<compile_context>
chip_gen: v5e
topology: v5e:2x2
jax: 0.10.0
libtpu: 0.0.40
codegen_flags: <defaults>
</compile_context>

<pallas_src>
import functools

import jax
import jax.numpy as jnp
from jax.experimental import pallas as pl
from jax.experimental.pallas import tpu as pltpu

EPS = 1e-5


def _compiler_params(semantics):
    return pltpu.CompilerParams(dimension_semantics=semantics,
                                vmem_limit_bytes=32 * 1024 * 1024)


# ---------------------------------------------------------------------------
# Wrapper glue: stride-2 parity-plane rearrangement (done once, on x only).
# Every 3x3/s2 tap then becomes a unit-stride static slice inside the kernel.
# ---------------------------------------------------------------------------
def _parity_planes(x_nchw):
    n, c, h, w = x_nchw.shape
    ho = (h - 1) // 2 + 1
    wo = (w - 1) // 2 + 1
    xp = jnp.pad(x_nchw, ((0, 0), (0, 0), (1, 2 * ho + 1 - h), (1, 2 * wo + 1 - w)))
    planes = jnp.stack([xp[:, :, a::2, b::2] for a in (0, 1) for b in (0, 1)], axis=2)
    return planes, ho, wo                 # (N, C, 4, Ho+1, Wo+1)


# ---------------------------------------------------------------------------
# K1: right-branch 1x1 conv (MXU) + BN1 batch-stat accumulation.
# ---------------------------------------------------------------------------
def _k1_conv_stats(x_ref, w_ref, gb_ref, ypre_ref, aff_ref, *, n_valid, bf16):
    n = pl.program_id(0)
    lhs = w_ref[...]                       # (Cr, Cin)
    rhs = x_ref[0]                         # (Cin, S)
    if bf16:
        lhs = lhs.astype(jnp.bfloat16)
        rhs = rhs.astype(jnp.bfloat16)
    y = jnp.dot(lhs, rhs, preferred_element_type=jnp.float32)      # (Cr, S)
    ypre_ref[0] = y

    @pl.when(n == 0)
    def _():
        aff_ref[...] = jnp.zeros_like(aff_ref)

    # pad-plane columns of y are exactly 0 (no conv bias) -> sums == valid sums.
    aff_ref[0] = aff_ref[0] + jnp.sum(y, axis=1, keepdims=True)
    aff_ref[1] = aff_ref[1] + jnp.sum(y * y, axis=1, keepdims=True)

    @pl.when(n == pl.num_programs(0) - 1)
    def _():
        mean = aff_ref[0] / n_valid
        var = jnp.maximum(aff_ref[1] / n_valid - mean * mean, 0.0)
        scale = gb_ref[0] * jax.lax.rsqrt(var + EPS)
        aff_ref[1] = gb_ref[1] - mean * scale
        aff_ref[0] = scale


# ---------------------------------------------------------------------------
# K2: BN1+ReLU on load, both depthwise 3x3/s2 convs, depthwise-BN stats.
# ---------------------------------------------------------------------------
def _k2_depthwise_stats(ypre_ref, xpl_ref, aff1_ref, mask_ref, wdr_ref, wdl_ref,
                        gbd_ref, u_ref, affd_ref, *, ho, wo, c_l, n_valid):
    n = pl.program_id(0)

    scale1 = aff1_ref[0]                   # (Cr, 1, 1)
    shift1 = aff1_ref[1]

    y_all = ypre_ref[0]                    # (Cr, 4, Hq, Wq)  pre-BN right activation
    x_all = xpl_ref[0]                     # (Cin, 4, Hq, Wq) zero-padded input planes

    # Stage-1 BN + ReLU, then zero out the conv-padding positions (mask).
    yplanes = [jnp.maximum(y_all[:, p] * scale1 + shift1, 0.0) * mask_ref[p]
               for p in range(4)]          # 4 x (Cr, Hq, Wq)
    xplanes = [x_all[:, p] for p in range(4)]                      # 4 x (Cin, Hq, Wq)

    def dw(planes, wd_ref):
        acc = None
        for di in range(3):
            for dj in range(3):
                p = (di % 2) * 2 + (dj % 2)
                tap = planes[p][:, di // 2:di // 2 + ho, dj // 2:dj // 2 + wo]
                term = wd_ref[di * 3 + dj] * tap                   # (C,1,1)*(C,Ho,Wo)
                acc = term if acc is None else acc + term
        return acc                                                  # (C, Ho, Wo)

    acc_l = dw(xplanes, wdl_ref)           # (Cin, Ho, Wo) left depthwise (pre-BN)
    acc_r = dw(yplanes, wdr_ref)           # (Cr,  Ho, Wo) right depthwise (pre-BN)

    u_ref[0, :c_l] = acc_l
    u_ref[0, c_l:] = acc_r

    def moments(a):
        s = jnp.sum(jnp.sum(a, axis=2, keepdims=True), axis=1, keepdims=True)
        ss = jnp.sum(jnp.sum(a * a, axis=2, keepdims=True), axis=1, keepdims=True)
        return s, ss

    s_l, ss_l = moments(acc_l)
    s_r, ss_r = moments(acc_r)

    @pl.when(n == 0)
    def _():
        affd_ref[...] = jnp.zeros_like(affd_ref)

    affd_ref[0, :c_l] = affd_ref[0, :c_l] + s_l
    affd_ref[0, c_l:] = affd_ref[0, c_l:] + s_r
    affd_ref[1, :c_l] = affd_ref[1, :c_l] + ss_l
    affd_ref[1, c_l:] = affd_ref[1, c_l:] + ss_r

    @pl.when(n == pl.num_programs(0) - 1)
    def _():
        mean = affd_ref[0] / n_valid
        var = jnp.maximum(affd_ref[1] / n_valid - mean * mean, 0.0)
        scale = gbd_ref[0] * jax.lax.rsqrt(var + EPS)
        affd_ref[1] = gbd_ref[1] - mean * scale
        affd_ref[0] = scale


# ---------------------------------------------------------------------------
# K3: merged final 1x1 conv (MXU) -> final-BN stat accumulation only.
# ---------------------------------------------------------------------------
def _k3_final_stats(u_ref, affd_ref, wm_ref, gbf_ref, afff_ref, *, n_valid, bf16):
    n = pl.program_id(0)
    u = u_ref[0] * affd_ref[0] + affd_ref[1]                       # (Ccat, P) post-dw-BN
    lhs = wm_ref[...]
    if bf16:
        lhs = lhs.astype(jnp.bfloat16)
        u = u.astype(jnp.bfloat16)
    pre = jnp.dot(lhs, u, preferred_element_type=jnp.float32)      # (Cout, P)

    @pl.when(n == 0)
    def _():
        afff_ref[...] = jnp.zeros_like(afff_ref)

    afff_ref[0] = afff_ref[0] + jnp.sum(pre, axis=1, keepdims=True)
    afff_ref[1] = afff_ref[1] + jnp.sum(pre * pre, axis=1, keepdims=True)

    @pl.when(n == pl.num_programs(0) - 1)
    def _():
        mean = afff_ref[0] / n_valid
        var = jnp.maximum(afff_ref[1] / n_valid - mean * mean, 0.0)
        scale = gbf_ref[0] * jax.lax.rsqrt(var + EPS)
        afff_ref[1] = gbf_ref[1] - mean * scale
        afff_ref[0] = scale


# ---------------------------------------------------------------------------
# K4: apply pass (fully parallel): dw-BN affine + merged 1x1 + final BN + ReLU.
# ---------------------------------------------------------------------------
def _k4_final_apply(u_ref, affd_ref, wm_ref, afff_ref, o_ref, *, bf16):
    u = u_ref[0] * affd_ref[0] + affd_ref[1]
    lhs = wm_ref[...]
    if bf16:
        lhs = lhs.astype(jnp.bfloat16)
        u = u.astype(jnp.bfloat16)
    pre = jnp.dot(lhs, u, preferred_element_type=jnp.float32)      # (Cout, P)
    o_ref[0] = jnp.maximum(pre * afff_ref[0] + afff_ref[1], 0.0)


# ---------------------------------------------------------------------------
# DownsampleUnit forward
# ---------------------------------------------------------------------------
def downsample_unit_forward(x_nchw, packed, *, matmul_bf16=False):
    n, cin, h, w = x_nchw.shape
    cr = packed["w1"].shape[0]
    ccat = packed["gbd"].shape[1]
    cout = packed["wm"].shape[0]

    xpl5, ho, wo = _parity_planes(x_nchw)                          # (N, Cin, 4, Hq, Wq)
    hq, wq = ho + 1, wo + 1
    s = 4 * hq * wq
    p_sp = ho * wo
    xpl_flat = xpl5.reshape(n, cin, s)                             # free row-major view

    # valid-pixel mask in parity layout (compile-time constant under jit)
    mask = _parity_planes(jnp.ones((1, 1, h, w), jnp.float32))[0].reshape(4, hq, wq)

    # --- K1: right 1x1 conv + BN1 stats ------------------------------------
    y_pre, aff1 = pl.pallas_call(
        functools.partial(_k1_conv_stats, n_valid=float(n * h * w), bf16=matmul_bf16),
        grid=(n,),
        in_specs=[
            pl.BlockSpec((1, cin, s), lambda i: (i, 0, 0)),
            pl.BlockSpec((cr, cin), lambda i: (0, 0)),
            pl.BlockSpec((2, cr, 1), lambda i: (0, 0, 0)),
        ],
        out_specs=[
            pl.BlockSpec((1, cr, s), lambda i: (i, 0, 0)),
            pl.BlockSpec((2, cr, 1), lambda i: (0, 0, 0)),
        ],
        out_shape=(
            jax.ShapeDtypeStruct((n, cr, s), jnp.float32),
            jax.ShapeDtypeStruct((2, cr, 1), jnp.float32),
        ),
        compiler_params=_compiler_params(("arbitrary",)),
    )(xpl_flat, packed["w1"], packed["gb1"])

    # --- K2: both depthwise convs + depthwise-BN stats ----------------------
    u_pre, affd = pl.pallas_call(
        functools.partial(_k2_depthwise_stats, ho=ho, wo=wo, c_l=cin,
                          n_valid=float(n * ho * wo)),
        grid=(n,),
        in_specs=[
            pl.BlockSpec((1, cr, 4, hq, wq), lambda i: (i, 0, 0, 0, 0)),
            pl.BlockSpec((1, cin, 4, hq, wq), lambda i: (i, 0, 0, 0, 0)),
            pl.BlockSpec((2, cr, 1, 1), lambda i: (0, 0, 0, 0)),
            pl.BlockSpec((4, hq, wq), lambda i: (0, 0, 0)),
            pl.BlockSpec((9, cr, 1, 1), lambda i: (0, 0, 0, 0)),
            pl.BlockSpec((9, cin, 1, 1), lambda i: (0, 0, 0, 0)),
            pl.BlockSpec((2, ccat, 1, 1), lambda i: (0, 0, 0, 0)),
        ],
        out_specs=[
            pl.BlockSpec((1, ccat, ho, wo), lambda i: (i, 0, 0, 0)),
            pl.BlockSpec((2, ccat, 1, 1), lambda i: (0, 0, 0, 0)),
        ],
        out_shape=(
            jax.ShapeDtypeStruct((n, ccat, ho, wo), jnp.float32),
            jax.ShapeDtypeStruct((2, ccat, 1, 1), jnp.float32),
        ),
        compiler_params=_compiler_params(("arbitrary",)),
    )(y_pre.reshape(n, cr, 4, hq, wq), xpl5,
      aff1.reshape(2, cr, 1, 1), mask,
      packed["wdr"], packed["wdl"], packed["gbd"])

    u_flat = u_pre.reshape(n, ccat, p_sp)                          # free views
    affd2 = affd.reshape(2, ccat, 1)

    # --- K3: final-BN stats --------------------------------------------------
    afff = pl.pallas_call(
        functools.partial(_k3_final_stats, n_valid=float(n * ho * wo), bf16=matmul_bf16),
        grid=(n,),
        in_specs=[
            pl.BlockSpec((1, ccat, p_sp), lambda i: (i, 0, 0)),
            pl.BlockSpec((2, ccat, 1), lambda i: (0, 0, 0)),
            pl.BlockSpec((cout, ccat), lambda i: (0, 0)),
            pl.BlockSpec((2, cout, 1), lambda i: (0, 0, 0)),
        ],
        out_specs=pl.BlockSpec((2, cout, 1), lambda i: (0, 0, 0)),
        out_shape=jax.ShapeDtypeStruct((2, cout, 1), jnp.float32),
        compiler_params=_compiler_params(("arbitrary",)),
    )(u_flat, affd2, packed["wm"], packed["gbf"])

    # --- K4: apply pass (lane-dense store, 'parallel' for megacore) ----------
    out = pl.pallas_call(
        functools.partial(_k4_final_apply, bf16=matmul_bf16),
        grid=(n,),
        in_specs=[
            pl.BlockSpec((1, ccat, p_sp), lambda i: (i, 0, 0)),
            pl.BlockSpec((2, ccat, 1), lambda i: (0, 0, 0)),
            pl.BlockSpec((cout, ccat), lambda i: (0, 0)),
            pl.BlockSpec((2, cout, 1), lambda i: (0, 0, 0)),
        ],
        out_specs=pl.BlockSpec((1, cout, p_sp), lambda i: (i, 0, 0)),
        out_shape=jax.ShapeDtypeStruct((n, cout, p_sp), jnp.float32),
        compiler_params=_compiler_params(("parallel",)),
    )(u_flat, affd2, packed["wm"], afff)

    return out.reshape(n, cout, ho, wo)                            # NCHW


# ---------------------------------------------------------------------------
# One-time weight packing (outside the jitted forward).
# concat + ChannelShuffle(groups=2) folded into the merged 1x1 weight:
#   left channel j -> output 2j, right channel j -> output 2j+1.
# Conv biases are dropped: a per-channel constant before training-mode BN
# cancels exactly in (y - mean) and leaves the variance unchanged.
# ---------------------------------------------------------------------------
def pack_params(params):
    r, l = params["right"], params["left"]
    cr, cin = r["w1"].shape
    cl = l["w1"].shape[0]
    cout = cl + cr

    wm = jnp.zeros((cout, cin + cr), jnp.float32)
    wm = wm.at[0::2, :cin].set(l["w1"]).at[1::2, cin:].set(r["w2"])
    gf = jnp.zeros((cout,), jnp.float32).at[0::2].set(l["g1"]).at[1::2].set(r["g2"])
    bf = jnp.zeros((cout,), jnp.float32).at[0::2].set(l["be1"]).at[1::2].set(r["be2"])

    return dict(
        w1=r["w1"],                                                 # (Cr, Cin)
        gb1=jnp.stack([r["g1"], r["be1"]])[:, :, None],             # (2, Cr, 1)
        wdr=r["wd"][:, :, None, None],                              # (9, Cr, 1, 1)
        wdl=l["wd"][:, :, None, None],                              # (9, Cin, 1, 1)
        gbd=jnp.stack([jnp.concatenate([l["gd"], r["gd"]]),
                       jnp.concatenate([l["bed"], r["bed"]])])[:, :, None, None],
        wm=wm,                                                      # (Cout, Cin+Cr)
        gbf=jnp.stack([gf, bf])[:, :, None],                        # (2, Cout, 1)
    )


# ---------------------------------------------------------------------------
# Deterministic parameter init (shapes dictated by DownsampleUnit.__init__).
# Conv biases kept for interface fidelity but unused (see pack_params note).
# ---------------------------------------------------------------------------
def init_params(key, in_channels, out_channels):
    cr = out_channels // 2
    cl = out_channels // 2
    keys = iter(jax.random.split(key, 40))

    def nrm(shape, scale=0.1):
        return scale * jax.random.normal(next(keys), shape, dtype=jnp.float32)

    right = dict(
        w1=nrm((cr, in_channels)), b1=nrm((cr,)), g1=1.0 + nrm((cr,)), be1=nrm((cr,)),
        wd=nrm((9, cr)), bd=nrm((cr,)), gd=1.0 + nrm((cr,)), bed=nrm((cr,)),
        w2=nrm((cr, cr)), b2=nrm((cr,)), g2=1.0 + nrm((cr,)), be2=nrm((cr,)),
    )
    left = dict(
        wd=nrm((9, in_channels)), bd=nrm((in_channels,)),
        gd=1.0 + nrm((in_channels,)), bed=nrm((in_channels,)),
        w1=nrm((cl, in_channels)), b1=nrm((cl,)), g1=1.0 + nrm((cl,)), be1=nrm((cl,)),
    )
    return dict(right=right, left=left)


if __name__ == "__main__":
    N, C_IN, H, W = 2, 4, 16, 16
    C_OUT = 8

    x = jax.random.normal(jax.random.PRNGKey(0), (N, C_IN, H, W), dtype=jnp.float32)
    params = init_params(jax.random.PRNGKey(1), C_IN, C_OUT)
    packed = pack_params(params)           # one-time packing, outside jit

    y = jax.jit(downsample_unit_forward)(x, packed)
    jax.block_until_ready(y)

    assert y.shape == (N, C_OUT, H // 2, W // 2), y.shape
    assert y.dtype == jnp.float32
    assert bool(jnp.all(jnp.isfinite(y)))
    print("KERNEL_OK")
</pallas_src>

<mosaic_0001>
module attributes {stable_mosaic.version = 11 : i64} {
  func.func @_k1_conv_stats(%arg0: i32, %arg1: memref<1x4x324xf32, #tpu.memory_space<vmem>>, %arg2: memref<4x4xf32, #tpu.memory_space<vmem>>, %arg3: memref<2x4x1xf32, #tpu.memory_space<vmem>>, %arg4: memref<1x4x324xf32, #tpu.memory_space<vmem>>, %arg5: memref<2x4x1xf32, #tpu.memory_space<vmem>>) attributes {dimension_semantics = [#tpu.dimension_semantics<arbitrary>], iteration_bounds = array<i64: 2>, scalar_prefetch = 0 : i64, scratch_operands = 0 : i64, tpu.core_type = #tpu.core_type<tc>, window_params = [{transform_indices = @transform_0, window_bounds = array<i64: 1, 4, 324>}, {pipeline_mode = #tpu.pipeline_mode<synchronous>, transform_indices = @transform_1, window_bounds = array<i64: 4, 4>}, {pipeline_mode = #tpu.pipeline_mode<synchronous>, transform_indices = @transform_2, window_bounds = array<i64: 2, 4, 1>}, {transform_indices = @transform_3, window_bounds = array<i64: 1, 4, 324>}, {pipeline_mode = #tpu.pipeline_mode<synchronous>, transform_indices = @transform_4, window_bounds = array<i64: 2, 4, 1>}]} {
    %c0 = arith.constant 0 : index
    %c0_0 = arith.constant 0 : index
    %0 = vector.load %arg2[%c0, %c0_0] : memref<4x4xf32, #tpu.memory_space<vmem>>, vector<4x4xf32>
    %c0_1 = arith.constant 0 : index
    %c0_2 = arith.constant 0 : index
    %c0_3 = arith.constant 0 : index
    %1 = vector.load %arg1[%c0_1, %c0_2, %c0_3] : memref<1x4x324xf32, #tpu.memory_space<vmem>>, vector<1x4x324xf32>
    %2 = vector.shape_cast %1 : vector<1x4x324xf32> to vector<4x324xf32>
    %cst = arith.constant dense<0.000000e+00> : vector<4x324xf32>
    %3 = tpu.matmul %0, %2, %cst {dimension_numbers = #tpu.dot_dimension_numbers<[1], [0], [0], [1], [0, 0, 1, 1], [], []>} : vector<4x4xf32>, vector<4x324xf32>, vector<4x324xf32> -> vector<4x324xf32>
    %c0_4 = arith.constant 0 : index
    %c0_5 = arith.constant 0 : index
    %c0_6 = arith.constant 0 : index
    %4 = vector.load %arg4[%c0_4, %c0_5, %c0_6] : memref<1x4x324xf32, #tpu.memory_space<vmem>>, vector<1x4x324xf32>
    %5 = vector.shape_cast %4 : vector<1x4x324xf32> to vector<4x324xf32>
    %6 = vector.shape_cast %3 : vector<4x324xf32> to vector<1x4x324xf32>
    tpu.vector_store %arg4[%c0_4, %c0_5, %c0_6], %6 {strides = array<i32>} : memref<1x4x324xf32, #tpu.memory_space<vmem>>, vector<1x4x324xf32>,
    %c0_i32 = arith.constant 0 : i32
    %7 = arith.cmpi eq, %arg0, %c0_i32 : i32
    %8 = arith.extui %7 : i1 to i32
    %c0_i32_7 = arith.constant 0 : i32
    %9 = arith.cmpi ne, %8, %c0_i32_7 : i32
    scf.if %9 {
      %cst_22 = arith.constant 0.000000e+00 : f32
      %30 = vector.broadcast %cst_22 : f32 to vector<2x4x1xf32>
      %c0_23 = arith.constant 0 : index
      %c0_24 = arith.constant 0 : index
      %c0_25 = arith.constant 0 : index
      %31 = vector.load %arg5[%c0_23, %c0_24, %c0_25] : memref<2x4x1xf32, #tpu.memory_space<vmem>>, vector<2x4x1xf32>
      tpu.vector_store %arg5[%c0_23, %c0_24, %c0_25], %30 {strides = array<i32>} : memref<2x4x1xf32, #tpu.memory_space<vmem>>, vector<2x4x1xf32>,
    } else {
    }
    %c0_8 = arith.constant 0 : index
    %c0_9 = arith.constant 0 : index
    %c0_10 = arith.constant 0 : index
    %10 = vector.load %arg5[%c0_8, %c0_9, %c0_10] : memref<2x4x1xf32, #tpu.memory_space<vmem>>, vector<1x4x1xf32>
    %11 = vector.shape_cast %10 : vector<1x4x1xf32> to vector<4x1xf32>
    %cst_11 = arith.constant dense<0.000000e+00> : vector<4xf32>
    %12 = vector.multi_reduction <add>, %3, %cst_11 [1] : vector<4x324xf32> to vector<4xf32>
    %13 = vector.shape_cast %12 : vector<4xf32> to vector<4x1xf32>
    %14 = arith.addf %11, %13 : vector<4x1xf32>
    %c0_12 = arith.constant 0 : index
    %c0_13 = arith.constant 0 : index
    %c0_14 = arith.constant 0 : index
    %15 = vector.load %arg5[%c0_12, %c0_13, %c0_14] : memref<2x4x1xf32, #tpu.memory_space<vmem>>, vector<1x4x1xf32>
    %16 = vector.shape_cast %15 : vector<1x4x1xf32> to vector<4x1xf32>
    %17 = vector.shape_cast %14 : vector<4x1xf32> to vector<1x4x1xf32>
    tpu.vector_store %arg5[%c0_12, %c0_13, %c0_14], %17 {strides = array<i32>} : memref<2x4x1xf32, #tpu.memory_space<vmem>>, vector<1x4x1xf32>,
    %c1 = arith.constant 1 : index
    %c0_15 = arith.constant 0 : index
    %c0_16 = arith.constant 0 : index
    %18 = vector.load %arg5[%c1, %c0_15, %c0_16] : memref<2x4x1xf32, #tpu.memory_space<vmem>>, vector<1x4x1xf32>
    %19 = vector.shape_cast %18 : vector<1x4x1xf32> to vector<4x1xf32>
    %20 = arith.mulf %3, %3 : vector<4x324xf32>
    %cst_17 = arith.constant dense<0.000000e+00> : vector<4xf32>
    %21 = vector.multi_reduction <add>, %20, %cst_17 [1] : vector<4x324xf32> to vector<4xf32>
    %22 = vector.shape_cast %21 : vector<4xf32> to vector<4x1xf32>
    %23 = arith.addf %19, %22 : vector<4x1xf32>
    %c1_18 = arith.constant 1 : index
    %c0_19 = arith.constant 0 : index
    %c0_20 = arith.constant 0 : index
    %24 = vector.load %arg5[%c1_18, %c0_19, %c0_20] : memref<2x4x1xf32, #tpu.memory_space<vmem>>, vector<1x4x1xf32>
    %25 = vector.shape_cast %24 : vector<1x4x1xf32> to vector<4x1xf32>
    %26 = vector.shape_cast %23 : vector<4x1xf32> to vector<1x4x1xf32>
    tpu.vector_store %arg5[%c1_18, %c0_19, %c0_20], %26 {strides = array<i32>} : memref<2x4x1xf32, #tpu.memory_space<vmem>>, vector<1x4x1xf32>,
    %c1_i32 = arith.constant 1 : i32
    %27 = arith.cmpi eq, %arg0, %c1_i32 : i32
    %28 = arith.extui %27 : i1 to i32
    %c0_i32_21 = arith.constant 0 : i32
    %29 = arith.cmpi ne, %28, %c0_i32_21 : i32
    scf.if %29 {
      %c0_22 = arith.constant 0 : index
      %c0_23 = arith.constant 0 : index
      %c0_24 = arith.constant 0 : index
      %30 = vector.load %arg5[%c0_22, %c0_23, %c0_24] : memref<2x4x1xf32, #tpu.memory_space<vmem>>, vector<1x4x1xf32>
      %31 = vector.shape_cast %30 : vector<1x4x1xf32> to vector<4x1xf32>
      %cst_25 = arith.constant 5.120000e+02 : f32
      %32 = vector.broadcast %cst_25 : f32 to vector<4x1xf32>
      %33 = arith.divf %31, %32 : vector<4x1xf32>
      %c1_26 = arith.constant 1 : index
      %c0_27 = arith.constant 0 : index
      %c0_28 = arith.constant 0 : index
      %34 = vector.load %arg5[%c1_26, %c0_27, %c0_28] : memref<2x4x1xf32, #tpu.memory_space<vmem>>, vector<1x4x1xf32>
      %35 = vector.shape_cast %34 : vector<1x4x1xf32> to vector<4x1xf32>
      %cst_29 = arith.constant 5.120000e+02 : f32
      %36 = vector.broadcast %cst_29 : f32 to vector<4x1xf32>
      %37 = arith.divf %35, %36 : vector<4x1xf32>
      %38 = arith.mulf %33, %33 : vector<4x1xf32>
      %39 = arith.subf %37, %38 : vector<4x1xf32>
      %cst_30 = arith.constant 0.000000e+00 : f32
      %40 = vector.broadcast %cst_30 : f32 to vector<4x1xf32>
      %41 = arith.maximumf %39, %40 : vector<4x1xf32>
      %c0_31 = arith.constant 0 : index
      %c0_32 = arith.constant 0 : index
      %c0_33 = arith.constant 0 : index
      %42 = vector.load %arg3[%c0_31, %c0_32, %c0_33] : memref<2x4x1xf32, #tpu.memory_space<vmem>>, vector<1x4x1xf32>
      %43 = vector.shape_cast %42 : vector<1x4x1xf32> to vector<4x1xf32>
      %cst_34 = arith.constant 9.99999974E-6 : f32
      %44 = vector.broadcast %cst_34 : f32 to vector<4x1xf32>
      %45 = arith.addf %41, %44 : vector<4x1xf32>
      %46 = math.rsqrt %45 : vector<4x1xf32>
      %47 = arith.mulf %43, %46 : vector<4x1xf32>
      %c1_35 = arith.constant 1 : index
      %c0_36 = arith.constant 0 : index
      %c0_37 = arith.constant 0 : index
      %48 = vector.load %arg3[%c1_35, %c0_36, %c0_37] : memref<2x4x1xf32, #tpu.memory_space<vmem>>, vector<1x4x1xf32>
      %49 = vector.shape_cast %48 : vector<1x4x1xf32> to vector<4x1xf32>
      %50 = arith.mulf %33, %47 : vector<4x1xf32>
      %51 = arith.subf %49, %50 : vector<4x1xf32>
      %c1_38 = arith.constant 1 : index
      %c0_39 = arith.constant 0 : index
      %c0_40 = arith.constant 0 : index
      %52 = vector.load %arg5[%c1_38, %c0_39, %c0_40] : memref<2x4x1xf32, #tpu.memory_space<vmem>>, vector<1x4x1xf32>
      %53 = vector.shape_cast %52 : vector<1x4x1xf32> to vector<4x1xf32>
      %54 = vector.shape_cast %51 : vector<4x1xf32> to vector<1x4x1xf32>
      tpu.vector_store %arg5[%c1_38, %c0_39, %c0_40], %54 {strides = array<i32>} : memref<2x4x1xf32, #tpu.memory_space<vmem>>, vector<1x4x1xf32>,
      %c0_41 = arith.constant 0 : index
      %c0_42 = arith.constant 0 : index
      %c0_43 = arith.constant 0 : index
      %55 = vector.load %arg5[%c0_41, %c0_42, %c0_43] : memref<2x4x1xf32, #tpu.memory_space<vmem>>, vector<1x4x1xf32>
      %56 = vector.shape_cast %55 : vector<1x4x1xf32> to vector<4x1xf32>
      %57 = vector.shape_cast %47 : vector<4x1xf32> to vector<1x4x1xf32>
      tpu.vector_store %arg5[%c0_41, %c0_42, %c0_43], %57 {strides = array<i32>} : memref<2x4x1xf32, #tpu.memory_space<vmem>>, vector<1x4x1xf32>,
    } else {
    }
    return
  }
  func.func @transform_0(%arg0: i32) -> (i32, i32, i32) {
    %c0_i32 = arith.constant 0 : i32
    %c0_i32_0 = arith.constant 0 : i32
    %c0_i32_1 = arith.constant 0 : i32
    return %arg0, %c0_i32, %c0_i32_0 : i32, i32, i32
  }
  func.func @transform_1(%arg0: i32) -> (i32, i32) {
    %c0_i32 = arith.constant 0 : i32
    %c0_i32_0 = arith.constant 0 : i32
    %c0_i32_1 = arith.constant 0 : i32
    return %c0_i32, %c0_i32_0 : i32, i32
  }
  func.func @transform_2(%arg0: i32) -> (i32, i32, i32) {
    %c0_i32 = arith.constant 0 : i32
    %c0_i32_0 = arith.constant 0 : i32
    %c0_i32_1 = arith.constant 0 : i32
    %c0_i32_2 = arith.constant 0 : i32
    return %c0_i32, %c0_i32_0, %c0_i32_1 : i32, i32, i32
  }
  func.func @transform_3(%arg0: i32) -> (i32, i32, i32) {
    %c0_i32 = arith.constant 0 : i32
    %c0_i32_0 = arith.constant 0 : i32
    %c0_i32_1 = arith.constant 0 : i32
    return %arg0, %c0_i32, %c0_i32_0 : i32, i32, i32
  }
  func.func @transform_4(%arg0: i32) -> (i32, i32, i32) {
    %c0_i32 = arith.constant 0 : i32
    %c0_i32_0 = arith.constant 0 : i32
    %c0_i32_1 = arith.constant 0 : i32
    %c0_i32_2 = arith.constant 0 : i32
    return %c0_i32, %c0_i32_0, %c0_i32_1 : i32, i32, i32
  }
}

module attributes {stable_mosaic.version = 11 : i64} {
  func.func @_k3_final_stats(%arg0: i32, %arg1: memref<1x8x64xf32, #tpu.memory_space<vmem>>, %arg2: memref<2x8x1xf32, #tpu.memory_space<vmem>>, %arg3: memref<8x8xf32, #tpu.memory_space<vmem>>, %arg4: memref<2x8x1xf32, #tpu.memory_space<vmem>>, %arg5: memref<2x8x1xf32, #tpu.memory_space<vmem>>) attributes {dimension_semantics = [#tpu.dimension_semantics<arbitrary>], iteration_bounds = array<i64: 2>, scalar_prefetch = 0 : i64, scratch_operands = 0 : i64, tpu.core_type = #tpu.core_type<tc>, window_params = [{transform_indices = @transform_0, window_bounds = array<i64: 1, 8, 64>}, {pipeline_mode = #tpu.pipeline_mode<synchronous>, transform_indices = @transform_1, window_bounds = array<i64: 2, 8, 1>}, {pipeline_mode = #tpu.pipeline_mode<synchronous>, transform_indices = @transform_2, window_bounds = array<i64: 8, 8>}, {pipeline_mode = #tpu.pipeline_mode<synchronous>, transform_indices = @transform_3, window_bounds = array<i64: 2, 8, 1>}, {pipeline_mode = #tpu.pipeline_mode<synchronous>, transform_indices = @transform_4, window_bounds = array<i64: 2, 8, 1>}]} {
    %c0 = arith.constant 0 : index
    %c0_0 = arith.constant 0 : index
    %c0_1 = arith.constant 0 : index
    %0 = vector.load %arg1[%c0, %c0_0, %c0_1] : memref<1x8x64xf32, #tpu.memory_space<vmem>>, vector<1x8x64xf32>
    %1 = vector.shape_cast %0 : vector<1x8x64xf32> to vector<8x64xf32>
    %c0_2 = arith.constant 0 : index
    %c0_3 = arith.constant 0 : index
    %c0_4 = arith.constant 0 : index
    %2 = vector.load %arg2[%c0_2, %c0_3, %c0_4] : memref<2x8x1xf32, #tpu.memory_space<vmem>>, vector<1x8x1xf32>
    %3 = vector.shape_cast %2 : vector<1x8x1xf32> to vector<8x1xf32>
    %4 = vector.broadcast %3 : vector<8x1xf32> to vector<8x64xf32>
    %5 = arith.mulf %1, %4 : vector<8x64xf32>
    %c1 = arith.constant 1 : index
    %c0_5 = arith.constant 0 : index
    %c0_6 = arith.constant 0 : index
    %6 = vector.load %arg2[%c1, %c0_5, %c0_6] : memref<2x8x1xf32, #tpu.memory_space<vmem>>, vector<1x8x1xf32>
    %7 = vector.shape_cast %6 : vector<1x8x1xf32> to vector<8x1xf32>
    %8 = vector.broadcast %7 : vector<8x1xf32> to vector<8x64xf32>
    %9 = arith.addf %5, %8 : vector<8x64xf32>
    %c0_7 = arith.constant 0 : index
    %c0_8 = arith.constant 0 : index
    %10 = vector.load %arg3[%c0_7, %c0_8] : memref<8x8xf32, #tpu.memory_space<vmem>>, vector<8x8xf32>
    %cst = arith.constant dense<0.000000e+00> : vector<8x64xf32>
    %11 = tpu.matmul %10, %9, %cst {dimension_numbers = #tpu.dot_dimension_numbers<[1], [0], [0], [1], [0, 0, 1, 1], [], []>} : vector<8x8xf32>, vector<8x64xf32>, vector<8x64xf32> -> vector<8x64xf32>
    %c0_i32 = arith.constant 0 : i32
    %12 = arith.cmpi eq, %arg0, %c0_i32 : i32
    %13 = arith.extui %12 : i1 to i32
    %c0_i32_9 = arith.constant 0 : i32
    %14 = arith.cmpi ne, %13, %c0_i32_9 : i32
    scf.if %14 {
      %cst_25 = arith.constant 0.000000e+00 : f32
      %35 = vector.broadcast %cst_25 : f32 to vector<2x8x1xf32>
      %c0_26 = arith.constant 0 : index
      %c0_27 = arith.constant 0 : index
      %c0_28 = arith.constant 0 : index
      %36 = vector.load %arg5[%c0_26, %c0_27, %c0_28] : memref<2x8x1xf32, #tpu.memory_space<vmem>>, vector<2x8x1xf32>
      tpu.vector_store %arg5[%c0_26, %c0_27, %c0_28], %35 {strides = array<i32>} : memref<2x8x1xf32, #tpu.memory_space<vmem>>, vector<2x8x1xf32>,
    } else {
    }
    %c0_10 = arith.constant 0 : index
    %c0_11 = arith.constant 0 : index
    %c0_12 = arith.constant 0 : index
    %15 = vector.load %arg5[%c0_10, %c0_11, %c0_12] : memref<2x8x1xf32, #tpu.memory_space<vmem>>, vector<1x8x1xf32>
    %16 = vector.shape_cast %15 : vector<1x8x1xf32> to vector<8x1xf32>
    %cst_13 = arith.constant dense<0.000000e+00> : vector<8xf32>
    %17 = vector.multi_reduction <add>, %11, %cst_13 [1] : vector<8x64xf32> to vector<8xf32>
    %18 = vector.shape_cast %17 : vector<8xf32> to vector<8x1xf32>
    %19 = arith.addf %16, %18 : vector<8x1xf32>
    %c0_14 = arith.constant 0 : index
    %c0_15 = arith.constant 0 : index
    %c0_16 = arith.constant 0 : index
    %20 = vector.load %arg5[%c0_14, %c0_15, %c0_16] : memref<2x8x1xf32, #tpu.memory_space<vmem>>, vector<1x8x1xf32>
    %21 = vector.shape_cast %20 : vector<1x8x1xf32> to vector<8x1xf32>
    %22 = vector.shape_cast %19 : vector<8x1xf32> to vector<1x8x1xf32>
    tpu.vector_store %arg5[%c0_14, %c0_15, %c0_16], %22 {strides = array<i32>} : memref<2x8x1xf32, #tpu.memory_space<vmem>>, vector<1x8x1xf32>,
    %c1_17 = arith.constant 1 : index
    %c0_18 = arith.constant 0 : index
    %c0_19 = arith.constant 0 : index
    %23 = vector.load %arg5[%c1_17, %c0_18, %c0_19] : memref<2x8x1xf32, #tpu.memory_space<vmem>>, vector<1x8x1xf32>
    %24 = vector.shape_cast %23 : vector<1x8x1xf32> to vector<8x1xf32>
    %25 = arith.mulf %11, %11 : vector<8x64xf32>
    %cst_20 = arith.constant dense<0.000000e+00> : vector<8xf32>
    %26 = vector.multi_reduction <add>, %25, %cst_20 [1] : vector<8x64xf32> to vector<8xf32>
    %27 = vector.shape_cast %26 : vector<8xf32> to vector<8x1xf32>
    %28 = arith.addf %24, %27 : vector<8x1xf32>
    %c1_21 = arith.constant 1 : index
    %c0_22 = arith.constant 0 : index
    %c0_23 = arith.constant 0 : index
    %29 = vector.load %arg5[%c1_21, %c0_22, %c0_23] : memref<2x8x1xf32, #tpu.memory_space<vmem>>, vector<1x8x1xf32>
    %30 = vector.shape_cast %29 : vector<1x8x1xf32> to vector<8x1xf32>
    %31 = vector.shape_cast %28 : vector<8x1xf32> to vector<1x8x1xf32>
    tpu.vector_store %arg5[%c1_21, %c0_22, %c0_23], %31 {strides = array<i32>} : memref<2x8x1xf32, #tpu.memory_space<vmem>>, vector<1x8x1xf32>,
    %c1_i32 = arith.constant 1 : i32
    %32 = arith.cmpi eq, %arg0, %c1_i32 : i32
    %33 = arith.extui %32 : i1 to i32
    %c0_i32_24 = arith.constant 0 : i32
    %34 = arith.cmpi ne, %33, %c0_i32_24 : i32
    scf.if %34 {
      %c0_25 = arith.constant 0 : index
      %c0_26 = arith.constant 0 : index
      %c0_27 = arith.constant 0 : index
      %35 = vector.load %arg5[%c0_25, %c0_26, %c0_27] : memref<2x8x1xf32, #tpu.memory_space<vmem>>, vector<1x8x1xf32>
      %36 = vector.shape_cast %35 : vector<1x8x1xf32> to vector<8x1xf32>
      %cst_28 = arith.constant 1.280000e+02 : f32
      %37 = vector.broadcast %cst_28 : f32 to vector<8x1xf32>
      %38 = arith.divf %36, %37 : vector<8x1xf32>
      %c1_29 = arith.constant 1 : index
      %c0_30 = arith.constant 0 : index
      %c0_31 = arith.constant 0 : index
      %39 = vector.load %arg5[%c1_29, %c0_30, %c0_31] : memref<2x8x1xf32, #tpu.memory_space<vmem>>, vector<1x8x1xf32>
      %40 = vector.shape_cast %39 : vector<1x8x1xf32> to vector<8x1xf32>
      %cst_32 = arith.constant 1.280000e+02 : f32
      %41 = vector.broadcast %cst_32 : f32 to vector<8x1xf32>
      %42 = arith.divf %40, %41 : vector<8x1xf32>
      %43 = arith.mulf %38, %38 : vector<8x1xf32>
      %44 = arith.subf %42, %43 : vector<8x1xf32>
      %cst_33 = arith.constant 0.000000e+00 : f32
      %45 = vector.broadcast %cst_33 : f32 to vector<8x1xf32>
      %46 = arith.maximumf %44, %45 : vector<8x1xf32>
      %c0_34 = arith.constant 0 : index
      %c0_35 = arith.constant 0 : index
      %c0_36 = arith.constant 0 : index
      %47 = vector.load %arg4[%c0_34, %c0_35, %c0_36] : memref<2x8x1xf32, #tpu.memory_space<vmem>>, vector<1x8x1xf32>
      %48 = vector.shape_cast %47 : vector<1x8x1xf32> to vector<8x1xf32>
      %cst_37 = arith.constant 9.99999974E-6 : f32
      %49 = vector.broadcast %cst_37 : f32 to vector<8x1xf32>
      %50 = arith.addf %46, %49 : vector<8x1xf32>
      %51 = math.rsqrt %50 : vector<8x1xf32>
      %52 = arith.mulf %48, %51 : vector<8x1xf32>
      %c1_38 = arith.constant 1 : index
      %c0_39 = arith.constant 0 : index
      %c0_40 = arith.constant 0 : index
      %53 = vector.load %arg4[%c1_38, %c0_39, %c0_40] : memref<2x8x1xf32, #tpu.memory_space<vmem>>, vector<1x8x1xf32>
      %54 = vector.shape_cast %53 : vector<1x8x1xf32> to vector<8x1xf32>
      %55 = arith.mulf %38, %52 : vector<8x1xf32>
      %56 = arith.subf %54, %55 : vector<8x1xf32>
      %c1_41 = arith.constant 1 : index
      %c0_42 = arith.constant 0 : index
      %c0_43 = arith.constant 0 : index
      %57 = vector.load %arg5[%c1_41, %c0_42, %c0_43] : memref<2x8x1xf32, #tpu.memory_space<vmem>>, vector<1x8x1xf32>
      %58 = vector.shape_cast %57 : vector<1x8x1xf32> to vector<8x1xf32>
      %59 = vector.shape_cast %56 : vector<8x1xf32> to vector<1x8x1xf32>
      tpu.vector_store %arg5[%c1_41, %c0_42, %c0_43], %59 {strides = array<i32>} : memref<2x8x1xf32, #tpu.memory_space<vmem>>, vector<1x8x1xf32>,
      %c0_44 = arith.constant 0 : index
      %c0_45 = arith.constant 0 : index
      %c0_46 = arith.constant 0 : index
      %60 = vector.load %arg5[%c0_44, %c0_45, %c0_46] : memref<2x8x1xf32, #tpu.memory_space<vmem>>, vector<1x8x1xf32>
      %61 = vector.shape_cast %60 : vector<1x8x1xf32> to vector<8x1xf32>
      %62 = vector.shape_cast %52 : vector<8x1xf32> to vector<1x8x1xf32>
      tpu.vector_store %arg5[%c0_44, %c0_45, %c0_46], %62 {strides = array<i32>} : memref<2x8x1xf32, #tpu.memory_space<vmem>>, vector<1x8x1xf32>,
    } else {
    }
    return
  }
  func.func @transform_0(%arg0: i32) -> (i32, i32, i32) {
    %c0_i32 = arith.constant 0 : i32
    %c0_i32_0 = arith.constant 0 : i32
    %c0_i32_1 = arith.constant 0 : i32
    return %arg0, %c0_i32, %c0_i32_0 : i32, i32, i32
  }
  func.func @transform_1(%arg0: i32) -> (i32, i32, i32) {
    %c0_i32 = arith.constant 0 : i32
    %c0_i32_0 = arith.constant 0 : i32
    %c0_i32_1 = arith.constant 0 : i32
    %c0_i32_2 = arith.constant 0 : i32
    return %c0_i32, %c0_i32_0, %c0_i32_1 : i32, i32, i32
  }
  func.func @transform_2(%arg0: i32) -> (i32, i32) {
    %c0_i32 = arith.constant 0 : i32
    %c0_i32_0 = arith.constant 0 : i32
    %c0_i32_1 = arith.constant 0 : i32
    return %c0_i32, %c0_i32_0 : i32, i32
  }
  func.func @transform_3(%arg0: i32) -> (i32, i32, i32) {
    %c0_i32 = arith.constant 0 : i32
    %c0_i32_0 = arith.constant 0 : i32
    %c0_i32_1 = arith.constant 0 : i32
    %c0_i32_2 = arith.constant 0 : i32
    return %c0_i32, %c0_i32_0, %c0_i32_1 : i32, i32, i32
  }
  func.func @transform_4(%arg0: i32) -> (i32, i32, i32) {
    %c0_i32 = arith.constant 0 : i32
    %c0_i32_0 = arith.constant 0 : i32
    %c0_i32_1 = arith.constant 0 : i32
    %c0_i32_2 = arith.constant 0 : i32
    return %c0_i32, %c0_i32_0, %c0_i32_1 : i32, i32, i32
  }
}

module attributes {stable_mosaic.version = 11 : i64} {
  func.func @_k2_depthwise_stats(%arg0: i32, %arg1: memref<1x4x4x9x9xf32, #tpu.memory_space<vmem>>, %arg2: memref<1x4x4x9x9xf32, #tpu.memory_space<vmem>>, %arg3: memref<2x4x1x1xf32, #tpu.memory_space<vmem>>, %arg4: memref<4x9x9xf32, #tpu.memory_space<vmem>>, %arg5: memref<9x4x1x1xf32, #tpu.memory_space<vmem>>, %arg6: memref<9x4x1x1xf32, #tpu.memory_space<vmem>>, %arg7: memref<2x8x1x1xf32, #tpu.memory_space<vmem>>, %arg8: memref<1x8x8x8xf32, #tpu.memory_space<vmem>>, %arg9: memref<2x8x1x1xf32, #tpu.memory_space<vmem>>) attributes {dimension_semantics = [#tpu.dimension_semantics<arbitrary>], iteration_bounds = array<i64: 2>, scalar_prefetch = 0 : i64, scratch_operands = 0 : i64, tpu.core_type = #tpu.core_type<tc>, window_params = [{transform_indices = @transform_0, window_bounds = array<i64: 1, 4, 4, 9, 9>}, {transform_indices = @transform_1, window_bounds = array<i64: 1, 4, 4, 9, 9>}, {pipeline_mode = #tpu.pipeline_mode<synchronous>, transform_indices = @transform_2, window_bounds = array<i64: 2, 4, 1, 1>}, {pipeline_mode = #tpu.pipeline_mode<synchronous>, transform_indices = @transform_3, window_bounds = array<i64: 4, 9, 9>}, {pipeline_mode = #tpu.pipeline_mode<synchronous>, transform_indices = @transform_4, window_bounds = array<i64: 9, 4, 1, 1>}, {pipeline_mode = #tpu.pipeline_mode<synchronous>, transform_indices = @transform_5, window_bounds = array<i64: 9, 4, 1, 1>}, {pipeline_mode = #tpu.pipeline_mode<synchronous>, transform_indices = @transform_6, window_bounds = array<i64: 2, 8, 1, 1>}, {transform_indices = @transform_7, window_bounds = array<i64: 1, 8, 8, 8>}, {pipeline_mode = #tpu.pipeline_mode<synchronous>, transform_indices = @transform_8, window_bounds = array<i64: 2, 8, 1, 1>}]} {
    %c0 = arith.constant 0 : index
    %c0_0 = arith.constant 0 : index
    %c0_1 = arith.constant 0 : index
    %c0_2 = arith.constant 0 : index
    %0 = vector.load %arg3[%c0, %c0_0, %c0_1, %c0_2] : memref<2x4x1x1xf32, #tpu.memory_space<vmem>>, vector<1x4x1x1xf32>
    %1 = vector.shape_cast %0 : vector<1x4x1x1xf32> to vector<4x1x1xf32>
    %c1 = arith.constant 1 : index
    %c0_3 = arith.constant 0 : index
    %c0_4 = arith.constant 0 : index
    %c0_5 = arith.constant 0 : index
    %2 = vector.load %arg3[%c1, %c0_3, %c0_4, %c0_5] : memref<2x4x1x1xf32, #tpu.memory_space<vmem>>, vector<1x4x1x1xf32>
    %3 = vector.shape_cast %2 : vector<1x4x1x1xf32> to vector<4x1x1xf32>
    %c0_6 = arith.constant 0 : index
    %c0_7 = arith.constant 0 : index
    %c0_8 = arith.constant 0 : index
    %c0_9 = arith.constant 0 : index
    %c0_10 = arith.constant 0 : index
    %4 = vector.load %arg1[%c0_6, %c0_7, %c0_8, %c0_9, %c0_10] : memref<1x4x4x9x9xf32, #tpu.memory_space<vmem>>, vector<1x4x4x9x9xf32>
    %5 = vector.shape_cast %4 : vector<1x4x4x9x9xf32> to vector<4x4x9x9xf32>
    %c0_11 = arith.constant 0 : index
    %c0_12 = arith.constant 0 : index
    %c0_13 = arith.constant 0 : index
    %c0_14 = arith.constant 0 : index
    %c0_15 = arith.constant 0 : index
    %6 = vector.load %arg2[%c0_11, %c0_12, %c0_13, %c0_14, %c0_15] : memref<1x4x4x9x9xf32, #tpu.memory_space<vmem>>, vector<1x4x4x9x9xf32>
    %7 = vector.shape_cast %6 : vector<1x4x4x9x9xf32> to vector<4x4x9x9xf32>
    %8 = vector.extract_strided_slice %5 {offsets = [0, 0, 0, 0], sizes = [4, 1, 9, 9], strides = [1, 1, 1, 1]} : vector<4x4x9x9xf32> to vector<4x1x9x9xf32>
    %9 = vector.shape_cast %8 : vector<4x1x9x9xf32> to vector<4x9x9xf32>
    %10 = vector.broadcast %1 : vector<4x1x1xf32> to vector<4x9x9xf32>
    %11 = arith.mulf %9, %10 : vector<4x9x9xf32>
    %12 = vector.broadcast %3 : vector<4x1x1xf32> to vector<4x9x9xf32>
    %13 = arith.addf %11, %12 : vector<4x9x9xf32>
    %cst = arith.constant 0.000000e+00 : f32
    %14 = vector.broadcast %cst : f32 to vector<4x9x9xf32>
    %15 = arith.maximumf %13, %14 : vector<4x9x9xf32>
    %c0_16 = arith.constant 0 : index
    %c0_17 = arith.constant 0 : index
    %c0_18 = arith.constant 0 : index
    %16 = vector.load %arg4[%c0_16, %c0_17, %c0_18] : memref<4x9x9xf32, #tpu.memory_space<vmem>>, vector<1x9x9xf32>
    %17 = vector.shape_cast %16 : vector<1x9x9xf32> to vector<9x9xf32>
    %18 = vector.shape_cast %17 : vector<9x9xf32> to vector<1x9x9xf32>
    %19 = vector.broadcast %18 : vector<1x9x9xf32> to vector<4x9x9xf32>
    %20 = arith.mulf %15, %19 : vector<4x9x9xf32>
    %21 = vector.extract_strided_slice %5 {offsets = [0, 1, 0, 0], sizes = [4, 1, 9, 9], strides = [1, 1, 1, 1]} : vector<4x4x9x9xf32> to vector<4x1x9x9xf32>
    %22 = vector.shape_cast %21 : vector<4x1x9x9xf32> to vector<4x9x9xf32>
    %23 = vector.broadcast %1 : vector<4x1x1xf32> to vector<4x9x9xf32>
    %24 = arith.mulf %22, %23 : vector<4x9x9xf32>
    %25 = vector.broadcast %3 : vector<4x1x1xf32> to vector<4x9x9xf32>
    %26 = arith.addf %24, %25 : vector<4x9x9xf32>
    %cst_19 = arith.constant 0.000000e+00 : f32
    %27 = vector.broadcast %cst_19 : f32 to vector<4x9x9xf32>
    %28 = arith.maximumf %26, %27 : vector<4x9x9xf32>
    %c1_20 = arith.constant 1 : index
    %c0_21 = arith.constant 0 : index
    %c0_22 = arith.constant 0 : index
    %29 = vector.load %arg4[%c1_20, %c0_21, %c0_22] : memref<4x9x9xf32, #tpu.memory_space<vmem>>, vector<1x9x9xf32>
    %30 = vector.shape_cast %29 : vector<1x9x9xf32> to vector<9x9xf32>
    %31 = vector.shape_cast %30 : vector<9x9xf32> to vector<1x9x9xf32>
    %32 = vector.broadcast %31 : vector<1x9x9xf32> to vector<4x9x9xf32>
    %33 = arith.mulf %28, %32 : vector<4x9x9xf32>
    %34 = vector.extract_strided_slice %5 {offsets = [0, 2, 0, 0], sizes = [4, 1, 9, 9], strides = [1, 1, 1, 1]} : vector<4x4x9x9xf32> to vector<4x1x9x9xf32>
    %35 = vector.shape_cast %34 : vector<4x1x9x9xf32> to vector<4x9x9xf32>
    %36 = vector.broadcast %1 : vector<4x1x1xf32> to vector<4x9x9xf32>
    %37 = arith.mulf %35, %36 : vector<4x9x9xf32>
    %38 = vector.broadcast %3 : vector<4x1x1xf32> to vector<4x9x9xf32>
    %39 = arith.addf %37, %38 : vector<4x9x9xf32>
    %cst_23 = arith.constant 0.000000e+00 : f32
    %40 = vector.broadcast %cst_23 : f32 to vector<4x9x9xf32>
    %41 = arith.maximumf %39, %40 : vector<4x9x9xf32>
    %c2 = arith.constant 2 : index
    %c0_24 = arith.constant 0 : index
    %c0_25 = arith.constant 0 : index
    %42 = vector.load %arg4[%c2, %c0_24, %c0_25] : memref<4x9x9xf32, #tpu.memory_space<vmem>>, vector<1x9x9xf32>
    %43 = vector.shape_cast %42 : vector<1x9x9xf32> to vector<9x9xf32>
    %44 = vector.shape_cast %43 : vector<9x9xf32> to vector<1x9x9xf32>
    %45 = vector.broadcast %44 : vector<1x9x9xf32> to vector<4x9x9xf32>
    %46 = arith.mulf %41, %45 : vector<4x9x9xf32>
    %47 = vector.extract_strided_slice %5 {offsets = [0, 3, 0, 0], sizes = [4, 1, 9, 9], strides = [1, 1, 1, 1]} : vector<4x4x9x9xf32> to vector<4x1x9x9xf32>
    %48 = vector.shape_cast %47 : vector<4x1x9x9xf32> to vector<4x9x9xf32>
    %49 = vector.broadcast %1 : vector<4x1x1xf32> to vector<4x9x9xf32>
    %50 = arith.mulf %48, %49 : vector<4x9x9xf32>
    %51 = vector.broadcast %3 : vector<4x1x1xf32> to vector<4x9x9xf32>
    %52 = arith.addf %50, %51 : vector<4x9x9xf32>
    %cst_26 = arith.constant 0.000000e+00 : f32
    %53 = vector.broadcast %cst_26 : f32 to vector<4x9x9xf32>
    %54 = arith.maximumf %52, %53 : vector<4x9x9xf32>
    %c3 = arith.constant 3 : index
    %c0_27 = arith.constant 0 : index
    %c0_28 = arith.constant 0 : index
    %55 = vector.load %arg4[%c3, %c0_27, %c0_28] : memref<4x9x9xf32, #tpu.memory_space<vmem>>, vector<1x9x9xf32>
    %56 = vector.shape_cast %55 : vector<1x9x9xf32> to vector<9x9xf32>
    %57 = vector.shape_cast %56 : vector<9x9xf32> to vector<1x9x9xf32>
    %58 = vector.broadcast %57 : vector<1x9x9xf32> to vector<4x9x9xf32>
    %59 = arith.mulf %54, %58 : vector<4x9x9xf32>
    %60 = vector.extract_strided_slice %7 {offsets = [0, 0, 0, 0], sizes = [4, 1, 9, 9], strides = [1, 1, 1, 1]} : vector<4x4x9x9xf32> to vector<4x1x9x9xf32>
    %61 = vector.shape_cast %60 : vector<4x1x9x9xf32> to vector<4x9x9xf32>
    %62 = vector.extract_strided_slice %7 {offsets = [0, 1, 0, 0], sizes = [4, 1, 9, 9], strides = [1, 1, 1, 1]} : vector<4x4x9x9xf32> to vector<4x1x9x9xf32>
    %63 = vector.shape_cast %62 : vector<4x1x9x9xf32> to vector<4x9x9xf32>
    %64 = vector.extract_strided_slice %7 {offsets = [0, 2, 0, 0], sizes = [4, 1, 9, 9], strides = [1, 1, 1, 1]} : vector<4x4x9x9xf32> to vector<4x1x9x9xf32>
    %65 = vector.shape_cast %64 : vector<4x1x9x9xf32> to vector<4x9x9xf32>
    %66 = vector.extract_strided_slice %7 {offsets = [0, 3, 0, 0], sizes = [4, 1, 9, 9], strides = [1, 1, 1, 1]} : vector<4x4x9x9xf32> to vector<4x1x9x9xf32>
    %67 = vector.shape_cast %66 : vector<4x1x9x9xf32> to vector<4x9x9xf32>
    %68 = vector.extract_strided_slice %61 {offsets = [0, 0, 0], sizes = [4, 8, 8], strides = [1, 1, 1]} : vector<4x9x9xf32> to vector<4x8x8xf32>
    %c0_29 = arith.constant 0 : index
    %c0_30 = arith.constant 0 : index
    %c0_31 = arith.constant 0 : index
    %c0_32 = arith.constant 0 : index
    %69 = vector.load %arg6[%c0_29, %c0_30, %c0_31, %c0_32] : memref<9x4x1x1xf32, #tpu.memory_space<vmem>>, vector<1x4x1x1xf32>
    %70 = vector.shape_cast %69 : vector<1x4x1x1xf32> to vector<4x1x1xf32>
    %71 = vector.broadcast %70 : vector<4x1x1xf32> to vector<4x8x8xf32>
    %72 = arith.mulf %71, %68 : vector<4x8x8xf32>
    %73 = vector.extract_strided_slice %63 {offsets = [0, 0, 0], sizes = [4, 8, 8], strides = [1, 1, 1]} : vector<4x9x9xf32> to vector<4x8x8xf32>
    %c1_33 = arith.constant 1 : index
    %c0_34 = arith.constant 0 : index
    %c0_35 = arith.constant 0 : index
    %c0_36 = arith.constant 0 : index
    %74 = vector.load %arg6[%c1_33, %c0_34, %c0_35, %c0_36] : memref<9x4x1x1xf32, #tpu.memory_space<vmem>>, vector<1x4x1x1xf32>
    %75 = vector.shape_cast %74 : vector<1x4x1x1xf32> to vector<4x1x1xf32>
    %76 = vector.broadcast %75 : vector<4x1x1xf32> to vector<4x8x8xf32>
    %77 = arith.mulf %76, %73 : vector<4x8x8xf32>
    %78 = arith.addf %72, %77 : vector<4x8x8xf32>
    %79 = vector.extract_strided_slice %61 {offsets = [0, 0, 1], sizes = [4, 8, 8], strides = [1, 1, 1]} : vector<4x9x9xf32> to vector<4x8x8xf32>
    %c2_37 = arith.constant 2 : index
    %c0_38 = arith.constant 0 : index
    %c0_39 = arith.constant 0 : index
    %c0_40 = arith.constant 0 : index
    %80 = vector.load %arg6[%c2_37, %c0_38, %c0_39, %c0_40] : memref<9x4x1x1xf32, #tpu.memory_space<vmem>>, vector<1x4x1x1xf32>
    %81 = vector.shape_cast %80 : vector<1x4x1x1xf32> to vector<4x1x1xf32>
    %82 = vector.broadcast %81 : vector<4x1x1xf32> to vector<4x8x8xf32>
    %83 = arith.mulf %82, %79 : vector<4x8x8xf32>
    %84 = arith.addf %78, %83 : vector<4x8x8xf32>
    %85 = vector.extract_strided_slice %65 {offsets = [0, 0, 0], sizes = [4, 8, 8], strides = [1, 1, 1]} : vector<4x9x9xf32> to vector<4x8x8xf32>
    %c3_41 = arith.constant 3 : index
    %c0_42 = arith.constant 0 : index
    %c0_43 = arith.constant 0 : index
    %c0_44 = arith.constant 0 : index
    %86 = vector.load %arg6[%c3_41, %c0_42, %c0_43, %c0_44] : memref<9x4x1x1xf32, #tpu.memory_space<vmem>>, vector<1x4x1x1xf32>
    %87 = vector.shape_cast %86 : vector<1x4x1x1xf32> to vector<4x1x1xf32>
    %88 = vector.broadcast %87 : vector<4x1x1xf32> to vector<4x8x8xf32>
    %89 = arith.mulf %88, %85 : vector<4x8x8xf32>
    %90 = arith.addf %84, %89 : vector<4x8x8xf32>
    %91 = vector.extract_strided_slice %67 {offsets = [0, 0, 0], sizes = [4, 8, 8], strides = [1, 1, 1]} : vector<4x9x9xf32> to vector<4x8x8xf32>
    %c4 = arith.constant 4 : index
    %c0_45 = arith.constant 0 : index
    %c0_46 = arith.constant 0 : index
    %c0_47 = arith.constant 0 : index
    %92 = vector.load %arg6[%c4, %c0_45, %c0_46, %c0_47] : memref<9x4x1x1xf32, #tpu.memory_space<vmem>>, vector<1x4x1x1xf32>
    %93 = vector.shape_cast %92 : vector<1x4x1x1xf32> to vector<4x1x1xf32>
    %94 = vector.broadcast %93 : vector<4x1x1xf32> to vector<4x8x8xf32>
    %95 = arith.mulf %94, %91 : vector<4x8x8xf32>
    %96 = arith.addf %90, %95 : vector<4x8x8xf32>
    %97 = vector.extract_strided_slice %65 {offsets = [0, 0, 1], sizes = [4, 8, 8], strides = [1, 1, 1]} : vector<4x9x9xf32> to vector<4x8x8xf32>
    %c5 = arith.constant 5 : index
    %c0_48 = arith.constant 0 : index
    %c0_49 = arith.constant 0 : index
    %c0_50 = arith.constant 0 : index
    %98 = vector.load %arg6[%c5, %c0_48, %c0_49, %c0_50] : memref<9x4x1x1xf32, #tpu.memory_space<vmem>>, vector<1x4x1x1xf32>
    %99 = vector.shape_cast %98 : vector<1x4x1x1xf32> to vector<4x1x1xf32>
    %100 = vector.broadcast %99 : vector<4x1x1xf32> to vector<4x8x8xf32>
    %101 = arith.mulf %100, %97 : vector<4x8x8xf32>
    %102 = arith.addf %96, %101 : vector<4x8x8xf32>
    %103 = vector.extract_strided_slice %61 {offsets = [0, 1, 0], sizes = [4, 8, 8], strides = [1, 1, 1]} : vector<4x9x9xf32> to vector<4x8x8xf32>
    %c6 = arith.constant 6 : index
    %c0_51 = arith.constant 0 : index
    %c0_52 = arith.constant 0 : index
    %c0_53 = arith.constant 0 : index
    %104 = vector.load %arg6[%c6, %c0_51, %c0_52, %c0_53] : memref<9x4x1x1xf32, #tpu.memory_space<vmem>>, vector<1x4x1x1xf32>
    %105 = vector.shape_cast %104 : vector<1x4x1x1xf32> to vector<4x1x1xf32>
    %106 = vector.broadcast %105 : vector<4x1x1xf32> to vector<4x8x8xf32>
    %107 = arith.mulf %106, %103 : vector<4x8x8xf32>
    %108 = arith.addf %102, %107 : vector<4x8x8xf32>
    %109 = vector.extract_strided_slice %63 {offsets = [0, 1, 0], sizes = [4, 8, 8], strides = [1, 1, 1]} : vector<4x9x9xf32> to vector<4x8x8xf32>
    %c7 = arith.constant 7 : index
    %c0_54 = arith.constant 0 : index
    %c0_55 = arith.constant 0 : index
    %c0_56 = arith.constant 0 : index
    %110 = vector.load %arg6[%c7, %c0_54, %c0_55, %c0_56] : memref<9x4x1x1xf32, #tpu.memory_space<vmem>>, vector<1x4x1x1xf32>
    %111 = vector.shape_cast %110 : vector<1x4x1x1xf32> to vector<4x1x1xf32>
    %112 = vector.broadcast %111 : vector<4x1x1xf32> to vector<4x8x8xf32>
    %113 = arith.mulf %112, %109 : vector<4x8x8xf32>
    %114 = arith.addf %108, %113 : vector<4x8x8xf32>
    %115 = vector.extract_strided_slice %61 {offsets = [0, 1, 1], sizes = [4, 8, 8], strides = [1, 1, 1]} : vector<4x9x9xf32> to vector<4x8x8xf32>
    %c8 = arith.constant 8 : index
    %c0_57 = arith.constant 0 : index
    %c0_58 = arith.constant 0 : index
    %c0_59 = arith.constant 0 : index
    %116 = vector.load %arg6[%c8, %c0_57, %c0_58, %c0_59] : memref<9x4x1x1xf32, #tpu.memory_space<vmem>>, vector<1x4x1x1xf32>
    %117 = vector.shape_cast %116 : vector<1x4x1x1xf32> to vector<4x1x1xf32>
    %118 = vector.broadcast %117 : vector<4x1x1xf32> to vector<4x8x8xf32>
    %119 = arith.mulf %118, %115 : vector<4x8x8xf32>
    %120 = arith.addf %114, %119 : vector<4x8x8xf32>
    %121 = vector.extract_strided_slice %20 {offsets = [0, 0, 0], sizes = [4, 8, 8], strides = [1, 1, 1]} : vector<4x9x9xf32> to vector<4x8x8xf32>
    %c0_60 = arith.constant 0 : index
    %c0_61 = arith.constant 0 : index
    %c0_62 = arith.constant 0 : index
    %c0_63 = arith.constant 0 : index
    %122 = vector.load %arg5[%c0_60, %c0_61, %c0_62, %c0_63] : memref<9x4x1x1xf32, #tpu.memory_space<vmem>>, vector<1x4x1x1xf32>
    %123 = vector.shape_cast %122 : vector<1x4x1x1xf32> to vector<4x1x1xf32>
    %124 = vector.broadcast %123 : vector<4x1x1xf32> to vector<4x8x8xf32>
    %125 = arith.mulf %124, %121 : vector<4x8x8xf32>
    %126 = vector.extract_strided_slice %33 {offsets = [0, 0, 0], sizes = [4, 8, 8], strides = [1, 1, 1]} : vector<4x9x9xf32> to vector<4x8x8xf32>
    %c1_64 = arith.constant 1 : index
    %c0_65 = arith.constant 0 : index
    %c0_66 = arith.constant 0 : index
    %c0_67 = arith.constant 0 : index
    %127 = vector.load %arg5[%c1_64, %c0_65, %c0_66, %c0_67] : memref<9x4x1x1xf32, #tpu.memory_space<vmem>>, vector<1x4x1x1xf32>
    %128 = vector.shape_cast %127 : vector<1x4x1x1xf32> to vector<4x1x1xf32>
    %129 = vector.broadcast %128 : vector<4x1x1xf32> to vector<4x8x8xf32>
    %130 = arith.mulf %129, %126 : vector<4x8x8xf32>
    %131 = arith.addf %125, %130 : vector<4x8x8xf32>
    %132 = vector.extract_strided_slice %20 {offsets = [0, 0, 1], sizes = [4, 8, 8], strides = [1, 1, 1]} : vector<4x9x9xf32> to vector<4x8x8xf32>
    %c2_68 = arith.constant 2 : index
    %c0_69 = arith.constant 0 : index
    %c0_70 = arith.constant 0 : index
    %c0_71 = arith.constant 0 : index
    %133 = vector.load %arg5[%c2_68, %c0_69, %c0_70, %c0_71] : memref<9x4x1x1xf32, #tpu.memory_space<vmem>>, vector<1x4x1x1xf32>
    %134 = vector.shape_cast %133 : vector<1x4x1x1xf32> to vector<4x1x1xf32>
    %135 = vector.broadcast %134 : vector<4x1x1xf32> to vector<4x8x8xf32>
    %136 = arith.mulf %135, %132 : vector<4x8x8xf32>
    %137 = arith.addf %131, %136 : vector<4x8x8xf32>
    %138 = vector.extract_strided_slice %46 {offsets = [0, 0, 0], sizes = [4, 8, 8], strides = [1, 1, 1]} : vector<4x9x9xf32> to vector<4x8x8xf32>
    %c3_72 = arith.constant 3 : index
    %c0_73 = arith.constant 0 : index
    %c0_74 = arith.constant 0 : index
    %c0_75 = arith.constant 0 : index
    %139 = vector.load %arg5[%c3_72, %c0_73, %c0_74, %c0_75] : memref<9x4x1x1xf32, #tpu.memory_space<vmem>>, vector<1x4x1x1xf32>
    %140 = vector.shape_cast %139 : vector<1x4x1x1xf32> to vector<4x1x1xf32>
    %141 = vector.broadcast %140 : vector<4x1x1xf32> to vector<4x8x8xf32>
    %142 = arith.mulf %141, %138 : vector<4x8x8xf32>
    %143 = arith.addf %137, %142 : vector<4x8x8xf32>
    %144 = vector.extract_strided_slice %59 {offsets = [0, 0, 0], sizes = [4, 8, 8], strides = [1, 1, 1]} : vector<4x9x9xf32> to vector<4x8x8xf32>
    %c4_76 = arith.constant 4 : index
    %c0_77 = arith.constant 0 : index
    %c0_78 = arith.constant 0 : index
    %c0_79 = arith.constant 0 : index
    %145 = vector.load %arg5[%c4_76, %c0_77, %c0_78, %c0_79] : memref<9x4x1x1xf32, #tpu.memory_space<vmem>>, vector<1x4x1x1xf32>
    %146 = vector.shape_cast %145 : vector<1x4x1x1xf32> to vector<4x1x1xf32>
    %147 = vector.broadcast %146 : vector<4x1x1xf32> to vector<4x8x8xf32>
    %148 = arith.mulf %147, %144 : vector<4x8x8xf32>
    %149 = arith.addf %143, %148 : vector<4x8x8xf32>
    %150 = vector.extract_strided_slice %46 {offsets = [0, 0, 1], sizes = [4, 8, 8], strides = [1, 1, 1]} : vector<4x9x9xf32> to vector<4x8x8xf32>
    %c5_80 = arith.constant 5 : index
    %c0_81 = arith.constant 0 : index
    %c0_82 = arith.constant 0 : index
    %c0_83 = arith.constant 0 : index
    %151 = vector.load %arg5[%c5_80, %c0_81, %c0_82, %c0_83] : memref<9x4x1x1xf32, #tpu.memory_space<vmem>>, vector<1x4x1x1xf32>
    %152 = vector.shape_cast %151 : vector<1x4x1x1xf32> to vector<4x1x1xf32>
    %153 = vector.broadcast %152 : vector<4x1x1xf32> to vector<4x8x8xf32>
    %154 = arith.mulf %153, %150 : vector<4x8x8xf32>
    %155 = arith.addf %149, %154 : vector<4x8x8xf32>
    %156 = vector.extract_strided_slice %20 {offsets = [0, 1, 0], sizes = [4, 8, 8], strides = [1, 1, 1]} : vector<4x9x9xf32> to vector<4x8x8xf32>
    %c6_84 = arith.constant 6 : index
    %c0_85 = arith.constant 0 : index
    %c0_86 = arith.constant 0 : index
    %c0_87 = arith.constant 0 : index
    %157 = vector.load %arg5[%c6_84, %c0_85, %c0_86, %c0_87] : memref<9x4x1x1xf32, #tpu.memory_space<vmem>>, vector<1x4x1x1xf32>
    %158 = vector.shape_cast %157 : vector<1x4x1x1xf32> to vector<4x1x1xf32>
    %159 = vector.broadcast %158 : vector<4x1x1xf32> to vector<4x8x8xf32>
    %160 = arith.mulf %159, %156 : vector<4x8x8xf32>
    %161 = arith.addf %155, %160 : vector<4x8x8xf32>
    %162 = vector.extract_strided_slice %33 {offsets = [0, 1, 0], sizes = [4, 8, 8], strides = [1, 1, 1]} : vector<4x9x9xf32> to vector<4x8x8xf32>
    %c7_88 = arith.constant 7 : index
    %c0_89 = arith.constant 0 : index
    %c0_90 = arith.constant 0 : index
    %c0_91 = arith.constant 0 : index
    %163 = vector.load %arg5[%c7_88, %c0_89, %c0_90, %c0_91] : memref<9x4x1x1xf32, #tpu.memory_space<vmem>>, vector<1x4x1x1xf32>
    %164 = vector.shape_cast %163 : vector<1x4x1x1xf32> to vector<4x1x1xf32>
    %165 = vector.broadcast %164 : vector<4x1x1xf32> to vector<4x8x8xf32>
    %166 = arith.mulf %165, %162 : vector<4x8x8xf32>
    %167 = arith.addf %161, %166 : vector<4x8x8xf32>
    %168 = vector.extract_strided_slice %20 {offsets = [0, 1, 1], sizes = [4, 8, 8], strides = [1, 1, 1]} : vector<4x9x9xf32> to vector<4x8x8xf32>
    %c8_92 = arith.constant 8 : index
    %c0_93 = arith.constant 0 : index
    %c0_94 = arith.constant 0 : index
    %c0_95 = arith.constant 0 : index
    %169 = vector.load %arg5[%c8_92, %c0_93, %c0_94, %c0_95] : memref<9x4x1x1xf32, #tpu.memory_space<vmem>>, vector<1x4x1x1xf32>
    %170 = vector.shape_cast %169 : vector<1x4x1x1xf32> to vector<4x1x1xf32>
    %171 = vector.broadcast %170 : vector<4x1x1xf32> to vector<4x8x8xf32>
    %172 = arith.mulf %171, %168 : vector<4x8x8xf32>
    %173 = arith.addf %167, %172 : vector<4x8x8xf32>
    %c0_96 = arith.constant 0 : index
    %c0_97 = arith.constant 0 : index
    %c0_98 = arith.constant 0 : index
    %c0_99 = arith.constant 0 : index
    %174 = vector.load %arg8[%c0_96, %c0_97, %c0_98, %c0_99] : memref<1x8x8x8xf32, #tpu.memory_space<vmem>>, vector<1x4x8x8xf32>
    %175 = vector.shape_cast %174 : vector<1x4x8x8xf32> to vector<4x8x8xf32>
    %176 = vector.shape_cast %120 : vector<4x8x8xf32> to vector<1x4x8x8xf32>
    tpu.vector_store %arg8[%c0_96, %c0_97, %c0_98, %c0_99], %176 {strides = array<i32>} : memref<1x8x8x8xf32, #tpu.memory_space<vmem>>, vector<1x4x8x8xf32>,
    %c0_100 = arith.constant 0 : index
    %c4_101 = arith.constant 4 : index
    %c0_102 = arith.constant 0 : index
    %c0_103 = arith.constant 0 : index
    %177 = vector.load %arg8[%c0_100, %c4_101, %c0_102, %c0_103] : memref<1x8x8x8xf32, #tpu.memory_space<vmem>>, vector<1x4x8x8xf32>
    %178 = vector.shape_cast %177 : vector<1x4x8x8xf32> to vector<4x8x8xf32>
    %179 = vector.shape_cast %173 : vector<4x8x8xf32> to vector<1x4x8x8xf32>
    tpu.vector_store %arg8[%c0_100, %c4_101, %c0_102, %c0_103], %179 {strides = array<i32>} : memref<1x8x8x8xf32, #tpu.memory_space<vmem>>, vector<1x4x8x8xf32>,
    %cst_104 = arith.constant dense<0.000000e+00> : vector<4x8xf32>
    %180 = vector.multi_reduction <add>, %120, %cst_104 [2] : vector<4x8x8xf32> to vector<4x8xf32>
    %181 = vector.shape_cast %180 : vector<4x8xf32> to vector<4x8x1xf32>
    %cst_105 = arith.constant dense<0.000000e+00> : vector<4x1xf32>
    %182 = vector.multi_reduction <add>, %181, %cst_105 [1] : vector<4x8x1xf32> to vector<4x1xf32>
    %183 = vector.shape_cast %182 : vector<4x1xf32> to vector<4x1x1xf32>
    %184 = arith.mulf %120, %120 : vector<4x8x8xf32>
    %cst_106 = arith.constant dense<0.000000e+00> : vector<4x8xf32>
    %185 = vector.multi_reduction <add>, %184, %cst_106 [2] : vector<4x8x8xf32> to vector<4x8xf32>
    %186 = vector.shape_cast %185 : vector<4x8xf32> to vector<4x8x1xf32>
    %cst_107 = arith.constant dense<0.000000e+00> : vector<4x1xf32>
    %187 = vector.multi_reduction <add>, %186, %cst_107 [1] : vector<4x8x1xf32> to vector<4x1xf32>
    %188 = vector.shape_cast %187 : vector<4x1xf32> to vector<4x1x1xf32>
    %cst_108 = arith.constant dense<0.000000e+00> : vector<4x8xf32>
    %189 = vector.multi_reduction <add>, %173, %cst_108 [2] : vector<4x8x8xf32> to vector<4x8xf32>
    %190 = vector.shape_cast %189 : vector<4x8xf32> to vector<4x8x1xf32>
    %cst_109 = arith.constant dense<0.000000e+00> : vector<4x1xf32>
    %191 = vector.multi_reduction <add>, %190, %cst_109 [1] : vector<4x8x1xf32> to vector<4x1xf32>
    %192 = vector.shape_cast %191 : vector<4x1xf32> to vector<4x1x1xf32>
    %193 = arith.mulf %173, %173 : vector<4x8x8xf32>
    %cst_110 = arith.constant dense<0.000000e+00> : vector<4x8xf32>
    %194 = vector.multi_reduction <add>, %193, %cst_110 [2] : vector<4x8x8xf32> to vector<4x8xf32>
    %195 = vector.shape_cast %194 : vector<4x8xf32> to vector<4x8x1xf32>
    %cst_111 = arith.constant dense<0.000000e+00> : vector<4x1xf32>
    %196 = vector.multi_reduction <add>, %195, %cst_111 [1] : vector<4x8x1xf32> to vector<4x1xf32>
    %197 = vector.shape_cast %196 : vector<4x1xf32> to vector<4x1x1xf32>
    %c0_i32 = arith.constant 0 : i32
    %198 = arith.cmpi eq, %arg0, %c0_i32 : i32
    %199 = arith.extui %198 : i1 to i32
    %c0_i32_112 = arith.constant 0 : i32
    %200 = arith.cmpi ne, %199, %c0_i32_112 : i32
    scf.if %200 {
      %cst_146 = arith.constant 0.000000e+00 : f32
      %228 = vector.broadcast %cst_146 : f32 to vector<2x8x1x1xf32>
      %c0_147 = arith.constant 0 : index
      %c0_148 = arith.constant 0 : index
      %c0_149 = arith.constant 0 : index
      %c0_150 = arith.constant 0 : index
      %229 = vector.load %arg9[%c0_147, %c0_148, %c0_149, %c0_150] : memref<2x8x1x1xf32, #tpu.memory_space<vmem>>, vector<2x8x1x1xf32>
      tpu.vector_store %arg9[%c0_147, %c0_148, %c0_149, %c0_150], %228 {strides = array<i32>} : memref<2x8x1x1xf32, #tpu.memory_space<vmem>>, vector<2x8x1x1xf32>,
    } else {
    }
    %c0_113 = arith.constant 0 : index
    %c0_114 = arith.constant 0 : index
    %c0_115 = arith.constant 0 : index
    %c0_116 = arith.constant 0 : index
    %201 = vector.load %arg9[%c0_113, %c0_114, %c0_115, %c0_116] : memref<2x8x1x1xf32, #tpu.memory_space<vmem>>, vector<1x4x1x1xf32>
    %202 = vector.shape_cast %201 : vector<1x4x1x1xf32> to vector<4x1x1xf32>
    %203 = arith.addf %202, %183 : vector<4x1x1xf32>
    %c0_117 = arith.constant 0 : index
    %c0_118 = arith.constant 0 : index
    %c0_119 = arith.constant 0 : index
    %c0_120 = arith.constant 0 : index
    %204 = vector.load %arg9[%c0_117, %c0_118, %c0_119, %c0_120] : memref<2x8x1x1xf32, #tpu.memory_space<vmem>>, vector<1x4x1x1xf32>
    %205 = vector.shape_cast %204 : vector<1x4x1x1xf32> to vector<4x1x1xf32>
    %206 = vector.shape_cast %203 : vector<4x1x1xf32> to vector<1x4x1x1xf32>
    tpu.vector_store %arg9[%c0_117, %c0_118, %c0_119, %c0_120], %206 {strides = array<i32>} : memref<2x8x1x1xf32, #tpu.memory_space<vmem>>, vector<1x4x1x1xf32>,
    %c0_121 = arith.constant 0 : index
    %c4_122 = arith.constant 4 : index
    %c0_123 = arith.constant 0 : index
    %c0_124 = arith.constant 0 : index
    %207 = vector.load %arg9[%c0_121, %c4_122, %c0_123, %c0_124] : memref<2x8x1x1xf32, #tpu.memory_space<vmem>>, vector<1x4x1x1xf32>
    %208 = vector.shape_cast %207 : vector<1x4x1x1xf32> to vector<4x1x1xf32>
    %209 = arith.addf %208, %192 : vector<4x1x1xf32>
    %c0_125 = arith.constant 0 : index
    %c4_126 = arith.constant 4 : index
    %c0_127 = arith.constant 0 : index
    %c0_128 = arith.constant 0 : index
    %210 = vector.load %arg9[%c0_125, %c4_126, %c0_127, %c0_128] : memref<2x8x1x1xf32, #tpu.memory_space<vmem>>, vector<1x4x1x1xf32>
    %211 = vector.shape_cast %210 : vector<1x4x1x1xf32> to vector<4x1x1xf32>
    %212 = vector.shape_cast %209 : vector<4x1x1xf32> to vector<1x4x1x1xf32>
    tpu.vector_store %arg9[%c0_125, %c4_126, %c0_127, %c0_128], %212 {strides = array<i32>} : memref<2x8x1x1xf32, #tpu.memory_space<vmem>>, vector<1x4x1x1xf32>,
    %c1_129 = arith.constant 1 : index
    %c0_130 = arith.constant 0 : index
    %c0_131 = arith.constant 0 : index
    %c0_132 = arith.constant 0 : index
    %213 = vector.load %arg9[%c1_129, %c0_130, %c0_131, %c0_132] : memref<2x8x1x1xf32, #tpu.memory_space<vmem>>, vector<1x4x1x1xf32>
    %214 = vector.shape_cast %213 : vector<1x4x1x1xf32> to vector<4x1x1xf32>
    %215 = arith.addf %214, %188 : vector<4x1x1xf32>
    %c1_133 = arith.constant 1 : index
    %c0_134 = arith.constant 0 : index
    %c0_135 = arith.constant 0 : index
    %c0_136 = arith.constant 0 : index
    %216 = vector.load %arg9[%c1_133, %c0_134, %c0_135, %c0_136] : memref<2x8x1x1xf32, #tpu.memory_space<vmem>>, vector<1x4x1x1xf32>
    %217 = vector.shape_cast %216 : vector<1x4x1x1xf32> to vector<4x1x1xf32>
    %218 = vector.shape_cast %215 : vector<4x1x1xf32> to vector<1x4x1x1xf32>
    tpu.vector_store %arg9[%c1_133, %c0_134, %c0_135, %c0_136], %218 {strides = array<i32>} : memref<2x8x1x1xf32, #tpu.memory_space<vmem>>, vector<1x4x1x1xf32>,
    %c1_137 = arith.constant 1 : index
    %c4_138 = arith.constant 4 : index
    %c0_139 = arith.constant 0 : index
    %c0_140 = arith.constant 0 : index
    %219 = vector.load %arg9[%c1_137, %c4_138, %c0_139, %c0_140] : memref<2x8x1x1xf32, #tpu.memory_space<vmem>>, vector<1x4x1x1xf32>
    %220 = vector.shape_cast %219 : vector<1x4x1x1xf32> to vector<4x1x1xf32>
    %221 = arith.addf %220, %197 : vector<4x1x1xf32>
    %c1_141 = arith.constant 1 : index
    %c4_142 = arith.constant 4 : index
    %c0_143 = arith.constant 0 : index
    %c0_144 = arith.constant 0 : index
    %222 = vector.load %arg9[%c1_141, %c4_142, %c0_143, %c0_144] : memref<2x8x1x1xf32, #tpu.memory_space<vmem>>, vector<1x4x1x1xf32>
    %223 = vector.shape_cast %222 : vector<1x4x1x1xf32> to vector<4x1x1xf32>
    %224 = vector.shape_cast %221 : vector<4x1x1xf32> to vector<1x4x1x1xf32>
    tpu.vector_store %arg9[%c1_141, %c4_142, %c0_143, %c0_144], %224 {strides = array<i32>} : memref<2x8x1x1xf32, #tpu.memory_space<vmem>>, vector<1x4x1x1xf32>,
    %c1_i32 = arith.constant 1 : i32
    %225 = arith.cmpi eq, %arg0, %c1_i32 : i32
    %226 = arith.extui %225 : i1 to i32
    %c0_i32_145 = arith.constant 0 : i32
    %227 = arith.cmpi ne, %226, %c0_i32_145 : i32
    scf.if %227 {
      %c0_146 = arith.constant 0 : index
      %c0_147 = arith.constant 0 : index
      %c0_148 = arith.constant 0 : index
      %c0_149 = arith.constant 0 : index
      %228 = vector.load %arg9[%c0_146, %c0_147, %c0_148, %c0_149] : memref<2x8x1x1xf32, #tpu.memory_space<vmem>>, vector<1x8x1x1xf32>
      %229 = vector.shape_cast %228 : vector<1x8x1x1xf32> to vector<8x1x1xf32>
      %cst_150 = arith.constant 1.280000e+02 : f32
      %230 = vector.broadcast %cst_150 : f32 to vector<8x1x1xf32>
      %231 = arith.divf %229, %230 : vector<8x1x1xf32>
      %c1_151 = arith.constant 1 : index
      %c0_152 = arith.constant 0 : index
      %c0_153 = arith.constant 0 : index
      %c0_154 = arith.constant 0 : index
      %232 = vector.load %arg9[%c1_151, %c0_152, %c0_153, %c0_154] : memref<2x8x1x1xf32, #tpu.memory_space<vmem>>, vector<1x8x1x1xf32>
      %233 = vector.shape_cast %232 : vector<1x8x1x1xf32> to vector<8x1x1xf32>
      %cst_155 = arith.constant 1.280000e+02 : f32
      %234 = vector.broadcast %cst_155 : f32 to vector<8x1x1xf32>
      %235 = arith.divf %233, %234 : vector<8x1x1xf32>
      %236 = arith.mulf %231, %231 : vector<8x1x1xf32>
      %237 = arith.subf %235, %236 : vector<8x1x1xf32>
      %cst_156 = arith.constant 0.000000e+00 : f32
      %238 = vector.broadcast %cst_156 : f32 to vector<8x1x1xf32>
      %239 = arith.maximumf %237, %238 : vector<8x1x1xf32>
      %c0_157 = arith.constant 0 : index
      %c0_158 = arith.constant 0 : index
      %c0_159 = arith.constant 0 : index
      %c0_160 = arith.constant 0 : index
      %240 = vector.load %arg7[%c0_157, %c0_158, %c0_159, %c0_160] : memref<2x8x1x1xf32, #tpu.memory_space<vmem>>, vector<1x8x1x1xf32>
      %241 = vector.shape_cast %240 : vector<1x8x1x1xf32> to vector<8x1x1xf32>
      %cst_161 = arith.constant 9.99999974E-6 : f32
      %242 = vector.broadcast %cst_161 : f32 to vector<8x1x1xf32>
      %243 = arith.addf %239, %242 : vector<8x1x1xf32>
      %244 = math.rsqrt %243 : vector<8x1x1xf32>
      %245 = arith.mulf %241, %244 : vector<8x1x1xf32>
      %c1_162 = arith.constant 1 : index
      %c0_163 = arith.constant 0 : index
      %c0_164 = arith.constant 0 : index
      %c0_165 = arith.constant 0 : index
      %246 = vector.load %arg7[%c1_162, %c0_163, %c0_164, %c0_165] : memref<2x8x1x1xf32, #tpu.memory_space<vmem>>, vector<1x8x1x1xf32>
      %247 = vector.shape_cast %246 : vector<1x8x1x1xf32> to vector<8x1x1xf32>
      %248 = arith.mulf %231, %245 : vector<8x1x1xf32>
      %249 = arith.subf %247, %248 : vector<8x1x1xf32>
      %c1_166 = arith.constant 1 : index
      %c0_167 = arith.constant 0 : index
      %c0_168 = arith.constant 0 : index
      %c0_169 = arith.constant 0 : index
      %250 = vector.load %arg9[%c1_166, %c0_167, %c0_168, %c0_169] : memref<2x8x1x1xf32, #tpu.memory_space<vmem>>, vector<1x8x1x1xf32>
      %251 = vector.shape_cast %250 : vector<1x8x1x1xf32> to vector<8x1x1xf32>
      %252 = vector.shape_cast %249 : vector<8x1x1xf32> to vector<1x8x1x1xf32>
      tpu.vector_store %arg9[%c1_166, %c0_167, %c0_168, %c0_169], %252 {strides = array<i32>} : memref<2x8x1x1xf32, #tpu.memory_space<vmem>>, vector<1x8x1x1xf32>,
      %c0_170 = arith.constant 0 : index
      %c0_171 = arith.constant 0 : index
      %c0_172 = arith.constant 0 : index
      %c0_173 = arith.constant 0 : index
      %253 = vector.load %arg9[%c0_170, %c0_171, %c0_172, %c0_173] : memref<2x8x1x1xf32, #tpu.memory_space<vmem>>, vector<1x8x1x1xf32>
      %254 = vector.shape_cast %253 : vector<1x8x1x1xf32> to vector<8x1x1xf32>
      %255 = vector.shape_cast %245 : vector<8x1x1xf32> to vector<1x8x1x1xf32>
      tpu.vector_store %arg9[%c0_170, %c0_171, %c0_172, %c0_173], %255 {strides = array<i32>} : memref<2x8x1x1xf32, #tpu.memory_space<vmem>>, vector<1x8x1x1xf32>,
    } else {
    }
    return
  }
  func.func @transform_0(%arg0: i32) -> (i32, i32, i32, i32, i32) {
    %c0_i32 = arith.constant 0 : i32
    %c0_i32_0 = arith.constant 0 : i32
    %c0_i32_1 = arith.constant 0 : i32
    %c0_i32_2 = arith.constant 0 : i32
    %c0_i32_3 = arith.constant 0 : i32
    return %arg0, %c0_i32, %c0_i32_0, %c0_i32_1, %c0_i32_2 : i32, i32, i32, i32, i32
  }
  func.func @transform_1(%arg0: i32) -> (i32, i32, i32, i32, i32) {
    %c0_i32 = arith.constant 0 : i32
    %c0_i32_0 = arith.constant 0 : i32
    %c0_i32_1 = arith.constant 0 : i32
    %c0_i32_2 = arith.constant 0 : i32
    %c0_i32_3 = arith.constant 0 : i32
    return %arg0, %c0_i32, %c0_i32_0, %c0_i32_1, %c0_i32_2 : i32, i32, i32, i32, i32
  }
  func.func @transform_2(%arg0: i32) -> (i32, i32, i32, i32) {
    %c0_i32 = arith.constant 0 : i32
    %c0_i32_0 = arith.constant 0 : i32
    %c0_i32_1 = arith.constant 0 : i32
    %c0_i32_2 = arith.constant 0 : i32
    %c0_i32_3 = arith.constant 0 : i32
    return %c0_i32, %c0_i32_0, %c0_i32_1, %c0_i32_2 : i32, i32, i32, i32
  }
  func.func @transform_3(%arg0: i32) -> (i32, i32, i32) {
    %c0_i32 = arith.constant 0 : i32
    %c0_i32_0 = arith.constant 0 : i32
    %c0_i32_1 = arith.constant 0 : i32
    %c0_i32_2 = arith.constant 0 : i32
    return %c0_i32, %c0_i32_0, %c0_i32_1 : i32, i32, i32
  }
  func.func @transform_4(%arg0: i32) -> (i32, i32, i32, i32) {
    %c0_i32 = arith.constant 0 : i32
    %c0_i32_0 = arith.constant 0 : i32
    %c0_i32_1 = arith.constant 0 : i32
    %c0_i32_2 = arith.constant 0 : i32
    %c0_i32_3 = arith.constant 0 : i32
    return %c0_i32, %c0_i32_0, %c0_i32_1, %c0_i32_2 : i32, i32, i32, i32
  }
  func.func @transform_5(%arg0: i32) -> (i32, i32, i32, i32) {
    %c0_i32 = arith.constant 0 : i32
    %c0_i32_0 = arith.constant 0 : i32
    %c0_i32_1 = arith.constant 0 : i32
    %c0_i32_2 = arith.constant 0 : i32
    %c0_i32_3 = arith.constant 0 : i32
    return %c0_i32, %c0_i32_0, %c0_i32_1, %c0_i32_2 : i32, i32, i32, i32
  }
  func.func @transform_6(%arg0: i32) -> (i32, i32, i32, i32) {
    %c0_i32 = arith.constant 0 : i32
    %c0_i32_0 = arith.constant 0 : i32
    %c0_i32_1 = arith.constant 0 : i32
    %c0_i32_2 = arith.constant 0 : i32
    %c0_i32_3 = arith.constant 0 : i32
    return %c0_i32, %c0_i32_0, %c0_i32_1, %c0_i32_2 : i32, i32, i32, i32
  }
  func.func @transform_7(%arg0: i32) -> (i32, i32, i32, i32) {
    %c0_i32 = arith.constant 0 : i32
    %c0_i32_0 = arith.constant 0 : i32
    %c0_i32_1 = arith.constant 0 : i32
    %c0_i32_2 = arith.constant 0 : i32
    return %arg0, %c0_i32, %c0_i32_0, %c0_i32_1 : i32, i32, i32, i32
  }
  func.func @transform_8(%arg0: i32) -> (i32, i32, i32, i32) {
    %c0_i32 = arith.constant 0 : i32
    %c0_i32_0 = arith.constant 0 : i32
    %c0_i32_1 = arith.constant 0 : i32
    %c0_i32_2 = arith.constant 0 : i32
    %c0_i32_3 = arith.constant 0 : i32
    return %c0_i32, %c0_i32_0, %c0_i32_1, %c0_i32_2 : i32, i32, i32, i32
  }
}

module attributes {stable_mosaic.version = 11 : i64} {
  func.func @_k4_final_apply(%arg0: i32, %arg1: memref<1x8x64xf32, #tpu.memory_space<vmem>>, %arg2: memref<2x8x1xf32, #tpu.memory_space<vmem>>, %arg3: memref<8x8xf32, #tpu.memory_space<vmem>>, %arg4: memref<2x8x1xf32, #tpu.memory_space<vmem>>, %arg5: memref<1x8x64xf32, #tpu.memory_space<vmem>>) attributes {dimension_semantics = [#tpu.dimension_semantics<parallel>], iteration_bounds = array<i64: 2>, scalar_prefetch = 0 : i64, scratch_operands = 0 : i64, tpu.core_type = #tpu.core_type<tc>, window_params = [{transform_indices = @transform_0, window_bounds = array<i64: 1, 8, 64>}, {pipeline_mode = #tpu.pipeline_mode<synchronous>, transform_indices = @transform_1, window_bounds = array<i64: 2, 8, 1>}, {pipeline_mode = #tpu.pipeline_mode<synchronous>, transform_indices = @transform_2, window_bounds = array<i64: 8, 8>}, {pipeline_mode = #tpu.pipeline_mode<synchronous>, transform_indices = @transform_3, window_bounds = array<i64: 2, 8, 1>}, {transform_indices = @transform_4, window_bounds = array<i64: 1, 8, 64>}]} {
    %c0 = arith.constant 0 : index
    %c0_0 = arith.constant 0 : index
    %c0_1 = arith.constant 0 : index
    %0 = vector.load %arg1[%c0, %c0_0, %c0_1] : memref<1x8x64xf32, #tpu.memory_space<vmem>>, vector<1x8x64xf32>
    %1 = vector.shape_cast %0 : vector<1x8x64xf32> to vector<8x64xf32>
    %c0_2 = arith.constant 0 : index
    %c0_3 = arith.constant 0 : index
    %c0_4 = arith.constant 0 : index
    %2 = vector.load %arg2[%c0_2, %c0_3, %c0_4] : memref<2x8x1xf32, #tpu.memory_space<vmem>>, vector<1x8x1xf32>
    %3 = vector.shape_cast %2 : vector<1x8x1xf32> to vector<8x1xf32>
    %4 = vector.broadcast %3 : vector<8x1xf32> to vector<8x64xf32>
    %5 = arith.mulf %1, %4 : vector<8x64xf32>
    %c1 = arith.constant 1 : index
    %c0_5 = arith.constant 0 : index
    %c0_6 = arith.constant 0 : index
    %6 = vector.load %arg2[%c1, %c0_5, %c0_6] : memref<2x8x1xf32, #tpu.memory_space<vmem>>, vector<1x8x1xf32>
    %7 = vector.shape_cast %6 : vector<1x8x1xf32> to vector<8x1xf32>
    %8 = vector.broadcast %7 : vector<8x1xf32> to vector<8x64xf32>
    %9 = arith.addf %5, %8 : vector<8x64xf32>
    %c0_7 = arith.constant 0 : index
    %c0_8 = arith.constant 0 : index
    %10 = vector.load %arg3[%c0_7, %c0_8] : memref<8x8xf32, #tpu.memory_space<vmem>>, vector<8x8xf32>
    %cst = arith.constant dense<0.000000e+00> : vector<8x64xf32>
    %11 = tpu.matmul %10, %9, %cst {dimension_numbers = #tpu.dot_dimension_numbers<[1], [0], [0], [1], [0, 0, 1, 1], [], []>} : vector<8x8xf32>, vector<8x64xf32>, vector<8x64xf32> -> vector<8x64xf32>
    %c0_9 = arith.constant 0 : index
    %c0_10 = arith.constant 0 : index
    %c0_11 = arith.constant 0 : index
    %12 = vector.load %arg4[%c0_9, %c0_10, %c0_11] : memref<2x8x1xf32, #tpu.memory_space<vmem>>, vector<1x8x1xf32>
    %13 = vector.shape_cast %12 : vector<1x8x1xf32> to vector<8x1xf32>
    %14 = vector.broadcast %13 : vector<8x1xf32> to vector<8x64xf32>
    %15 = arith.mulf %11, %14 : vector<8x64xf32>
    %c1_12 = arith.constant 1 : index
    %c0_13 = arith.constant 0 : index
    %c0_14 = arith.constant 0 : index
    %16 = vector.load %arg4[%c1_12, %c0_13, %c0_14] : memref<2x8x1xf32, #tpu.memory_space<vmem>>, vector<1x8x1xf32>
    %17 = vector.shape_cast %16 : vector<1x8x1xf32> to vector<8x1xf32>
    %18 = vector.broadcast %17 : vector<8x1xf32> to vector<8x64xf32>
    %19 = arith.addf %15, %18 : vector<8x64xf32>
    %cst_15 = arith.constant 0.000000e+00 : f32
    %20 = vector.broadcast %cst_15 : f32 to vector<8x64xf32>
    %21 = arith.maximumf %19, %20 : vector<8x64xf32>
    %c0_16 = arith.constant 0 : index
    %c0_17 = arith.constant 0 : index
    %c0_18 = arith.constant 0 : index
    %22 = vector.load %arg5[%c0_16, %c0_17, %c0_18] : memref<1x8x64xf32, #tpu.memory_space<vmem>>, vector<1x8x64xf32>
    %23 = vector.shape_cast %22 : vector<1x8x64xf32> to vector<8x64xf32>
    %24 = vector.shape_cast %21 : vector<8x64xf32> to vector<1x8x64xf32>
    tpu.vector_store %arg5[%c0_16, %c0_17, %c0_18], %24 {strides = array<i32>} : memref<1x8x64xf32, #tpu.memory_space<vmem>>, vector<1x8x64xf32>,
    return
  }
  func.func @transform_0(%arg0: i32) -> (i32, i32, i32) {
    %c0_i32 = arith.constant 0 : i32
    %c0_i32_0 = arith.constant 0 : i32
    %c0_i32_1 = arith.constant 0 : i32
    return %arg0, %c0_i32, %c0_i32_0 : i32, i32, i32
  }
  func.func @transform_1(%arg0: i32) -> (i32, i32, i32) {
    %c0_i32 = arith.constant 0 : i32
    %c0_i32_0 = arith.constant 0 : i32
    %c0_i32_1 = arith.constant 0 : i32
    %c0_i32_2 = arith.constant 0 : i32
    return %c0_i32, %c0_i32_0, %c0_i32_1 : i32, i32, i32
  }
  func.func @transform_2(%arg0: i32) -> (i32, i32) {
    %c0_i32 = arith.constant 0 : i32
    %c0_i32_0 = arith.constant 0 : i32
    %c0_i32_1 = arith.constant 0 : i32
    return %c0_i32, %c0_i32_0 : i32, i32
  }
  func.func @transform_3(%arg0: i32) -> (i32, i32, i32) {
    %c0_i32 = arith.constant 0 : i32
    %c0_i32_0 = arith.constant 0 : i32
    %c0_i32_1 = arith.constant 0 : i32
    %c0_i32_2 = arith.constant 0 : i32
    return %c0_i32, %c0_i32_0, %c0_i32_1 : i32, i32, i32
  }
  func.func @transform_4(%arg0: i32) -> (i32, i32, i32) {
    %c0_i32 = arith.constant 0 : i32
    %c0_i32_0 = arith.constant 0 : i32
    %c0_i32_1 = arith.constant 0 : i32
    return %arg0, %c0_i32, %c0_i32_0 : i32, i32, i32
  }
}

</mosaic_0001>

<bundles_post_ra>
// kernel: downsample_unit_forward.4
= control target key start
LH: loop header
LB: loop body
LE: loop exit
PB: predicated region body
PF: predicated region fallthrough
CT: control target
= control target key end

     0   :  { %s488_s15 = smov 0   ;;  %s565_s0 = inlined_call_operand.vmem [shape: f32[2,4,324], index: 0, kind: input, shape index: {}]   ;;  %s566_s1 = inlined_call_operand.vmem [shape: f32[4,4], index: 1, kind: input, shape index: {}]   ;;  %s567_s2 = inlined_call_operand.vmem [shape: f32[2,4,1], index: 2, kind: input, shape index: {}]   ;;  %s568_s3 = inlined_call_operand.vmem [shape: f32[2,4,324], index: 3, kind: output, shape index: {0}]   ;;  %s569_s4 = inlined_call_operand.vmem [shape: f32[2,4,1], index: 4, kind: output, shape index: {1}]  }
   0x1 LB: > { %s494_s16 = sadd.s32 4294967295, %s459_s15   ;;  %p420_p0 = scmp.ge.s32.totalorder %s459_s15, 1  ;;  %s459_s15 = sphi %s488_s15, %s15_s15  }
   0x2   : > { %p160_p1 = scmp.lt.s32.totalorder %s459_s15, 3 }
   0x4   : > { %p161_p2 = pnand %p420_p0, %p160_p1 }
   0x5   : > { %p186_p3 = scmp.lt.s32.totalorder (!%p161_p2), %s494_s16, 1  ;;  %p429_p4 = scmp.ne.s32.totalorder (!%p161_p2), %s494_s16, 0 }
   0x6   : > { %164 = sbr.rel (%p161_p2) target bundleno = 346 (0x15a), region = 32 }
   0xb   : > { %s187_s17 = scalar_select %p186_p3, %s494_s16, 1  ;;  %vm211_vm0 = vcmask 1043456   ;;  %v196_v2 = vld [vmem:[%s566_s1] sm:$0xf]  ;;  %vm207_vm1 = vcmask 31744   ;;  %vm284_vm2 = vcmask 551936  }
   0xd   : > { %s438_s18 = smul.u32 12, %s187_s17 }
   0xf   : > { %s190_s21 = scalar_lea.vmem %s565_s0, %s438_s18  ;;  %s195_s26 = scalar_lea.vmem %s568_s3, %s438_s18 }
  0x10   : > { %v198_v0 = vld [vmem:[%s190_s21 + $0x8] sm:$0xf]  ;;  %v197_v1 = vld [vmem:[%s190_s21] sm:$0xff] }
  0x11   : > { %203 = vst [vmem:[#allocation1 + $0x10] ss:$2 sm:$0xff] %v198_v0 }
  0x12   : > { %201 = vst [vmem:[#allocation1] ss:$2 sm:$0xff] %v197_v1 }
  0x18   : > { %v206_v3 = vld.sshfl [vmem:[#allocation1 + $0x10] sm:$0xff pattern:$0x75316420] }
  0x19   : > { %427 = vmatpush.msk.msra.mxu2 %vm211_vm0, %v206_v3  ;;  %v205_v4 = vld.sshfl [vmem:[#allocation1 + $0x8] sm:$0xff pattern:$0x75316420]  ;;  %v204_v5 = vld.sshfl [vmem:[#allocation1] sm:$0xff pattern:$0x75316420] }
  0x1a   : > { %428 = vmatmul.msk.f32.vlgmr.msra.gmra.mxu2 %vm207_vm1, %v196_v2  ;;  %425 = vmatpush.msk.msra.mxu1 %vm211_vm0, %v205_v4 }
  0x1b   : > { %426 = vmatmul.msk.f32.vlgmr.msra.gmra.mxu1 %vm207_vm1, %v196_v2  ;;  %423 = vmatpush.msk.msra.mxu0 %vm211_vm0, %v204_v5 }
  0x1c   : > { %424 = vmatmul.msk.f32.vlgmr.msra.gmra.mxu0 %vm207_vm1, %v196_v2 }
  0x98   : > { %v255_v6 = vpop.f32.mrf.mxu1 }
  0x99   : > { %v280_v7 = vrot.slane %v255_v6, 4  ;;  %v235_v8 = vpop.f32.mrf.mxu0 }
  0x9a   : > { %289 = sbr.rel (%p429_p4) target bundleno = 162 (0xa2), region = 36 }
  0x9b   : > { %v281_v9 = vsel %vm211_vm0, %v235_v8, %v280_v7 }
  0x9c   : > { %283 = vst [vmem:[%s195_s26] sm:$0xff] %v281_v9 }
  0x9d   : > { %v275_v10 = vpop.f32.mrf.mxu2 }
  0x9e   : > { %285 = vst.msk [vmem:[%s195_s26 + $0x8] sm:$0xf] %vm284_vm2, %v275_v10 }
  0x9f   : > { %vm290_vm3 = vcmask 3072   ;;  %v461_v11 = vmov 0.0  }
  0xa0   : > { %291 = vst.msk [vmem:[%s569_s4] sm:$0xf] %vm290_vm3, %v461_v11 }
  0xa1   : > { %292 = vst.msk [vmem:[%s569_s4 + $0x4] sm:$0xf] %vm290_vm3, %v461_v11 }
  0xa2 PF: > { %v294_v12 = vsel %vm211_vm0, %v235_v8, 0.0  ;;  %v295_v13 = vsel %vm211_vm0, %v255_v6, 0.0  ;;  %v297_v14 = vsel %vm284_vm2, %v275_v10, 0.0  ;;  %v306_v15 = vmul.f32 %v235_v8, %v235_v8  ;;  %p432_p5 = scmp.ne.s32.totalorder %s494_s16, 1 }
  0xa3   : > { %v296_v16 = vadd.f32 %v295_v13, %v294_v12  ;;  %v307_v17 = vmul.f32 %v255_v6, %v255_v6  ;;  %v308_v18 = vmul.f32 %v275_v10, %v275_v10  ;;  %vm302_vm4 = vcmask 3072  }
  0xa4   : > { %v309_v19 = vsel %vm211_vm0, %v306_v15, 0.0 }
  0xa5   : > { %v298_v20 = vadd.f32 %v297_v14, %v296_v16  ;;  %v310_v21 = vsel %vm211_vm0, %v307_v17, 0.0  ;;  %v312_v23 = vsel %vm284_vm2, %v308_v18, 0.0 }
  0xa6   : > { %v311_v22 = vadd.f32 %v310_v21, %v309_v19 }
  0xa7   : > { %299 = vadd.xlane.f32.xlu0 %v298_v20  ;;  %v293_v25 = vld [vmem:[%s569_s4] sm:$0xf] }
  0xa8   : > { %v313_v24 = vadd.f32 %v312_v23, %v311_v22  ;;  %v430_v28 = vld [vmem:[%s569_s4 + $0x4] sm:$0xf] }
  0xaf   : > { %314 = vadd.xlane.f32.xlu0 %v313_v24 }
 0x11a   : > { %v300_v26 = vpop.xlane.xlu0 %299 }
 0x11b   : > { %v301_v27 = vadd.f32 %v300_v26, %v293_v25 }
 0x11d   : > { %303 = vst.msk [vmem:[%s569_s4] sm:$0xf] %vm302_vm4, %v301_v27 }
 0x121   : > { %321 = sbr.rel (%p432_p5) target bundleno = 346 (0x15a), region = 40 }
 0x122   : > { %v315_v29 = vpop.xlane.xlu0 %314 }
 0x123   : > { %v316_v30 = vadd.f32 %v430_v28, %v315_v29 }
 0x125   : > { %431 = vst.msk [vmem:[%s569_s4 + $0x4] sm:$0xf] %vm302_vm4, %v316_v30 }
 0x126   : > { %v462_v31 = vmov 512.0   ;;  %v322_v36 = vld [vmem:[%s569_s4] sm:$0xf]  ;;  %v434_v55 = vld [vmem:[%s567_s2 + $0x4] sm:$0xf] }
 0x127   : > { %449 = vrcp.f32 %v462_v31  ;;  %v336_v51 = vld [vmem:[%s567_s2] sm:$0xf] }
 0x12c   : > { %v433_v38 = vld [vmem:[%s569_s4 + $0x4] sm:$0xf] }
 0x12d   : > { %v450_v32 = vpop.eup %449 }
 0x12e   : > { %v324_v33 = vmul.f32 512.0, %v450_v32  ;;  %vm328_vm5 = vweird.f32 %v450_v32 }
 0x130   : > { %v325_v34 = vsub.f32 1.0, %v324_v33 }
 0x132   : > { %v326_v35 = vmul.f32 %v450_v32, %v325_v34 }
 0x134   : > { %v327_v37 = vadd.f32 %v450_v32, %v326_v35 }
 0x136   : > { %v329_v39 = vsel %vm328_vm5, %v450_v32, %v327_v37 }
 0x137   : > { %v330_v40 = vmul.f32 %v329_v39, %v322_v36  ;;  %v332_v41 = vmul.f32 %v433_v38, %v329_v39 }
 0x139   : > { %v333_v42 = vmul.f32 %v330_v40, %v330_v40 }
 0x13b   : > { %v334_v43 = vsub.f32 %v332_v41, %v333_v42 }
 0x13d   : > { %v335_v44 = vmax.f32 %v334_v43, 0.0 }
 0x13f   : > { %v337_v45 = vadd.f32 1e-05, %v335_v44 }
 0x141   : > { %451 = vrsqrt.f32 %v337_v45  ;;  %vm344_vm6 = vweird.f32 %v337_v45 }
 0x147   : > { %v452_v46 = vpop.eup %451 }
 0x148   : > { %v339_v47 = vmul.f32 %v452_v46, %v337_v45  ;;  %vm345_vm7 = vweird.f32 %v452_v46 }
 0x149   : > { %vm346_vm8 = vmor %vm344_vm6, %vm345_vm7 }
 0x14a   : > { %v340_v48 = vmul.f32 %v452_v46, %v339_v47 }
 0x14c   : > { %v341_v49 = vmul.f32 0.5, %v340_v48 }
 0x14e   : > { %v342_v50 = vsub.f32 1.5, %v341_v49 }
 0x150   : > { %v343_v52 = vmul.f32 %v452_v46, %v342_v50 }
 0x152   : > { %v347_v53 = vsel %vm346_vm8, %v452_v46, %v343_v52 }
 0x153   : > { %v348_v54 = vmul.f32 %v347_v53, %v336_v51 }
 0x155   : > { %v351_v56 = vmul.f32 %v348_v54, %v330_v40  ;;  %354 = vst.msk [vmem:[%s569_s4] sm:$0xf] %vm302_vm4, %v348_v54 }
 0x157   : > { %v352_v57 = vsub.f32 %v434_v55, %v351_v56 }
 0x159   : > { %435 = vst.msk [vmem:[%s569_s4 + $0x4] sm:$0xf] %vm302_vm4, %v352_v57 }
 0x15a PF: > { %s15_s15 = sadd.s32 1, %s459_s15  }
 0x15b   : > { %p12_p6 = scmp.ge.s32.totalorder %s15_s15, 4  }
 0x15d   :  { %14 = sbr.rel (!%p12_p6) target bundleno = 1 (0x1), region = 81 }

// kernel: downsample_unit_forward.6
= control target key start
LH: loop header
LB: loop body
LE: loop exit
PB: predicated region body
PF: predicated region fallthrough
CT: control target
= control target key end

     0   :  { %s377_s15 = smov 0   ;;  %s446_s0 = inlined_call_operand.vmem [shape: f32[2,8,64], index: 0, kind: input, shape index: {}]   ;;  %s447_s1 = inlined_call_operand.vmem [shape: f32[2,8,1], index: 1, kind: input, shape index: {}]   ;;  %s448_s2 = inlined_call_operand.vmem [shape: f32[8,8], index: 2, kind: input, shape index: {}]   ;;  %s449_s3 = inlined_call_operand.vmem [shape: f32[2,8,1], index: 3, kind: input, shape index: {}]   ;;  %s450_s4 = inlined_call_operand.vmem [shape: f32[2,8,1], index: 4, kind: output, shape index: {}]  }
   0x1 LB: > { %s383_s16 = sadd.s32 4294967295, %s347_s15   ;;  %p312_p0 = scmp.ge.s32.totalorder %s347_s15, 1  ;;  %s347_s15 = sphi %s377_s15, %s14_s15  }
   0x2   : > { %p156_p1 = scmp.lt.s32.totalorder %s347_s15, 3 }
   0x4   : > { %p157_p2 = pnand %p312_p0, %p156_p1 }
   0x5   : > { %p176_p3 = scmp.lt.s32.totalorder (!%p157_p2), %s383_s16, 1  ;;  %p316_p4 = scmp.ne.s32.totalorder (!%p157_p2), %s383_s16, 0 }
   0x6   : > { %160 = sbr.rel (%p157_p2) target bundleno = 449 (0x1c1), region = 36 }
   0xb   : > { %v181_v0 = vld [vmem:[%s447_s1] sm:$0xff]  ;;  %v349_v1 = vmov 0   ;;  %v314_v2 = vld [vmem:[%s447_s1 + $0x8] sm:$0xff]  ;;  %s177_s21 = scalar_select %p176_p3, %s383_s16, 1  ;;  %vm197_vm0 = vcmask 64512  }
   0xc   : > { %336 = vset.pattern.permute.xlu0 %v349_v1  ;;  %v196_v8 = vld [vmem:[%s448_s2] sm:$0xff] }
   0xd   : > { %184 = vperm.xlu0 %336, %v181_v0   ;;  %s313_s22 = sshll.u32 %s177_s21, 3 }
   0xe   : > { %s179_s25 = scalar_lea.vmem %s446_s0, %s313_s22 }
   0xf   : > { %v180_v4 = vld [vmem:[%s179_s25] sm:$0xff] }
  0x15   : > { %192 = vperm.xlu0 %336, %v314_v2  }
  0x7f   : > { %v185_v3 = vpop.permute.xlu0 %184 }
  0x80   : > { %v187_v5 = vmul.f32 %v185_v3, %v180_v4 }
  0x87   : > { %v193_v6 = vpop.permute.xlu0 %192 }
  0x88   : > { %v195_v7 = vadd.f32 %v193_v6, %v187_v5 }
  0x8a   : > { %216 = vmatpush.msra.mxu0 %v195_v7 }
  0x8b   : > { %315 = vmatmul.msk.f32.vlgmr.msra.gmra.mxu0 %vm197_vm0, %v196_v8 }
 0x104   : > { %224 = sbr.rel (%p316_p4) target bundleno = 268 (0x10c), region = 40 }
 0x108   : > { %v218_v9 = vpop.f32.mrf.mxu0 }
 0x109   : > { %vm225_vm1 = vcmask 7168   ;;  %v350_v10 = vmov 0.0  }
 0x10a   : > { %226 = vst.msk [vmem:[%s450_s4] sm:$0xff] %vm225_vm1, %v350_v10 }
 0x10b   : > { %227 = vst.msk [vmem:[%s450_s4 + $0x8] sm:$0xff] %vm225_vm1, %v350_v10 }
 0x10c PF: > { %vm229_vm2 = vcmask 523264   ;;  %v238_v12 = vmul.f32 %v218_v9, %v218_v9  ;;  %vm234_vm3 = vcmask 7168   ;;  %p319_p5 = scmp.ne.s32.totalorder %s383_s16, 1 }
 0x10d   : > { %v230_v11 = vsel %vm229_vm2, %v218_v9, 0.0 }
 0x10e   : > { %231 = vadd.xlane.f32.xlu0 %v230_v11  ;;  %v239_v13 = vsel %vm229_vm2, %v238_v12, 0.0 }
 0x111   : > { %v228_v14 = vld [vmem:[%s450_s4] sm:$0xff] }
 0x112   : > { %v317_v17 = vld [vmem:[%s450_s4 + $0x8] sm:$0xff] }
 0x116   : > { %240 = vadd.xlane.f32.xlu0 %v239_v13 }
 0x181   : > { %v232_v15 = vpop.xlane.xlu0 %231 }
 0x182   : > { %v233_v16 = vadd.f32 %v232_v15, %v228_v14 }
 0x184   : > { %235 = vst.msk [vmem:[%s450_s4] sm:$0xff] %vm234_vm3, %v233_v16 }
 0x188   : > { %247 = sbr.rel (%p319_p5) target bundleno = 449 (0x1c1), region = 44 }
 0x189   : > { %v241_v18 = vpop.xlane.xlu0 %240 }
 0x18a   : > { %v242_v19 = vadd.f32 %v317_v17, %v241_v18 }
 0x18c   : > { %318 = vst.msk [vmem:[%s450_s4 + $0x8] sm:$0xff] %vm234_vm3, %v242_v19 }
 0x18d   : > { %v351_v20 = vmov 128.0   ;;  %v248_v25 = vld [vmem:[%s450_s4] sm:$0xff]  ;;  %v321_v44 = vld [vmem:[%s449_s3 + $0x8] sm:$0xff] }
 0x18e   : > { %337 = vrcp.f32 %v351_v20  ;;  %v262_v40 = vld [vmem:[%s449_s3] sm:$0xff] }
 0x193   : > { %v320_v27 = vld [vmem:[%s450_s4 + $0x8] sm:$0xff] }
 0x194   : > { %v338_v21 = vpop.eup %337 }
 0x195   : > { %v250_v22 = vmul.f32 128.0, %v338_v21  ;;  %vm254_vm4 = vweird.f32 %v338_v21 }
 0x197   : > { %v251_v23 = vsub.f32 1.0, %v250_v22 }
 0x199   : > { %v252_v24 = vmul.f32 %v338_v21, %v251_v23 }
 0x19b   : > { %v253_v26 = vadd.f32 %v338_v21, %v252_v24 }
 0x19d   : > { %v255_v28 = vsel %vm254_vm4, %v338_v21, %v253_v26 }
 0x19e   : > { %v256_v29 = vmul.f32 %v255_v28, %v248_v25  ;;  %v258_v30 = vmul.f32 %v320_v27, %v255_v28 }
 0x1a0   : > { %v259_v31 = vmul.f32 %v256_v29, %v256_v29 }
 0x1a2   : > { %v260_v32 = vsub.f32 %v258_v30, %v259_v31 }
 0x1a4   : > { %v261_v33 = vmax.f32 %v260_v32, 0.0 }
 0x1a6   : > { %v263_v34 = vadd.f32 1e-05, %v261_v33 }
 0x1a8   : > { %339 = vrsqrt.f32 %v263_v34  ;;  %vm270_vm5 = vweird.f32 %v263_v34 }
 0x1ae   : > { %v340_v35 = vpop.eup %339 }
 0x1af   : > { %v265_v36 = vmul.f32 %v340_v35, %v263_v34  ;;  %vm271_vm6 = vweird.f32 %v340_v35 }
 0x1b0   : > { %vm272_vm7 = vmor %vm270_vm5, %vm271_vm6 }
 0x1b1   : > { %v266_v37 = vmul.f32 %v340_v35, %v265_v36 }
 0x1b3   : > { %v267_v38 = vmul.f32 0.5, %v266_v37 }
 0x1b5   : > { %v268_v39 = vsub.f32 1.5, %v267_v38 }
 0x1b7   : > { %v269_v41 = vmul.f32 %v340_v35, %v268_v39 }
 0x1b9   : > { %v273_v42 = vsel %vm272_vm7, %v340_v35, %v269_v41 }
 0x1ba   : > { %v274_v43 = vmul.f32 %v273_v42, %v262_v40 }
 0x1bc   : > { %v277_v45 = vmul.f32 %v274_v43, %v256_v29  ;;  %280 = vst.msk [vmem:[%s450_s4] sm:$0xff] %vm234_vm3, %v274_v43 }
 0x1be   : > { %v278_v46 = vsub.f32 %v321_v44, %v277_v45 }
 0x1c0   : > { %322 = vst.msk [vmem:[%s450_s4 + $0x8] sm:$0xff] %vm234_vm3, %v278_v46 }
 0x1c1 PF: > { %s14_s15 = sadd.s32 1, %s347_s15  }
 0x1c2   : > { %p11_p6 = scmp.ge.s32.totalorder %s14_s15, 4  }
 0x1c4   :  { %13 = sbr.rel (!%p11_p6) target bundleno = 1 (0x1), region = 73 }

// kernel: downsample_unit_forward.7
= control target key start
LH: loop header
LB: loop body
LE: loop exit
PB: predicated region body
PF: predicated region fallthrough
CT: control target
= control target key end

     0   :  { %s362_s15 = smov 0   ;;  %s394_s0 = inlined_call_operand.vmem [shape: f32[2,8,64], index: 0, kind: input, shape index: {}]   ;;  %s395_s1 = inlined_call_operand.vmem [shape: f32[2,8,1], index: 1, kind: input, shape index: {}]   ;;  %s396_s2 = inlined_call_operand.vmem [shape: f32[8,8], index: 2, kind: input, shape index: {}]   ;;  %s397_s3 = inlined_call_operand.vmem [shape: f32[2,8,1], index: 3, kind: input, shape index: {}]   ;;  %s398_s4 = inlined_call_operand.vmem [shape: f32[2,8,64], index: 4, kind: output, shape index: {}]  }
   0x1 LB: > { %s305_s16 = sadd.s32 4294967295, %s334_s15   ;;  %p309_p0 = scmp.ge.s32.totalorder %s334_s15, 1  ;;  %s334_s15 = sphi %s362_s15, %s14_s15  }
   0x2   : > { %p161_p1 = scmp.lt.s32.totalorder %s334_s15, 3 }
   0x4   : > { %p162_p2 = pnand %p309_p0, %p161_p1 }
   0x5   : > { %p185_p3 = scmp.lt.s32.totalorder (!%p162_p2), %s305_s16, 1 }
   0x6   : > { %165 = sbr.rel (%p162_p2) target bundleno = 272 (0x110), region = 36 }
   0xb   : > { %v194_v0 = vld [vmem:[%s395_s1] sm:$0xff]  ;;  %v336_v1 = vmov 0   ;;  %v312_v2 = vld [vmem:[%s395_s1 + $0x8] sm:$0xff]  ;;  %s400_s16 = smov (!%p185_p3, %s305_s16), 1  ;;  %vm210_vm0 = vcmask 64512   ;;  %vm250_vm1 = vcmask 523264  }
   0xc   : > { %326 = vset.pattern.permute.xlu0 %v336_v1  ;;  %327 = vset.pattern.permute.xlu1 %v336_v1  ;;  %v234_v3 = vld [vmem:[%s397_s3] sm:$0xff]  ;;  %v314_v4 = vld [vmem:[%s397_s3 + $0x8] sm:$0xff]  ;;  %s310_s25 = sshll.u32 %s400_s16, 3 }
   0xd   : > { %197 = vperm.xlu0 %326, %v194_v0   ;;  %237 = vperm.xlu1 %327, %v234_v3   ;;  %s188_s28 = scalar_lea.vmem %s394_s0, %s310_s25  ;;  %v209_v10 = vld [vmem:[%s396_s2] sm:$0xff]  ;;  %s192_s7 = scalar_lea.vmem %s398_s4, %s310_s25 }
   0xe   : > { %v193_v6 = vld [vmem:[%s188_s28] sm:$0xff] }
  0x15   : > { %205 = vperm.xlu0 %326, %v312_v2   ;;  %245 = vperm.xlu1 %327, %v314_v4  }
  0x7f   : > { %v198_v5 = vpop.permute.xlu0 %197  ;;  %v238_v11 = vpop.permute.xlu1 %237 }
  0x80   : > { %v200_v7 = vmul.f32 %v198_v5, %v193_v6 }
  0x87   : > { %v206_v8 = vpop.permute.xlu0 %205  ;;  %v246_v14 = vpop.permute.xlu1 %245 }
  0x88   : > { %v208_v9 = vadd.f32 %v206_v8, %v200_v7 }
  0x8a   : > { %229 = vmatpush.msra.mxu0 %v208_v9 }
  0x8b   : > { %313 = vmatmul.msk.f32.vlgmr.msra.gmra.mxu0 %vm210_vm0, %v209_v10 }
 0x108   : > { %v231_v12 = vpop.f32.mrf.mxu0 }
 0x109   : > { %v240_v13 = vmul.f32 %v238_v11, %v231_v12 }
 0x10b   : > { %v248_v15 = vadd.f32 %v246_v14, %v240_v13 }
 0x10d   : > { %v249_v16 = vmax.f32 %v248_v15, 0.0 }
 0x10f   : > { %251 = vst.msk [vmem:[%s192_s7] sm:$0xff] %vm250_vm1, %v249_v16 }
 0x110 PF: > { %s14_s15 = sadd.s32 1, %s334_s15  }
 0x111   : > { %p11_p4 = scmp.ge.s32.totalorder %s14_s15, 4  }
 0x113   :  { %13 = sbr.rel (!%p11_p4) target bundleno = 1 (0x1), region = 68 }

// kernel: downsample_unit_forward.5
= control target key start
LH: loop header
LB: loop body
LE: loop exit
PB: predicated region body
PF: predicated region fallthrough
CT: control target
= control target key end

     0   :  { %s2271_s27 = smov 0   ;;  %s3540_s0 = inlined_call_operand.vmem [shape: f32[2,4,4,9,9], index: 0, kind: input, shape index: {}]   ;;  %s3541_s1 = inlined_call_operand.vmem [shape: f32[2,4,4,9,9], index: 1, kind: input, shape index: {}]   ;;  %s3542_s2 = inlined_call_operand.vmem [shape: f32[2,4,1,1], index: 2, kind: input, shape index: {}]   ;;  %s3543_s3 = inlined_call_operand.vmem [shape: f32[4,9,9], index: 3, kind: input, shape index: {}]   ;;  %s3544_s4 = inlined_call_operand.vmem [shape: f32[9,4,1,1], index: 4, kind: input, shape index: {}]   ;;  %s3545_s5 = inlined_call_operand.vmem [shape: f32[9,4,1,1], index: 5, kind: input, shape index: {}]   ;;  %s3546_s6 = inlined_call_operand.vmem [shape: f32[2,8,1,1], index: 6, kind: input, shape index: {}]   ;;  %s3547_s7 = inlined_call_operand.vmem [shape: f32[2,8,8,8], index: 7, kind: output, shape index: {0}]   ;;  %s3548_s8 = inlined_call_operand.vmem [shape: f32[2,8,1,1], index: 8, kind: output, shape index: {1}]  }
   0x1 LB: > { %s2277_s28 = sadd.s32 4294967295, %s2220_s27   ;;  %p1963_p0 = scmp.ge.s32.totalorder %s2220_s27, 1  ;;  %s2220_s27 = sphi %s2271_s27, %s19_s27  }
   0x2   : > { %p270_p1 = scmp.lt.s32.totalorder %s2220_s27, 3 }
   0x4   : > { %p271_p2 = pnand %p1963_p0, %p270_p1 }
   0x6   : > { %274 = sbr.rel (%p271_p2) target bundleno = 1107 (0x453), region = 48 }
   0xb   : > { %v2116_v0 = vld [vmem:[%s3542_s2 + $0x4] ss:$0 sm:$0xff]  ;;  %v2222_v1 = vmov 0   ;;  %v2117_v2 = vld [vmem:[%s3542_s2 + $0x2] ss:$0 sm:$0xff]  ;;  %p309_p3 = scmp.lt.s32.totalorder %s2277_s28, 1 }
   0xc   : > { %2115 = vset.pattern.permute.xlu2 %v2222_v1  ;;  %2114 = vset.pattern.permute.xlu1 %v2222_v1  ;;  %v2118_v3 = vld [vmem:[%s3542_s2] ss:$0 sm:$0xff]  ;;  %v2119_v4 = vld [vmem:[%s3542_s2 + $0x5] ss:$0 sm:$0xff]  ;;  %v2120_v5 = vld [vmem:[%s3542_s2 + $0x3] ss:$0 sm:$0xff] }
   0xd   : > { %2113 = vset.pattern.permute.xlu0 %v2222_v1  ;;  %422 = vperm.xlu2 %2115, %v2116_v0   ;;  %v2121_v6 = vld [vmem:[%s3542_s2 + $0x1] ss:$0 sm:$0xff]  ;;  %v2122_v7 = vld [vmem:[%s3545_s5] ss:$0 sm:$0xff]  ;;  %v2123_v8 = vld [vmem:[%s3542_s2 + $0x7] ss:$0 sm:$0xff] }
   0xe   : > { %398 = vperm.xlu1 %2114, %v2117_v2   ;;  %390 = vperm.xlu0 %2113, %v2118_v3   ;;  %v2124_v9 = vld [vmem:[%s3542_s2 + $0x6] ss:$0 sm:$0xff]  ;;  %v2125_v10 = vld [vmem:[%s3545_s5 + $0x3] ss:$0 sm:$0xff]  ;;  %v2126_v11 = vld [vmem:[%s3545_s5 + $0x2] ss:$0 sm:$0xff] }
   0xf   : > { %v2127_v12 = vld [vmem:[%s3545_s5 + $0x1] ss:$0 sm:$0xff]  ;;  %v2128_v13 = vld [vmem:[%s3545_s5 + $0x6] ss:$0 sm:$0xff]  ;;  %v2129_v14 = vld [vmem:[%s3545_s5 + $0x5] ss:$0 sm:$0xff] }
  0x10   : > { %v2130_v15 = vld [vmem:[%s3545_s5 + $0x4] ss:$0 sm:$0xff]  ;;  %v2131_v16 = vld [vmem:[%s3545_s5 + $0x9] ss:$0 sm:$0xff]  ;;  %v2132_v17 = vld [vmem:[%s3545_s5 + $0x8] ss:$0 sm:$0xff] }
  0x11   : > { %v2133_v18 = vld [vmem:[%s3545_s5 + $0x7] ss:$0 sm:$0xff]  ;;  %v2134_v19 = vld [vmem:[%s3545_s5 + $0xe] ss:$0 sm:$0xff]  ;;  %v2135_v20 = vld [vmem:[%s3545_s5 + $0xb] ss:$0 sm:$0xff] }
  0x12   : > { %v2136_v21 = vld [vmem:[%s3545_s5 + $0xa] ss:$0 sm:$0xff]  ;;  %v2137_v22 = vld [vmem:[%s3545_s5 + $0x11] ss:$0 sm:$0xff]  ;;  %v2138_v23 = vld [vmem:[%s3545_s5 + $0xd] ss:$0 sm:$0xff] }
  0x13   : > { %v2139_v24 = vld [vmem:[%s3545_s5 + $0xc] ss:$0 sm:$0xff]  ;;  %v2140_v25 = vld [vmem:[%s3545_s5 + $0x14] ss:$0 sm:$0xff]  ;;  %v2141_v26 = vld [vmem:[%s3545_s5 + $0x10] ss:$0 sm:$0xff] }
  0x14   : > { %v2142_v27 = vld [vmem:[%s3545_s5 + $0xf] ss:$0 sm:$0xff]  ;;  %v2143_v28 = vld [vmem:[%s3545_s5 + $0x17] ss:$0 sm:$0xff]  ;;  %v2144_v29 = vld [vmem:[%s3545_s5 + $0x13] ss:$0 sm:$0xff] }
  0x15   : > { %426 = vperm.xlu2 %2115, %v2119_v4   ;;  %v2145_v30 = vld [vmem:[%s3545_s5 + $0x12] ss:$0 sm:$0xff]  ;;  %v2146_v31 = vld [vmem:[%s3545_s5 + $0x19] ss:$0 sm:$0xff]  ;;  %v2147_v32 = vld [vmem:[%s3545_s5 + $0x16] ss:$0 sm:$0xff] }
  0x16   : > { %402 = vperm.xlu1 %2114, %v2120_v5   ;;  %394 = vperm.xlu0 %2113, %v2121_v6   ;;  %v2148_v33 = vld [vmem:[%s3545_s5 + $0x15] ss:$0 sm:$0xff]  ;;  %v2149_v34 = vld [vmem:[%s3545_s5 + $0x1c] ss:$0 sm:$0xff]  ;;  %v2150_v35 = vld [vmem:[%s3545_s5 + $0x18] ss:$0 sm:$0xff] }
  0x17   : > { %v2151_v36 = vld [vmem:[%s3545_s5 + $0x1a] ss:$0 sm:$0xff]  ;;  %v2152_v38 = vld [vmem:[%s3545_s5 + $0x1f] ss:$0 sm:$0xff]  ;;  %v2153_v39 = vld [vmem:[%s3545_s5 + $0x1b] ss:$0 sm:$0xff] }
  0x18   : > { %v2154_v40 = vld [vmem:[%s3545_s5 + $0x1d] ss:$0 sm:$0xff]  ;;  %v2155_v42 = vld [vmem:[%s3545_s5 + $0x1e] ss:$0 sm:$0xff]  ;;  %s2405_s29 = scalar_select %p309_p3, %s2277_s28, 1  ;;  %vm828_vm0 = vcmask 1046528  }
  0x19   : > { %s2223_s15 = smov 127   ;;  %vm1439_vm1 = vcmask 64512   ;;  %p2046_p4 = scmp.ne.s32.totalorder %s2277_s28, 0 }
  0x1a   : > { %s2098_s30 = sshll.u32 %s2405_s29, 8 }
  0x1b   : > { %s2415_s11 = scalar_lea.vmem %s3540_s0, %s2098_s30  ;;  %s2466_s14 = scalar_lea.vmem %s3541_s1, %s2098_s30 }
  0x1c   : > { %v345_v44 = vld [vmem:[%s2415_s11 + $0x80] sm:$0xff]  ;;  %v335_v46 = vld [vmem:[%s2415_s11 + $0x10] sm:$0xff]  ;;  %v334_v53 = vld [vmem:[%s2415_s11 + $0x8] sm:$0x1] }
  0x1d   : > { %547 = vperm.xlu2 %2115, %v2122_v7   ;;  %v333_v45 = vld [vmem:[%s2415_s11] sm:$0xff]  ;;  %v347_v47 = vld [vmem:[%s2415_s11 + $0x90] sm:$0xff]  ;;  %v336_v55 = vld [vmem:[%s2415_s11 + $0x18] sm:$0x1] }
  0x1e   : > { %434 = vperm.xlu1 %2114, %v2123_v8   ;;  %430 = vperm.xlu0 %2113, %v2124_v9   ;;  %v349_v48 = vld [vmem:[%s2415_s11 + $0xa0] sm:$0xff]  ;;  %v350_v49 = vld [vmem:[%s2415_s11 + $0xb0] sm:$0xff]  ;;  %v348_v56 = vld [vmem:[%s2415_s11 + $0x98] sm:$0x1] }
  0x1f   : > { %v337_v51 = vld [vmem:[%s2415_s11 + $0x20] sm:$0xff]  ;;  %v338_v52 = vld [vmem:[%s2415_s11 + $0x30] sm:$0xff]  ;;  %v346_v57 = vld [vmem:[%s2415_s11 + $0x88] sm:$0x1] }
  0x25   : > { %559 = vperm.xlu2 %2115, %v2125_v10  }
  0x26   : > { %555 = vperm.xlu1 %2114, %v2126_v11   ;;  %551 = vperm.xlu0 %2113, %v2127_v12   ;;  %v351_v11 = vld [vmem:[%s2415_s11 + $0xc0] sm:$0xff] }
  0x2d   : > { %588 = vperm.xlu2 %2115, %v2128_v13  }
  0x2e   : > { %584 = vperm.xlu1 %2114, %v2129_v14   ;;  %580 = vperm.xlu0 %2113, %v2130_v15   ;;  %v339_v14 = vld [vmem:[%s2415_s11 + $0x40] sm:$0xff]  ;;  %v353_v15 = vld [vmem:[%s2415_s11 + $0xd0] sm:$0xff] }
  0x35   : > { %621 = vperm.xlu2 %2115, %v2131_v16   ;;  %v355_v16 = vld [vmem:[%s2415_s11 + $0xe0] sm:$0xff] }
  0x36   : > { %617 = vperm.xlu1 %2114, %v2132_v17   ;;  %592 = vperm.xlu0 %2113, %v2133_v18   ;;  %v341_v18 = vld [vmem:[%s2415_s11 + $0x50] sm:$0xff] }
  0x3d   : > { %678 = vperm.xlu2 %2115, %v2134_v19   ;;  %v344_v19 = vld [vmem:[%s2415_s11 + $0x70] sm:$0xff] }
  0x3e   : > { %629 = vperm.xlu1 %2114, %v2135_v20   ;;  %625 = vperm.xlu0 %2113, %v2136_v21   ;;  %v343_v20 = vld [vmem:[%s2415_s11 + $0x60] sm:$0xff] }
  0x45   : > { %711 = vperm.xlu2 %2115, %v2137_v22   ;;  %v356_v22 = vld [vmem:[%s2415_s11 + $0xf0] sm:$0xff] }
  0x46   : > { %674 = vperm.xlu1 %2114, %v2138_v23   ;;  %670 = vperm.xlu0 %2113, %v2139_v24   ;;  %v340_v23 = vld [vmem:[%s2415_s11 + $0x48] sm:$0x1] }
  0x47   : > { %v352_v24 = vld [vmem:[%s2415_s11 + $0xc8] sm:$0x1] }
  0x4d   : > { %744 = vperm.xlu2 %2115, %v2140_v25  }
  0x4e   : > { %707 = vperm.xlu1 %2114, %v2141_v26   ;;  %682 = vperm.xlu0 %2113, %v2142_v27  }
  0x55   : > { %756 = vperm.xlu2 %2115, %v2143_v28  }
  0x56   : > { %719 = vperm.xlu1 %2114, %v2144_v29   ;;  %715 = vperm.xlu0 %2113, %v2145_v30  }
  0x5d   : > { %801 = vperm.xlu2 %2115, %v2146_v31  }
  0x5e   : > { %752 = vperm.xlu1 %2114, %v2147_v32   ;;  %748 = vperm.xlu0 %2113, %v2148_v33   ;;  %v354_v33 = vld [vmem:[%s2415_s11 + $0xd8] sm:$0x1] }
  0x65   : > { %863 = vperm.xlu2 %2115, %v2149_v34   ;;  %v342_v34 = vld [vmem:[%s2415_s11 + $0x58] sm:$0x1]  ;;  %s2100_s11 = sshll.u32 %s2405_s29, 6 }
  0x66   : > { %797 = vperm.xlu1 %2114, %v2150_v35   ;;  %805 = vperm.xlu0 %2113, %v2151_v36  }
  0x67   : > { %v423_v37 = vpop.permute.xlu2 %422 }
  0x6d   : > { %875 = vperm.xlu2 %2115, %v2152_v38  }
  0x6e   : > { %809 = vperm.xlu1 %2114, %v2153_v39   ;;  %867 = vperm.xlu0 %2113, %v2154_v40  }
  0x6f   : > { %v2398_v41 = vpop.permute.xlu2 %426 }
  0x76   : > { %871 = vperm.xlu1 %2114, %v2155_v42  }
  0x77   : > { %v2407_v43 = vpop.permute.xlu2 %547 }
  0x7f   : > { %v2423_v50 = vpop.permute.xlu2 %559 }
  0x80   : > { %v399_v54 = vpop.permute.xlu1 %398  ;;  %v391_v59 = vpop.permute.xlu0 %390 }
  0x81   : > { %v2431_v58 = vmul.f32 %v399_v54, %v345_v44  ;;  %v467_v60 = vmul.f32 %v399_v54, %v347_v47  ;;  %v500_v61 = vmul.f32 %v399_v54, %v349_v48  ;;  %v2433_v62 = vmul.f32 %v399_v54, %v350_v49  ;;  %v2483_v44 = vld [vmem:[%s2466_s14 + $0x40] sm:$0xff] }
  0x82   : > { %v405_v63 = vmul.f32 %v391_v59, %v333_v45  ;;  %v463_v0 = vmul.f32 %v391_v59, %v335_v46  ;;  %v498_v1 = vmul.f32 %v391_v59, %v337_v51  ;;  %v516_v2 = vmul.f32 %v391_v59, %v338_v52 }
  0x83   : > { %v406_v3 = vmul.f32 %v391_v59, %v334_v53  ;;  %v464_v4 = vmul.f32 %v391_v59, %v336_v55  ;;  %v2435_v5 = vmul.f32 %v399_v54, %v348_v56  ;;  %v2437_v6 = vmul.f32 %v399_v54, %v346_v57 }
  0x84   : > { %v2439_v7 = vadd.f32 %v423_v37, %v405_v63  ;;  %v2441_v8 = vadd.f32 %v463_v0, %v423_v37  ;;  %v2443_v9 = vadd.f32 %v498_v1, %v423_v37  ;;  %v2445_v10 = vadd.f32 %v516_v2, %v423_v37  ;;  %v2512_v1 = vld [vmem:[%s2466_s14 + $0x90] sm:$0xff]  ;;  %v2515_v2 = vld [vmem:[%s2466_s14 + $0xa0] sm:$0xff] }
  0x85   : > { %v2448_v12 = vadd.f32 %v423_v37, %v406_v3  ;;  %v2450_v13 = vadd.f32 %v464_v4, %v423_v37  ;;  %v2518_v3 = vld [vmem:[%s2466_s14 + $0x80] sm:$0xff] }
  0x87   : > { %v589_v17 = vpop.permute.xlu2 %588 }
  0x88   : > { %v403_v21 = vpop.permute.xlu1 %402  ;;  %v395_v26 = vpop.permute.xlu0 %394 }
  0x89   : > { %v411_v25 = vmul.f32 %v403_v21, %v351_v11  ;;  %v469_v27 = vmul.f32 %v403_v21, %v353_v15  ;;  %v501_v28 = vmul.f32 %v403_v21, %v355_v16  ;;  %v407_v29 = vmul.f32 %v395_v26, %v339_v14 }
  0x8a   : > { %v465_v30 = vmul.f32 %v395_v26, %v341_v18  ;;  %v517_v31 = vmul.f32 %v395_v26, %v344_v19  ;;  %v499_v32 = vmul.f32 %v395_v26, %v343_v20  ;;  %v519_v35 = vmul.f32 %v403_v21, %v356_v22  ;;  %v2538_v19 = vld [vmem:[%s2466_s14 + $0x50] sm:$0xff]  ;;  %v2541_v20 = vld [vmem:[%s2466_s14] sm:$0xff] }
  0x8b   : > { %v408_v36 = vmul.f32 %v395_v26, %v340_v23  ;;  %v412_v37 = vmul.f32 %v403_v21, %v352_v24  ;;  %v2471_v38 = vadd.f32 %v2398_v41, %v407_v29  ;;  %v470_v46 = vmul.f32 %v403_v21, %v354_v33  ;;  %v2546_v22 = vld [vmem:[%s2466_s14 + $0x10] sm:$0xff]  ;;  %v361_v29 = vld [vmem:[%s2466_s14 + $0x20] sm:$0xff] }
  0x8c   : > { %v2474_v39 = vadd.f32 %v465_v30, %v2398_v41  ;;  %v2477_v40 = vadd.f32 %v517_v31, %v2398_v41  ;;  %v2480_v42 = vadd.f32 %v499_v32, %v2398_v41  ;;  %v466_v47 = vmul.f32 %v395_v26, %v342_v34  ;;  %v2555_v30 = vld [vmem:[%s2466_s14 + $0xc0] sm:$0xff]  ;;  %v2558_v32 = vld [vmem:[%s2466_s14 + $0xd0] sm:$0xff] }
  0x8d   : > { %v2486_v45 = vadd.f32 %v2398_v41, %v408_v36 }
  0x8e   : > { %v2489_v49 = vadd.f32 %v466_v47, %v2398_v41  ;;  %v379_v47 = vld [vmem:[%s2466_s14 + $0xe0] sm:$0xff] }
  0x8f   : > { %v622_v48 = vpop.permute.xlu2 %621 }
  0x90   : > { %3549 = vst [vmem:[#allocation2_spill] sm:$0xff] %v2489_v49  ;;  %v633_v51 = vmul.f32 %v622_v48, %v2483_v44  ;;  %v435_v52 = vpop.permute.xlu1 %434  ;;  %v431_v53 = vpop.permute.xlu0 %430 }
  0x91   : > { %v2492_v54 = vadd.f32 %v435_v52, %v411_v25  ;;  %v2494_v55 = vadd.f32 %v469_v27, %v435_v52  ;;  %v2496_v56 = vadd.f32 %v501_v28, %v435_v52  ;;  %v2500_v57 = vadd.f32 %v431_v53, %v2431_v58 }
  0x92   : > { %642 = vrot.lane.b32.xlu0 %v633_v51, %s2223_s15  ;;  %v2502_v59 = vadd.f32 %v467_v60, %v431_v53  ;;  %v2504_v41 = vadd.f32 %v500_v61, %v431_v53  ;;  %v2506_v63 = vadd.f32 %v519_v35, %v435_v52  ;;  %v2509_v0 = vadd.f32 %v2433_v62, %v431_v53 }
  0x93   : > { %v597_v58 = vmul.f32 %v589_v17, %v2512_v1  ;;  %v2521_v4 = vadd.f32 %v435_v52, %v412_v37  ;;  %v2523_v61 = vadd.f32 %v470_v46, %v435_v52  ;;  %v2529_v14 = vadd.f32 %v2435_v5, %v431_v53 }
  0x94   : > { %v2532_v15 = vadd.f32 %v431_v53, %v2437_v6  ;;  %v562_v25 = vmul.f32 %v2407_v43, %v2541_v20  ;;  %v565_v43 = vmul.f32 %v2423_v50, %v2555_v30  ;;  %v367_v50 = vld [vmem:[%s2466_s14 + $0x60] sm:$0xff] }
  0x95   : > { %3550 = vst [vmem:[#allocation3_spill] sm:$0xff] %v2529_v14  ;;  %v358_v14 = vld [vmem:[%s2466_s14 + $0x8] sm:$0x1] }
  0x96   : > { %3551 = vst [vmem:[#allocation4_spill] sm:$0xff] %v2532_v15 }
  0x97   : > { %v679_v60 = vpop.permute.xlu2 %678 }
  0x98   : > { %v2526_v11 = vmul.f32 %v679_v60, %v2515_v2  ;;  %v556_v62 = vpop.permute.xlu1 %555  ;;  %v552_v17 = vpop.permute.xlu0 %551 }
  0x99   : > { %v564_v16 = vmul.f32 %v556_v62, %v2518_v3  ;;  %v563_v6 = vmul.f32 %v552_v17, %v2483_v44  ;;  %v2156_v62 = vld [vmem:[%s3545_s5 + $0x20] ss:$0 sm:$0xff] }
  0x9b   : > { %v2535_v18 = vadd.f32 %v597_v58, %v564_v16 }
  0x9f   : > { %v2543_v21 = vpop.permute.xlu2 %711 }
  0xa0   : > { %v585_v5 = vpop.permute.xlu1 %584  ;;  %v581_v24 = vpop.permute.xlu0 %580 }
  0xa1   : > { %v596_v23 = vmul.f32 %v585_v5, %v2538_v19  ;;  %v595_v26 = vmul.f32 %v581_v24, %v2546_v22 }
  0xa3   : > { %v600_v27 = vadd.f32 %v596_v23, %v563_v6  ;;  %v599_v28 = vadd.f32 %v595_v26, %v562_v25  ;;  %v2157_v23 = vld [vmem:[%s3545_s5 + $0x23] ss:$0 sm:$0xff] }
  0xa7   : > { %v745_v31 = vpop.permute.xlu2 %744 }
  0xa8   : > { %v759_v33 = vmul.f32 %v745_v31, %v361_v29  ;;  %v618_v34 = vpop.permute.xlu1 %617  ;;  %v593_v36 = vpop.permute.xlu0 %592 }
  0xa9   : > { %v632_v35 = vmul.f32 %v618_v34, %v2541_v20  ;;  %v598_v37 = vmul.f32 %v593_v36, %v2558_v32 }
  0xaa   : > { %767 = vrot.lane.b32.xlu0 %v759_v33, %s2223_s15 }
  0xab   : > { %640 = vrot.lane.b32.xlu2 %v632_v35, %s2223_s15  ;;  %v602_v46 = vadd.f32 %v598_v37, %v565_v43  ;;  %v2158_v37 = vld [vmem:[%s3545_s5 + $0x21] ss:$0 sm:$0xff] }
  0xaf   : > { %v757_v48 = vpop.permute.xlu2 %756 }
  0xb0   : > { %v762_v51 = vmul.f32 %v757_v48, %v379_v47  ;;  %v630_v52 = vpop.permute.xlu1 %629  ;;  %v626_v58 = vpop.permute.xlu0 %625 }
  0xb1   : > { %v635_v53 = vmul.f32 %v630_v52, %v2555_v30  ;;  %v634_v60 = vmul.f32 %v626_v58, %v2518_v3 }
  0xb2   : > { %773 = vrot.lane.b32.xlu0 %v762_v51, %s2223_s15 }
  0xb3   : > { %646 = vrot.lane.b32.xlu2 %v635_v53, %s2223_s15  ;;  %644 = vrot.lane.b32.xlu1 %v634_v60, %s2223_s15  ;;  %v368_v53 = vld [vmem:[%s2466_s14 + $0x70] sm:$0xff] }
  0xb4   : > { %v362_v60 = vld [vmem:[%s2466_s14 + $0x30] sm:$0xff] }
  0xb8   : > { %v675_v16 = vpop.permute.xlu1 %674  ;;  %v671_v5 = vpop.permute.xlu0 %670 }
  0xb9   : > { %v686_v17 = vmul.f32 %v675_v16, %v367_v50  ;;  %v685_v6 = vmul.f32 %v671_v5, %v361_v29  ;;  %v2159_v29 = vld [vmem:[%s3545_s5 + $0x22] ss:$0 sm:$0xff]  ;;  %v723_v5 = vmul.f32 %v2543_v21, %v368_v53 }
  0xba   : > { %928 = vperm.xlu0 %2113, %v2156_v62  }
  0xc0   : > { %v708_v24 = vpop.permute.xlu1 %707  ;;  %v683_v25 = vpop.permute.xlu0 %682 }
  0xc1   : > { %v688_v26 = vmul.f32 %v683_v25, %v379_v47  ;;  %v2590_v47 = vpop.permute.xlu2 %801  ;;  %v722_v25 = vmul.f32 %v708_v24, %v362_v60 }
  0xc2   : > { %940 = vperm.xlu0 %2113, %v2157_v23  }
  0xc8   : > { %v720_v31 = vpop.permute.xlu1 %719  ;;  %v2579_v33 = vpop.permute.xlu0 %715 }
  0xc9   : > { %v864_v48 = vpop.permute.xlu2 %863 }
  0xd0   : > { %v753_v34 = vpop.permute.xlu1 %752  ;;  %v749_v36 = vpop.permute.xlu0 %748 }
  0xd1   : > { %v761_v35 = vmul.f32 %v753_v34, %v2515_v2  ;;  %v760_v43 = vmul.f32 %v749_v36, %v367_v50  ;;  %v876_v52 = vpop.permute.xlu2 %875 }
  0xd3   : > { %771 = vrot.lane.b32.xlu2 %v761_v35, %s2223_s15  ;;  %769 = vrot.lane.b32.xlu1 %v760_v43, %s2223_s15 }
  0xd8   : > { %v806_v2 = vpop.permute.xlu0 %805  ;;  %v798_v36 = vpop.permute.xlu1 %797 }
  0xd9   : > { %v812_v21 = vmul.f32 %v798_v36, %v2541_v20 }
  0xdb   : > { %936 = vperm.xlu2 %2115, %v2159_v29   ;;  %932 = vperm.xlu1 %2114, %v2158_v37   ;;  %v380_v29 = vld [vmem:[%s2466_s14 + $0xf0] sm:$0xff]  ;;  %v829_v53 = vrot.slane %v812_v21, 1  ;;  %v370_v21 = vld [vmem:[%s2466_s14 + $0x88] sm:$0x1] }
  0xdc   : > { %v725_v15 = vmul.f32 %v720_v31, %v380_v29 }
  0xe0   : > { %v2592_v51 = vpop.permute.xlu0 %867 }
 0x104   : > { %v643_v58 = vpop.permute.xlu0 %642 }
 0x105   : > { %v653_v50 = vadd.f32 %v643_v58, %v600_v27  ;;  %v641_v62 = vpop.permute.xlu2 %640 }
 0x106   : > { %v652_v16 = vadd.f32 %v641_v62, %v599_v28  ;;  %v810_v28 = vpop.permute.xlu1 %809  ;;  %v360_v62 = vld [vmem:[%s2466_s14 + $0x18] sm:$0x1] }
 0x107   : > { %v690_v23 = vadd.f32 %v686_v17, %v653_v50  ;;  %v813_v17 = vmul.f32 %v798_v36, %v358_v14  ;;  %v879_v24 = vmul.f32 %v864_v48, %v360_v62  ;;  %v376_v50 = vld [vmem:[%s2466_s14 + $0xc8] sm:$0x1] }
 0x108   : > { %v689_v34 = vadd.f32 %v685_v6, %v652_v16  ;;  %v878_v6 = vmul.f32 %v864_v48, %v2546_v22  ;;  %v884_v48 = vmul.f32 %v876_v52, %v2558_v32  ;;  %v817_v32 = vmul.f32 %v806_v2, %v370_v21 }
 0x109   : > { %v2597_v35 = vadd.f32 %v723_v5, %v690_v23  ;;  %v830_v60 = vrot.slane %v813_v17, 1  ;;  %v895_v5 = vrot.slane %v879_v24, 1  ;;  %v372_v24 = vld [vmem:[%s2466_s14 + $0x98] sm:$0x1] }
 0x10a   : > { %v726_v43 = vadd.f32 %v722_v25, %v689_v34  ;;  %v894_v16 = vrot.slane %v878_v6, 1  ;;  %v903_v62 = vrot.slane %v884_v48, 1  ;;  %v374_v6 = vld [vmem:[%s2466_s14 + $0xb0] sm:$0xff] }
 0x10b   : > { %v831_v25 = vsel %vm828_vm0, %v829_v53, %v830_v60  ;;  %v816_v60 = vmul.f32 %v806_v2, %v2518_v3 }
 0x10c   : > { %v896_v36 = vsel %vm828_vm0, %v894_v16, %v895_v5  ;;  %v724_v5 = vmul.f32 %v2579_v33, %v374_v6 }
 0x10d   : > { %v647_v37 = vpop.permute.xlu2 %646 }
 0x10e   : > { %v655_v49 = vadd.f32 %v647_v37, %v602_v46  ;;  %v378_v46 = vld [vmem:[%s2466_s14 + $0xd8] sm:$0x1]  ;;  %v872_v31 = vpop.permute.xlu1 %871 }
 0x10f   : > { %v885_v34 = vmul.f32 %v876_v52, %v378_v46 }
 0x110   : > { %v692_v27 = vadd.f32 %v688_v26, %v655_v49  ;;  %v819_v26 = vmul.f32 %v810_v28, %v376_v50 }
 0x112   : > { %v729_v58 = vadd.f32 %v725_v15, %v692_v27  ;;  %v818_v15 = vmul.f32 %v810_v28, %v2555_v30  ;;  %v839_v27 = vrot.slane %v819_v26, 1 }
 0x114   : > { %v838_v37 = vrot.slane %v818_v15, 1  ;;  %v883_v15 = vmul.f32 %v872_v31, %v372_v24 }
 0x116   : > { %v840_v53 = vsel %vm828_vm0, %v838_v37, %v839_v27  ;;  %v901_v2 = vrot.slane %v883_v15, 1 }
 0x11c   : > { %v768_v23 = vpop.permute.xlu0 %767 }
 0x11d   : > { %v779_v49 = vadd.f32 %v768_v23, %v726_v43  ;;  %v904_v43 = vrot.slane %v885_v34, 1 }
 0x11f   : > { %v845_v22 = vadd.f32 %v831_v25, %v779_v49  ;;  %v905_v46 = vsel %vm828_vm0, %v903_v62, %v904_v43  ;;  %v882_v49 = vmul.f32 %v872_v31, %v2512_v1  ;;  %v835_v25 = vrot.slane %v816_v60, 1 }
 0x121   : > { %v2610_v29 = vadd.f32 %v896_v36, %v845_v22  ;;  %v836_v22 = vrot.slane %v817_v32, 1  ;;  %v900_v36 = vrot.slane %v882_v49, 1  ;;  %v364_v49 = vld [vmem:[%s2466_s14 + $0x48] sm:$0x1] }
 0x122   : > { %v815_v15 = vmul.f32 %v2590_v47, %v364_v49 }
 0x123   : > { %v837_v1 = vsel %vm828_vm0, %v835_v25, %v836_v22  ;;  %v902_v43 = vsel %vm828_vm0, %v900_v36, %v901_v2 }
 0x124   : > { %v774_v17 = vpop.permute.xlu0 %773 }
 0x125   : > { %v782_v28 = vadd.f32 %v774_v17, %v729_v58  ;;  %v645_v23 = vpop.permute.xlu1 %644 }
 0x126   : > { %v654_v52 = vadd.f32 %v645_v23, %v2535_v18 }
 0x127   : > { %v848_v16 = vadd.f32 %v840_v53, %v782_v28 }
 0x128   : > { %v691_v26 = vadd.f32 %v2526_v11, %v654_v52 }
 0x129   : > { %v2622_v58 = vadd.f32 %v905_v46, %v848_v16 }
 0x12a   : > { %v728_v48 = vadd.f32 %v724_v5, %v691_v26  ;;  %v880_v26 = vmul.f32 %v2592_v51, %v2538_v19 }
 0x12c   : > { %v929_v34 = vpop.permute.xlu0 %928 }
 0x12d   : > { %v943_v18 = vmul.f32 %v929_v34, %v2541_v20  ;;  %v944_v37 = vmul.f32 %v929_v34, %v358_v14  ;;  %v772_v27 = vpop.permute.xlu2 %771  ;;  %v897_v34 = vrot.slane %v880_v26, 1  ;;  %v453_v26 = vld [vmem:[%s3543_s3] sm:$0xff] }
 0x12e   : > { %v781_v33 = vadd.f32 %v772_v27, %v728_v48  ;;  %v833_v48 = vrot.slane %v815_v15, 1  ;;  %v479_v15 = vmax.f32 %v2441_v8, 0.0 }
 0x12f   : > { %v959_v17 = vrot.slane %v943_v18, 1  ;;  %v960_v62 = vrot.slane %v944_v37, 1  ;;  %v2162_v18 = vld [vmem:[%s3544_s4 + $0x5] ss:$0 sm:$0xff] }
 0x130   : > { %v847_v31 = vadd.f32 %v837_v1, %v781_v33 }
 0x131   : > { %v961_v11 = vsel %vm828_vm0, %v959_v17, %v960_v62  ;;  %v2164_v62 = vld [vmem:[%s3544_s4 + $0x8] ss:$0 sm:$0xff] }
 0x132   : > { %971 = vrot.lane.b32.xlu1 %v961_v11, %s2223_s15  ;;  %v2629_v6 = vadd.f32 %v902_v43, %v847_v31  ;;  %v2165_v31 = vld [vmem:[%s3544_s4 + $0x7] ss:$0 sm:$0xff] }
 0x134   : > { %v941_v28 = vpop.permute.xlu0 %940 }
 0x135   : > { %v949_v14 = vmul.f32 %v941_v28, %v2555_v30  ;;  %v950_v20 = vmul.f32 %v941_v28, %v376_v50  ;;  %v937_v24 = vpop.permute.xlu2 %936  ;;  %v2160_v30 = vld [vmem:[%s3544_s4 + $0x2] ss:$0 sm:$0xff]  ;;  %v366_v50 = vld [vmem:[%s2466_s14 + $0x58] sm:$0x1]  ;;  %s2691_s14 = scalar_lea.vmem %s3547_s7, %s2100_s11 }
 0x136   : > { %v947_v23 = vmul.f32 %v937_v24, %v2518_v3  ;;  %v948_v53 = vmul.f32 %v937_v24, %v370_v21  ;;  %v2161_v3 = vld [vmem:[%s3544_s4 + $0x1] ss:$0 sm:$0xff]  ;;  %v814_v21 = vmul.f32 %v2590_v47, %v2483_v44  ;;  %v881_v25 = vmul.f32 %v2592_v51, %v366_v50  ;;  %v2163_v47 = vld [vmem:[%s3544_s4 + $0x4] ss:$0 sm:$0xff]  ;;  %v2169_v24 = vld [vmem:[%s3544_s4 + $0x3] ss:$0 sm:$0xff] }
 0x137   : > { %v968_v60 = vrot.slane %v949_v14, 1  ;;  %v969_v32 = vrot.slane %v950_v20, 1  ;;  %v2166_v14 = vld [vmem:[%s3544_s4 + $0xb] ss:$0 sm:$0xff]  ;;  %v2167_v20 = vld [vmem:[%s3544_s4] ss:$0 sm:$0xff] }
 0x138   : > { %v965_v52 = vrot.slane %v947_v23, 1  ;;  %v966_v16 = vrot.slane %v948_v53, 1  ;;  %v832_v22 = vrot.slane %v814_v21, 1  ;;  %v898_v36 = vrot.slane %v881_v25, 1  ;;  %v2170_v23 = vld [vmem:[%s3544_s4 + $0x6] ss:$0 sm:$0xff] }
 0x139   : > { %v970_v5 = vsel %vm828_vm0, %v968_v60, %v969_v32  ;;  %v2171_v53 = vld [vmem:[%s3544_s4 + $0x9] ss:$0 sm:$0xff]  ;;  %v445_v21 = vmax.f32 %v2439_v7, 0.0  ;;  %v1974_v25 = vld [vmem:[%s3543_s3 + $0x10] sm:$0xff] }
 0x13a   : > { %977 = vrot.lane.b32.xlu1 %v970_v5, %s2223_s15  ;;  %v967_v46 = vsel %vm828_vm0, %v965_v52, %v966_v16  ;;  %v834_v19 = vsel %vm828_vm0, %v832_v22, %v833_v48  ;;  %v899_v27 = vsel %vm828_vm0, %v897_v34, %v898_v36 }
 0x13b   : > { %975 = vrot.lane.b32.xlu0 %v967_v46, %s2223_s15  ;;  %v2730_v34 = vmul.f32 %v453_v26, %v445_v21  ;;  %v2180_v21 = vld [vmem:[%s3544_s4 + $0x14] ss:$0 sm:$0xff] }
 0x142   : > { %1008 = vperm.xlu1 %2114, %v2160_v30  }
 0x143   : > { %1004 = vperm.xlu0 %2113, %v2161_v3   ;;  %v447_v3 = vmax.f32 %v2471_v38, 0.0 }
 0x145   : > { %v770_v2 = vpop.permute.xlu1 %769  ;;  %v2726_v22 = vmul.f32 %v453_v26, %v447_v3  ;;  %v2175_v3 = vld [vmem:[%s3544_s4 + $0x10] ss:$0 sm:$0xff] }
 0x146   : > { %v780_v37 = vadd.f32 %v770_v2, %v2597_v35 }
 0x148   : > { %v846_v51 = vadd.f32 %v834_v19, %v780_v37  ;;  %v451_v19 = vmax.f32 %v2492_v54, 0.0 }
 0x14a   : > { %1037 = vperm.xlu1 %2114, %v2162_v18   ;;  %v911_v33 = vadd.f32 %v899_v27, %v846_v51  ;;  %v485_v51 = vmax.f32 %v2494_v55, 0.0 }
 0x14b   : > { %1033 = vperm.xlu0 %2113, %v2163_v47  }
 0x14d   : > { %v933_v17 = vpop.permute.xlu1 %932 }
 0x14e   : > { %v945_v1 = vmul.f32 %v933_v17, %v2483_v44  ;;  %v946_v35 = vmul.f32 %v933_v17, %v364_v49  ;;  %v2168_v44 = vld [vmem:[%s3544_s4 + $0xa] ss:$0 sm:$0xff]  ;;  %v483_v17 = vmax.f32 %v2502_v59, 0.0 }
 0x150   : > { %v962_v11 = vrot.slane %v945_v1, 1  ;;  %v963_v43 = vrot.slane %v946_v35, 1  ;;  %v2746_v35 = vmul.f32 %v1974_v25, %v485_v51 }
 0x152   : > { %1070 = vperm.xlu1 %2114, %v2164_v62   ;;  %v964_v28 = vsel %vm828_vm0, %v962_v11, %v963_v43  ;;  %v2744_v62 = vmul.f32 %v453_v26, %v451_v19  ;;  %v1976_v19 = vld [vmem:[%s3543_s3 + $0x20] sm:$0xff] }
 0x153   : > { %1045 = vperm.xlu0 %2113, %v2165_v31   ;;  %973 = vrot.lane.b32.xlu2 %v964_v28, %s2223_s15  ;;  %v2751_v28 = vmul.f32 %v1974_v25, %v483_v17 }
 0x15a   : > { %1082 = vperm.xlu1 %2114, %v2166_v14  }
 0x15b   : > { %1078 = vperm.xlu0 %2113, %v2168_v44   ;;  %1000 = vperm.xlu2 %2115, %v2167_v20  }
 0x163   : > { %1012 = vperm.xlu2 %2115, %v2169_v24  }
 0x16b   : > { %1041 = vperm.xlu2 %2115, %v2170_v23  }
 0x173   : > { %1074 = vperm.xlu2 %2115, %v2171_v53  }
 0x1a4   : > { %v972_v60 = vpop.permute.xlu1 %971 }
 0x1a5   : > { %v2694_v32 = vadd.f32 %v972_v60, %v2610_v29 }
 0x1a7   : > { %1440 = vst.msk [vmem:[%s2691_s14] sm:$0xff] %vm1439_vm1, %v2694_v32 }
 0x1ac   : > { %v978_v52 = vpop.permute.xlu1 %977 }
 0x1ad   : > { %v2700_v16 = vadd.f32 %v978_v52, %v2622_v58  ;;  %v976_v5 = vpop.permute.xlu0 %975  ;;  %v974_v49 = vpop.permute.xlu2 %973 }
 0x1ae   : > { %v2703_v46 = vadd.f32 %v976_v5, %v2629_v6  ;;  %v2708_v30 = vadd.f32 %v974_v49, %v911_v33  ;;  %v481_v6 = vmax.f32 %v2474_v39, 0.0  ;;  %v2732_v39 = vmul.f32 %v1974_v25, %v479_v15  ;;  %v2174_v49 = vld [vmem:[%s3544_s4 + $0xe] ss:$0 sm:$0xff]  ;;  %v2178_v15 = vld [vmem:[%s3544_s4 + $0x13] ss:$0 sm:$0xff] }
 0x1af   : > { %1443 = vst.msk [vmem:[%s2691_s14 + $0x18] sm:$0xff] %vm1439_vm1, %v2700_v16  ;;  %v449_v33 = vmax.f32 %v2500_v57, 0.0 }
 0x1b0   : > { %1442 = vst.msk [vmem:[%s2691_s14 + $0x10] sm:$0xff] %vm1439_vm1, %v2703_v46  ;;  %v2728_v48 = vmul.f32 %v1974_v25, %v481_v6  ;;  %v2176_v6 = vld [vmem:[%s3544_s4 + $0xf] ss:$0 sm:$0xff]  ;;  %v2183_v25 = vld [vmem:[%s3544_s4 + $0x17] ss:$0 sm:$0xff] }
 0x1b1   : > { %1441 = vst.msk [vmem:[%s2691_s14 + $0x8] sm:$0xff] %vm1439_vm1, %v2708_v30  ;;  %v2748_v31 = vmul.f32 %v453_v26, %v449_v33  ;;  %v2179_v26 = vld [vmem:[%s3544_s4 + $0x12] ss:$0 sm:$0xff] }
 0x1b4   : > { %v1009_v29 = vpop.permute.xlu1 %1008 }
 0x1b5   : > { %v1005_v50 = vpop.permute.xlu0 %1004  ;;  %v1001_v58 = vpop.permute.xlu2 %1000  ;;  %v1017_v57 = vmul.f32 %v1009_v29, %v2748_v31  ;;  %v2172_v29 = vld [vmem:[%s3544_s4 + $0xd] ss:$0 sm:$0xff] }
 0x1b6   : > { %v1016_v7 = vmul.f32 %v1005_v50, %v2726_v22  ;;  %v1015_v2 = vmul.f32 %v1001_v58, %v2730_v34  ;;  %v2173_v50 = vld [vmem:[%s3544_s4 + $0xc] ss:$0 sm:$0xff]  ;;  %v2177_v58 = vld [vmem:[%s3544_s4 + $0x11] ss:$0 sm:$0xff] }
 0x1bc   : > { %v1038_v38 = vpop.permute.xlu1 %1037 }
 0x1bd   : > { %v1049_v8 = vmul.f32 %v1038_v38, %v2728_v48  ;;  %v1034_v36 = vpop.permute.xlu0 %1033  ;;  %v1013_v37 = vpop.permute.xlu2 %1012  ;;  %v2181_v38 = vld [vmem:[%s3544_s4 + $0x16] ss:$0 sm:$0xff] }
 0x1be   : > { %v1048_v18 = vmul.f32 %v1034_v36, %v2732_v39  ;;  %v1018_v54 = vmul.f32 %v1013_v37, %v2744_v62  ;;  %v508_v37 = vmax.f32 %v2504_v41, 0.0 }
 0x1bf   : > { %v2738_v47 = vadd.f32 %v1049_v8, %v1016_v7  ;;  %v2182_v7 = vld [vmem:[%s3544_s4 + $0x15] ss:$0 sm:$0xff] }
 0x1c0   : > { %v1052_v27 = vadd.f32 %v1048_v18, %v1015_v2  ;;  %v514_v51 = vmul.f32 %v1976_v19, %v508_v37  ;;  %v526_v37 = vmax.f32 %v2509_v0, 0.0 }
 0x1c4   : > { %v1071_v1 = vpop.permute.xlu1 %1070 }
 0x1c5   : > { %v1085_v11 = vmul.f32 %v1071_v1, %v2730_v34  ;;  %v1046_v43 = vpop.permute.xlu0 %1045  ;;  %v1042_v14 = vpop.permute.xlu2 %1041  ;;  %v525_v1 = vmax.f32 %v2477_v40, 0.0  ;;  %v509_v40 = vmax.f32 %v2496_v56, 0.0 }
 0x1c6   : > { %v1051_v55 = vmul.f32 %v1046_v43, %v2746_v35  ;;  %v1050_v59 = vmul.f32 %v1042_v14, %v2751_v28 }
 0x1c7   : > { %1093 = vrot.lane.b32.xlu2 %v1085_v11, %s2223_s15  ;;  %v1977_v11 = vld [vmem:[%s3543_s3 + $0x30] sm:$0xff] }
 0x1c8   : > { %v1055_v44 = vadd.f32 %v1051_v55, %v1018_v54  ;;  %v1054_v20 = vadd.f32 %v1050_v59, %v1017_v57  ;;  %v531_v43 = vmul.f32 %v1977_v11, %v525_v1  ;;  %v506_v55 = vmax.f32 %v2443_v9, 0.0 }
 0x1ca   : > { %v512_v14 = vmul.f32 %v1976_v19, %v506_v55 }
 0x1cc   : > { %v1083_v24 = vpop.permute.xlu1 %1082 }
 0x1cd   : > { %v1088_v23 = vmul.f32 %v1083_v24, %v2744_v62  ;;  %v1079_v53 = vpop.permute.xlu0 %1078  ;;  %v1075_v52 = vpop.permute.xlu2 %1074 }
 0x1ce   : > { %v1087_v60 = vmul.f32 %v1079_v53, %v2748_v31  ;;  %v1086_v5 = vmul.f32 %v1075_v52, %v2726_v22  ;;  %v515_v52 = vmul.f32 %v1976_v19, %v509_v40  ;;  %v2194_v40 = vld [vmem:[%s3544_s4 + $0x1d] ss:$0 sm:$0xff] }
 0x1cf   : > { %1099 = vrot.lane.b32.xlu2 %v1088_v23, %s2223_s15 }
 0x1d0   : > { %1097 = vrot.lane.b32.xlu1 %v1087_v60, %s2223_s15  ;;  %1095 = vrot.lane.b32.xlu0 %v1086_v5, %s2223_s15  ;;  %v507_v60 = vmax.f32 %v2480_v42, 0.0  ;;  %v2184_v42 = vld [vmem:[%s3544_s4 + $0x21] ss:$0 sm:$0xff] }
 0x1d2   : > { %v513_v5 = vmul.f32 %v1976_v19, %v507_v60 }
 0x1d7   : > { %1131 = vperm.xlu2 %2115, %v2174_v49  }
 0x1d8   : > { %1127 = vperm.xlu1 %2114, %v2172_v29   ;;  %1123 = vperm.xlu0 %2113, %v2173_v50  }
 0x1df   : > { %1164 = vperm.xlu2 %2115, %v2177_v58  }
 0x1e0   : > { %1160 = vperm.xlu1 %2114, %v2175_v3   ;;  %1135 = vperm.xlu0 %2113, %v2176_v6  }
 0x1e7   : > { %1197 = vperm.xlu2 %2115, %v2180_v21  }
 0x1e8   : > { %1172 = vperm.xlu1 %2114, %v2178_v15   ;;  %1168 = vperm.xlu0 %2113, %v2179_v26  }
 0x1ef   : > { %1209 = vperm.xlu2 %2115, %v2183_v25  }
 0x1f0   : > { %1205 = vperm.xlu1 %2114, %v2181_v38   ;;  %1201 = vperm.xlu0 %2113, %v2182_v7   ;;  %v527_v7 = vmax.f32 %v2506_v63, 0.0  ;;  %v2186_v63 = vld [vmem:[%s3544_s4 + $0x1c] ss:$0 sm:$0xff] }
 0x221   : > { %v1094_v8 = vpop.permute.xlu2 %1093 }
 0x222   : > { %v1105_v36 = vadd.f32 %v1094_v8, %v1052_v27 }
 0x229   : > { %v1100_v2 = vpop.permute.xlu2 %1099 }
 0x22a   : > { %v1108_v18 = vadd.f32 %v1100_v2, %v1055_v44 }
 0x231   : > { %v1132_v33 = vpop.permute.xlu2 %1131 }
 0x232   : > { %v1140_v17 = vmul.f32 %v1132_v33, %v514_v51  ;;  %v532_v33 = vmul.f32 %v1977_v11, %v526_v37 }
 0x239   : > { %v1165_v54 = vpop.permute.xlu2 %1164 }
 0x23a   : > { %v1176_v27 = vmul.f32 %v1165_v54, %v531_v43 }
 0x241   : > { %v1198_v41 = vpop.permute.xlu2 %1197 }
 0x242   : > { %v1098_v57 = vpop.permute.xlu1 %1097  ;;  %v1212_v59 = vmul.f32 %v1198_v41, %v512_v14  ;;  %v1096_v24 = vpop.permute.xlu0 %1095  ;;  %v2188_v41 = vld [vmem:[%s3544_s4 + $0x20] ss:$0 sm:$0xff] }
 0x243   : > { %v1107_v44 = vadd.f32 %v1098_v57, %v1054_v20  ;;  %v1106_v23 = vadd.f32 %v1096_v24, %v2738_v47  ;;  %v524_v47 = vmax.f32 %v2445_v10, 0.0  ;;  %v2185_v10 = vld [vmem:[%s3544_s4 + $0x19] ss:$0 sm:$0xff]  ;;  %v2187_v57 = vld [vmem:[%s3544_s4 + $0x18] ss:$0 sm:$0xff] }
 0x244   : > { %1220 = vrot.lane.b32.xlu0 %v1212_v59, %s2223_s15  ;;  %v2190_v59 = vld [vmem:[%s3544_s4 + $0x22] ss:$0 sm:$0xff]  ;;  %v2192_v24 = vld [vmem:[%s3544_s4 + $0x1a] ss:$0 sm:$0xff] }
 0x245   : > { %v1144_v53 = vadd.f32 %v1140_v17, %v1107_v44  ;;  %v530_v56 = vmul.f32 %v1977_v11, %v524_v47  ;;  %v2193_v44 = vld [vmem:[%s3544_s4 + $0x1b] ss:$0 sm:$0xff] }
 0x249   : > { %v1210_v49 = vpop.permute.xlu2 %1209 }
 0x24a   : > { %v1128_v29 = vpop.permute.xlu1 %1127  ;;  %v1215_v9 = vmul.f32 %v1210_v49, %v515_v52  ;;  %v1124_v58 = vpop.permute.xlu0 %1123 }
 0x24b   : > { %v1139_v50 = vmul.f32 %v1128_v29, %v513_v5  ;;  %v1138_v3 = vmul.f32 %v1124_v58, %v512_v14  ;;  %v2866_v58 = vld [vmem:[%s3543_s3 + $0x8] sm:$0x1] }
 0x24c   : > { %1226 = vrot.lane.b32.xlu0 %v1215_v9, %s2223_s15  ;;  %v448_v9 = vmax.f32 %v2486_v45, 0.0 }
 0x24d   : > { %v1143_v20 = vadd.f32 %v1139_v50, %v1106_v23  ;;  %v1142_v6 = vadd.f32 %v1138_v3, %v1105_v36  ;;  %v533_v36 = vmul.f32 %v1977_v11, %v527_v7  ;;  %v2189_v11 = vld [vmem:[%s3544_s4 + $0x1f] ss:$0 sm:$0xff]  ;;  %v2195_v23 = vld [vmem:[%s3544_s4 + $0x1e] ss:$0 sm:$0xff]  ;;  %v446_v50 = vmax.f32 %v2448_v12, 0.0 }
 0x24e   : > { %v458_v3 = vmul.f32 %v2866_v58, %v448_v9  ;;  %v452_v7 = vmax.f32 %v2521_v4, 0.0 }
 0x24f   : > { %v2815_v21 = vadd.f32 %v1176_v27, %v1143_v20  ;;  %v456_v47 = vmul.f32 %v2866_v58, %v446_v50 }
 0x252   : > { %v1161_v15 = vpop.permute.xlu1 %1160  ;;  %v1136_v25 = vpop.permute.xlu0 %1135 }
 0x253   : > { %v1175_v26 = vmul.f32 %v1161_v15, %v530_v56  ;;  %v1141_v38 = vmul.f32 %v1136_v25, %v515_v52 }
 0x254   : > { %1384 = vperm.xlu0 %2113, %v2184_v42  }
 0x255   : > { %v1179_v8 = vadd.f32 %v1175_v26, %v1142_v6  ;;  %v1145_v2 = vadd.f32 %v1141_v38, %v1108_v18 }
 0x25a   : > { %v1173_v19 = vpop.permute.xlu1 %1172  ;;  %v1169_v1 = vpop.permute.xlu0 %1168 }
 0x25b   : > { %v1178_v17 = vmul.f32 %v1173_v19, %v533_v36  ;;  %v1177_v43 = vmul.f32 %v1169_v1, %v532_v33 }
 0x25c   : > { %1254 = vperm.xlu0 %2113, %v2185_v10   ;;  %v462_v10 = vmul.f32 %v2866_v58, %v452_v7 }
 0x25d   : > { %v1182_v54 = vadd.f32 %v1178_v17, %v1145_v2  ;;  %v1181_v27 = vadd.f32 %v1177_v43, %v1144_v53  ;;  %v480_v17 = vmax.f32 %v2450_v13, 0.0 }
 0x262   : > { %v1206_v18 = vpop.permute.xlu1 %1205  ;;  %v1202_v0 = vpop.permute.xlu0 %1201 }
 0x263   : > { %v1214_v55 = vmul.f32 %v1206_v18, %v514_v51  ;;  %v1213_v14 = vmul.f32 %v1202_v0, %v513_v5  ;;  %v2191_v51 = vld [vmem:[%s3544_s4 + $0x23] ss:$0 sm:$0xff] }
 0x264   : > { %1315 = vperm.xlu0 %2113, %v2186_v63  }
 0x265   : > { %1224 = vrot.lane.b32.xlu2 %v1214_v55, %s2223_s15  ;;  %1222 = vrot.lane.b32.xlu1 %v1213_v14, %s2223_s15 }
 0x26c   : > { %1327 = vperm.xlu0 %2113, %v2189_v11  }
 0x26d   : > { %1380 = vperm.xlu2 %2115, %v2188_v41   ;;  %1250 = vperm.xlu1 %2114, %v2187_v57  }
 0x275   : > { %1392 = vperm.xlu2 %2115, %v2191_v51   ;;  %1388 = vperm.xlu1 %2114, %v2190_v59  }
 0x27d   : > { %1262 = vperm.xlu2 %2115, %v2193_v44   ;;  %1258 = vperm.xlu1 %2114, %v2192_v24  }
 0x285   : > { %1323 = vperm.xlu2 %2115, %v2195_v23   ;;  %1319 = vperm.xlu1 %2114, %v2194_v40   ;;  %v486_v23 = vmax.f32 %v2523_v61, 0.0 }
 0x2b6   : > { %v1221_v53 = vpop.permute.xlu0 %1220 }
 0x2b7   : > { %v2857_v60 = vadd.f32 %v1221_v53, %v1179_v8 }
 0x2be   : > { %v1227_v52 = vpop.permute.xlu0 %1226 }
 0x2bf   : > { %v1235_v5 = vadd.f32 %v1227_v52, %v1182_v54  ;;  %v1225_v49 = vpop.permute.xlu2 %1224 }
 0x2c0   : > { %v2859_v29 = vadd.f32 %v1225_v49, %v1181_v27  ;;  %v2884_v27 = vld [vmem:[%s3543_s3 + $0x18] sm:$0x1]  ;;  %v3552_v49 = vld [vmem:[#allocation3_spill] sm:$0xff] }
 0x2c1   : > { %v491_v18 = vmul.f32 %v2884_v27, %v480_v17  ;;  %v484_v9 = vmax.f32 %v3552_v49, 0.0  ;;  %v1455_v49 = vsel %vm1439_vm1, %v2703_v46, 0.0 }
 0x2c6   : > { %v1385_v20 = vpop.permute.xlu0 %1384 }
 0x2c7   : > { %v1397_v6 = vmul.f32 %v1385_v20, %v2726_v22  ;;  %v1398_v42 = vmul.f32 %v1385_v20, %v458_v3  ;;  %v1381_v56 = vpop.permute.xlu2 %1380 }
 0x2c8   : > { %v1395_v15 = vmul.f32 %v1381_v56, %v2730_v34  ;;  %v1396_v26 = vmul.f32 %v1381_v56, %v456_v47 }
 0x2c9   : > { %v1414_v45 = vrot.slane %v1397_v6, 1  ;;  %v1415_v25 = vrot.slane %v1398_v42, 1 }
 0x2ca   : > { %v1411_v12 = vrot.slane %v1395_v15, 1  ;;  %v1412_v38 = vrot.slane %v1396_v26, 1 }
 0x2cb   : > { %v1416_v8 = vsel %vm828_vm0, %v1414_v45, %v1415_v25 }
 0x2cc   : > { %1425 = vrot.lane.b32.xlu2 %v1416_v8, %s2223_s15  ;;  %v1413_v2 = vsel %vm828_vm0, %v1411_v12, %v1412_v38 }
 0x2cd   : > { %1423 = vrot.lane.b32.xlu1 %v1413_v2, %s2223_s15 }
 0x2ce   : > { %v1255_v37 = vpop.permute.xlu0 %1254 }
 0x2cf   : > { %v1393_v36 = vpop.permute.xlu2 %1392  ;;  %v1267_v1 = vmul.f32 %v1255_v37, %v2726_v22  ;;  %v1268_v4 = vmul.f32 %v1255_v37, %v458_v3 }
 0x2d0   : > { %v1401_v19 = vmul.f32 %v1393_v36, %v2744_v62  ;;  %v1402_v33 = vmul.f32 %v1393_v36, %v462_v10 }
 0x2d1   : > { %v1284_v55 = vrot.slane %v1267_v1, 1  ;;  %v1285_v0 = vrot.slane %v1268_v4, 1 }
 0x2d2   : > { %v1420_v43 = vrot.slane %v1401_v19, 1  ;;  %v1421_v54 = vrot.slane %v1402_v33, 1 }
 0x2d3   : > { %v1286_v40 = vsel %vm828_vm0, %v1284_v55, %v1285_v0 }
 0x2d4   : > { %v1422_v63 = vsel %vm828_vm0, %v1420_v43, %v1421_v54 }
 0x2d5   : > { %1429 = vrot.lane.b32.xlu1 %v1422_v63, %s2223_s15 }
 0x2d6   : > { %v1316_v14 = vpop.permute.xlu0 %1315 }
 0x2d7   : > { %v1330_v13 = vmul.f32 %v1316_v14, %v2732_v39  ;;  %v1331_v22 = vmul.f32 %v1316_v14, %v491_v18  ;;  %v1263_v11 = vpop.permute.xlu2 %1262  ;;  %v1223_v41 = vpop.permute.xlu1 %1222 }
 0x2d8   : > { %v1271_v57 = vmul.f32 %v1263_v11, %v2744_v62  ;;  %v1272_v51 = vmul.f32 %v1263_v11, %v462_v10  ;;  %v1233_v59 = vadd.f32 %v1223_v41, %v2815_v21  ;;  %v497_v62 = vmul.f32 %v2884_v27, %v486_v23  ;;  %v3553_v10 = vld [vmem:[#allocation4_spill] sm:$0xff] }
 0x2d9   : > { %v1346_v44 = vrot.slane %v1330_v13, 1  ;;  %v1347_v24 = vrot.slane %v1331_v22, 1  ;;  %v495_v21 = vmul.f32 %v2884_v27, %v484_v9  ;;  %v450_v36 = vmax.f32 %v3553_v10, 0.0 }
 0x2da   : > { %v1290_v53 = vrot.slane %v1271_v57, 1  ;;  %v1291_v52 = vrot.slane %v1272_v51, 1  ;;  %v1298_v50 = vadd.f32 %v1286_v40, %v1233_v59 }
 0x2db   : > { %v1348_v39 = vsel %vm828_vm0, %v1346_v44, %v1347_v24 }
 0x2dc   : > { %v1292_v3 = vsel %vm828_vm0, %v1290_v53, %v1291_v52  ;;  %v1458_v53 = vsel %vm1439_vm1, %v2700_v16, 0.0 }
 0x2dd   : > { %v1300_v20 = vadd.f32 %v1292_v3, %v1235_v5  ;;  %v1488_v3 = vmul.f32 %v2700_v16, %v2700_v16 }
 0x2de   : > { %v1328_v6 = vpop.permute.xlu0 %1327 }
 0x2df   : > { %v1336_v42 = vmul.f32 %v1328_v6, %v2746_v35  ;;  %v1337_v61 = vmul.f32 %v1328_v6, %v497_v62  ;;  %v1324_v56 = vpop.permute.xlu2 %1323  ;;  %v1251_v15 = vpop.permute.xlu1 %1250 }
 0x2e0   : > { %v1334_v26 = vmul.f32 %v1324_v56, %v2751_v28  ;;  %v1335_v45 = vmul.f32 %v1324_v56, %v495_v21  ;;  %v1265_v25 = vmul.f32 %v1251_v15, %v2730_v34  ;;  %v1266_v12 = vmul.f32 %v1251_v15, %v456_v47 }
 0x2e1   : > { %v1355_v38 = vrot.slane %v1336_v42, 1  ;;  %v1356_v7 = vrot.slane %v1337_v61, 1  ;;  %v460_v34 = vmul.f32 %v2866_v58, %v450_v36  ;;  %v1449_v58 = vsel %vm1439_vm1, %v2694_v32, 0.0 }
 0x2e2   : > { %v1352_v8 = vrot.slane %v1334_v26, 1  ;;  %v1353_v2 = vrot.slane %v1335_v45, 1  ;;  %v1281_v37 = vrot.slane %v1265_v25, 1  ;;  %v1282_v5 = vrot.slane %v1266_v12, 1 }
 0x2e3   : > { %v1357_v19 = vsel %vm828_vm0, %v1355_v38, %v1356_v7 }
 0x2e4   : > { %v2904_v35 = vadd.f32 %v1357_v19, %v1300_v20  ;;  %v1354_v33 = vsel %vm828_vm0, %v1352_v8, %v1353_v2  ;;  %v1283_v28 = vsel %vm828_vm0, %v1281_v37, %v1282_v5 }
 0x2e5   : > { %v1297_v17 = vadd.f32 %v1283_v28, %v2857_v60  ;;  %v3554_v60 = vld [vmem:[#allocation2_spill] sm:$0xff] }
 0x2e6   : > { %v482_v11 = vmax.f32 %v3554_v60, 0.0 }
 0x2e7   : > { %v1389_v47 = vpop.permute.xlu1 %1388  ;;  %v1362_v1 = vadd.f32 %v1348_v39, %v1297_v17 }
 0x2e8   : > { %v1399_v4 = vmul.f32 %v1389_v47, %v2748_v31  ;;  %v1400_v43 = vmul.f32 %v1389_v47, %v460_v34  ;;  %v493_v51 = vmul.f32 %v2884_v27, %v482_v11 }
 0x2ea   : > { %v1417_v54 = vrot.slane %v1399_v4, 1  ;;  %v1418_v63 = vrot.slane %v1400_v43, 1 }
 0x2ec   : > { %v1419_v18 = vsel %vm828_vm0, %v1417_v54, %v1418_v63 }
 0x2ed   : > { %1427 = vrot.lane.b32.xlu0 %v1419_v18, %s2223_s15 }
 0x2ef   : > { %v1259_v55 = vpop.permute.xlu1 %1258 }
 0x2f0   : > { %v1269_v0 = vmul.f32 %v1259_v55, %v2748_v31  ;;  %v1270_v14 = vmul.f32 %v1259_v55, %v460_v34 }
 0x2f2   : > { %v1287_v13 = vrot.slane %v1269_v0, 1  ;;  %v1288_v22 = vrot.slane %v1270_v14, 1 }
 0x2f4   : > { %v1289_v41 = vsel %vm828_vm0, %v1287_v13, %v1288_v22 }
 0x2f5   : > { %1450 = vadd.xlane.f32.xlu2 %v1449_v58  ;;  %v1299_v57 = vadd.f32 %v1289_v41, %v2859_v29  ;;  %v1485_v29 = vmul.f32 %v2694_v32, %v2694_v32  ;;  %v1452_v32 = vsel %vm1439_vm1, %v2708_v30, 0.0 }
 0x2f7   : > { %v1320_v59 = vpop.permute.xlu1 %1319  ;;  %v1364_v44 = vadd.f32 %v1354_v33, %v1299_v57  ;;  %v1489_v27 = vsel %vm1439_vm1, %v1485_v29, 0.0 }
 0x2f8   : > { %v1332_v24 = vmul.f32 %v1320_v59, %v2728_v48  ;;  %v1333_v31 = vmul.f32 %v1320_v59, %v493_v51  ;;  %v1487_v48 = vmul.f32 %v2703_v46, %v2703_v46  ;;  %v1486_v46 = vmul.f32 %v2708_v30, %v2708_v30 }
 0x2fa   : > { %v1349_v23 = vrot.slane %v1332_v24, 1  ;;  %v1350_v40 = vrot.slane %v1333_v31, 1  ;;  %v1495_v39 = vsel %vm1439_vm1, %v1487_v48, 0.0  ;;  %v1492_v62 = vsel %vm1439_vm1, %v1486_v46, 0.0 }
 0x2fc   : > { %v1351_v52 = vsel %vm828_vm0, %v1349_v23, %v1350_v40 }
 0x2fd   : > { %1459 = vadd.xlane.f32.xlu2 %v1458_v53  ;;  %v1363_v9 = vadd.f32 %v1351_v52, %v1298_v50  ;;  %v1498_v50 = vsel %vm1439_vm1, %v1488_v3, 0.0 }
 0x2ff   : > { %1456 = vadd.xlane.f32.xlu1 %v1455_v49 }
 0x305   : > { %1490 = vadd.xlane.f32.xlu2 %v1489_v27 }
 0x307   : > { %1496 = vadd.xlane.f32.xlu1 %v1495_v39 }
 0x30d   : > { %1499 = vadd.xlane.f32.xlu2 %v1498_v50 }
 0x317   : > { %1453 = vadd.xlane.f32.xlu0 %v1452_v32 }
 0x31f   : > { %1493 = vadd.xlane.f32.xlu0 %v1492_v62 }
 0x326   : > { %v1426_v20 = vpop.permute.xlu2 %1425 }
 0x327   : > { %v1436_v6 = vadd.f32 %v1426_v20, %v1363_v9 }
 0x329   : > { %2043 = vst.msk [vmem:[%s2691_s14 + $0x28] sm:$0xff] %vm1439_vm1, %v1436_v6  ;;  %v1528_v16 = vsel %vm1439_vm1, %v1436_v6, 0.0  ;;  %v1562_v5 = vmul.f32 %v1436_v6, %v1436_v6 }
 0x32a   : > { %1529 = vadd.xlane.f32.xlu1 %v1528_v16 }
 0x33f   : > { %v1424_v21 = vpop.permute.xlu1 %1423 }
 0x340   : > { %v1435_v42 = vadd.f32 %v1424_v21, %v1362_v1 }
 0x342   : > { %2042 = vst.msk [vmem:[%s2691_s14 + $0x20] sm:$0xff] %vm1439_vm1, %v1435_v42  ;;  %v1525_v61 = vsel %vm1439_vm1, %v1435_v42, 0.0  ;;  %v1561_v56 = vmul.f32 %v1435_v42, %v1435_v42 }
 0x343   : > { %1526 = vadd.xlane.f32.xlu0 %v1525_v61 }
 0x344   : > { %v1565_v30 = vsel %vm1439_vm1, %v1561_v56, 0.0 }
 0x345   : > { %1566 = vadd.xlane.f32.xlu1 %v1565_v30 }
 0x347   : > { %v1430_v15 = vpop.permute.xlu1 %1429 }
 0x348   : > { %v1438_v26 = vadd.f32 %v1430_v15, %v2904_v35  ;;  %v1568_v35 = vsel %vm1439_vm1, %v1562_v5, 0.0 }
 0x34a   : > { %2045 = vst.msk [vmem:[%s2691_s14 + $0x38] sm:$0xff] %vm1439_vm1, %v1438_v26  ;;  %v1534_v45 = vsel %vm1439_vm1, %v1438_v26, 0.0  ;;  %v1564_v25 = vmul.f32 %v1438_v26, %v1438_v26 }
 0x34b   : > { %1535 = vadd.xlane.f32.xlu0 %v1534_v45 }
 0x34c   : > { %v1574_v12 = vsel %vm1439_vm1, %v1564_v25, 0.0 }
 0x34d   : > { %1575 = vadd.xlane.f32.xlu1 %v1574_v12 }
 0x35f   : > { %v1428_v38 = vpop.permute.xlu0 %1427 }
 0x360   : > { %v1437_v7 = vadd.f32 %v1428_v38, %v1364_v44 }
 0x362   : > { %2044 = vst.msk [vmem:[%s2691_s14 + $0x30] sm:$0xff] %vm1439_vm1, %v1437_v7  ;;  %v1531_v8 = vsel %vm1439_vm1, %v1437_v7, 0.0  ;;  %v1563_v2 = vmul.f32 %v1437_v7, %v1437_v7 }
 0x363   : > { %1532 = vadd.xlane.f32.xlu2 %v1531_v8 }
 0x364   : > { %v1571_v37 = vsel %vm1439_vm1, %v1563_v2, 0.0 }
 0x365   : > { %1572 = vadd.xlane.f32.xlu0 %v1571_v37 }
 0x368   : > { %v1451_v10 = vpop.xlane.xlu2 %1450 }
 0x369   : > { %v1461_v36 = vrot.slane %v1451_v10, 4 }
 0x36b   : > { %v1462_v19 = vadd.f32 %v1461_v36, %v1451_v10  ;;  %1569 = vadd.xlane.f32.xlu2 %v1568_v35 }
 0x36d   : > { %v1463_v33 = vrot.slane %v1462_v19, 2 }
 0x36f   : > { %v1464_v28 = vadd.f32 %v1463_v33, %v1462_v19 }
 0x370   : > { %v1460_v17 = vpop.xlane.xlu2 %1459 }
 0x371   : > { %v1465_v34 = vrot.slane %v1464_v28, 1  ;;  %v1479_v47 = vrot.slane %v1460_v17, 4 }
 0x372   : > { %v1457_v1 = vpop.xlane.xlu1 %1456 }
 0x373   : > { %v2957_v4 = vadd.f32 %v1465_v34, %v1464_v28  ;;  %v1480_v43 = vadd.f32 %v1479_v47, %v1460_v17  ;;  %v1473_v54 = vrot.slane %v1457_v1, 4 }
 0x375   : > { %v1481_v63 = vrot.slane %v1480_v43, 2  ;;  %v1474_v18 = vadd.f32 %v1473_v54, %v1457_v1 }
 0x377   : > { %v1482_v55 = vadd.f32 %v1481_v63, %v1480_v43  ;;  %v1475_v0 = vrot.slane %v1474_v18, 2 }
 0x378   : > { %v1491_v14 = vpop.xlane.xlu2 %1490 }
 0x379   : > { %v1483_v13 = vrot.slane %v1482_v55, 1  ;;  %v1476_v22 = vadd.f32 %v1475_v0, %v1474_v18  ;;  %v1501_v60 = vrot.slane %v1491_v14, 4 }
 0x37a   : > { %v1497_v11 = vpop.xlane.xlu1 %1496 }
 0x37b   : > { %v2959_v58 = vadd.f32 %v1483_v13, %v1482_v55  ;;  %v1477_v41 = vrot.slane %v1476_v22, 1  ;;  %v1502_v57 = vadd.f32 %v1501_v60, %v1491_v14  ;;  %v1513_v51 = vrot.slane %v1497_v11, 4 }
 0x37d   : > { %v2961_v59 = vadd.f32 %v1477_v41, %v1476_v22  ;;  %v1503_v44 = vrot.slane %v1502_v57, 2  ;;  %v1514_v24 = vadd.f32 %v1513_v51, %v1497_v11 }
 0x37f   : > { %v1504_v31 = vadd.f32 %v1503_v44, %v1502_v57  ;;  %v1515_v23 = vrot.slane %v1514_v24, 2 }
 0x380   : > { %v1500_v40 = vpop.xlane.xlu2 %1499 }
 0x381   : > { %v1505_v53 = vrot.slane %v1504_v31, 1  ;;  %v1516_v52 = vadd.f32 %v1515_v23, %v1514_v24  ;;  %v1519_v49 = vrot.slane %v1500_v40, 4 }
 0x383   : > { %v2963_v9 = vadd.f32 %v1505_v53, %v1504_v31  ;;  %v1517_v29 = vrot.slane %v1516_v52, 1  ;;  %v1520_v48 = vadd.f32 %v1519_v49, %v1500_v40 }
 0x385   : > { %v2965_v27 = vadd.f32 %v1517_v29, %v1516_v52  ;;  %v1521_v39 = vrot.slane %v1520_v48, 2 }
 0x387   : > { %v1522_v3 = vadd.f32 %v1521_v39, %v1520_v48 }
 0x389   : > { %v1523_v50 = vrot.slane %v1522_v3, 1 }
 0x38a   : > { %v1454_v46 = vpop.xlane.xlu0 %1453 }
 0x38b   : > { %v2967_v32 = vadd.f32 %v1523_v50, %v1522_v3  ;;  %v1467_v62 = vrot.slane %v1454_v46, 4 }
 0x38d   : > { %v1468_v20 = vadd.f32 %v1467_v62, %v1454_v46 }
 0x38f   : > { %v1469_v6 = vrot.slane %v1468_v20, 2 }
 0x391   : > { %v1470_v16 = vadd.f32 %v1469_v6, %v1468_v20 }
 0x392   : > { %v1494_v21 = vpop.xlane.xlu0 %1493 }
 0x393   : > { %v1471_v42 = vrot.slane %v1470_v16, 1  ;;  %v1507_v61 = vrot.slane %v1494_v21, 4 }
 0x395   : > { %v2969_v56 = vadd.f32 %v1471_v42, %v1470_v16  ;;  %v1508_v30 = vadd.f32 %v1507_v61, %v1494_v21 }
 0x397   : > { %v1509_v15 = vrot.slane %v1508_v30, 2 }
 0x399   : > { %v1510_v26 = vadd.f32 %v1509_v15, %v1508_v30 }
 0x39b   : > { %v1511_v45 = vrot.slane %v1510_v26, 1 }
 0x39d   : > { %v1530_v25 = vpop.xlane.xlu1 %1529  ;;  %v2971_v12 = vadd.f32 %v1511_v45, %v1510_v26 }
 0x39e   : > { %v1543_v38 = vrot.slane %v1530_v25, 4 }
 0x3a0   : > { %v1544_v7 = vadd.f32 %v1543_v38, %v1530_v25 }
 0x3a2   : > { %v1545_v8 = vrot.slane %v1544_v7, 2 }
 0x3a4   : > { %v1546_v2 = vadd.f32 %v1545_v8, %v1544_v7 }
 0x3a6   : > { %v1547_v37 = vrot.slane %v1546_v2, 1 }
 0x3a8   : > { %v2973_v5 = vadd.f32 %v1547_v37, %v1546_v2 }
 0x3b6   : > { %v1527_v10 = vpop.xlane.xlu0 %1526 }
 0x3b7   : > { %v1537_v36 = vrot.slane %v1527_v10, 4 }
 0x3b8   : > { %v1567_v19 = vpop.xlane.xlu1 %1566 }
 0x3b9   : > { %v1538_v35 = vadd.f32 %v1537_v36, %v1527_v10  ;;  %v1577_v33 = vrot.slane %v1567_v19, 4 }
 0x3bb   : > { %v1539_v28 = vrot.slane %v1538_v35, 2  ;;  %v1578_v17 = vadd.f32 %v1577_v33, %v1567_v19 }
 0x3bd   : > { %v1540_v34 = vadd.f32 %v1539_v28, %v1538_v35  ;;  %v1579_v47 = vrot.slane %v1578_v17, 2 }
 0x3be   : > { %v1536_v1 = vpop.xlane.xlu0 %1535 }
 0x3bf   : > { %v1541_v43 = vrot.slane %v1540_v34, 1  ;;  %v1580_v54 = vadd.f32 %v1579_v47, %v1578_v17  ;;  %v1555_v63 = vrot.slane %v1536_v1, 4 }
 0x3c0   : > { %v1576_v18 = vpop.xlane.xlu1 %1575 }
 0x3c1   : > { %v2975_v55 = vadd.f32 %v1541_v43, %v1540_v34  ;;  %v1581_v0 = vrot.slane %v1580_v54, 1  ;;  %v1556_v14 = vadd.f32 %v1555_v63, %v1536_v1  ;;  %v1595_v13 = vrot.slane %v1576_v18, 4 }
 0x3c3   : > { %v2977_v22 = vadd.f32 %v1581_v0, %v1580_v54  ;;  %v1557_v60 = vrot.slane %v1556_v14, 2  ;;  %v1596_v11 = vadd.f32 %v1595_v13, %v1576_v18 }
 0x3c5   : > { %v1558_v41 = vadd.f32 %v1557_v60, %v1556_v14  ;;  %v1597_v57 = vrot.slane %v1596_v11, 2 }
 0x3c7   : > { %v1559_v51 = vrot.slane %v1558_v41, 1  ;;  %v1598_v44 = vadd.f32 %v1597_v57, %v1596_v11 }
 0x3c9   : > { %v2979_v24 = vadd.f32 %v1559_v51, %v1558_v41  ;;  %v1599_v31 = vrot.slane %v1598_v44, 1 }
 0x3cb   : > { %v2981_v23 = vadd.f32 %v1599_v31, %v1598_v44 }
 0x3d6   : > { %v1533_v40 = vpop.xlane.xlu2 %1532 }
 0x3d7   : > { %v1549_v53 = vrot.slane %v1533_v40, 4 }
 0x3d8   : > { %v1573_v52 = vpop.xlane.xlu0 %1572 }
 0x3d9   : > { %v1550_v49 = vadd.f32 %v1549_v53, %v1533_v40  ;;  %v1589_v29 = vrot.slane %v1573_v52, 4 }
 0x3db   : > { %v1551_v48 = vrot.slane %v1550_v49, 2  ;;  %v1590_v39 = vadd.f32 %v1589_v29, %v1573_v52 }
 0x3dd   : > { %v1552_v3 = vadd.f32 %v1551_v48, %v1550_v49  ;;  %v1591_v50 = vrot.slane %v1590_v39, 2 }
 0x3de   : > { %v1570_v46 = vpop.xlane.xlu2 %1569 }
 0x3df   : > { %v1553_v62 = vrot.slane %v1552_v3, 1  ;;  %v1592_v20 = vadd.f32 %v1591_v50, %v1590_v39  ;;  %v1583_v6 = vrot.slane %v1570_v46, 4 }
 0x3e1   : > { %v1554_v16 = vadd.f32 %v1553_v62, %v1552_v3  ;;  %v1593_v21 = vrot.slane %v1592_v20, 1  ;;  %v1584_v42 = vadd.f32 %v1583_v6, %v1570_v46 }
 0x3e3   : > { %v2983_v61 = vadd.f32 %v1593_v21, %v1592_v20  ;;  %v1585_v30 = vrot.slane %v1584_v42, 2 }
 0x3e5   : > { %v1586_v15 = vadd.f32 %v1585_v30, %v1584_v42  ;;  %1604 = sbr.rel (%p2046_p4) target bundleno = 1019 (0x3fb), region = 52 }
 0x3e7   : > { %v1587_v26 = vrot.slane %v1586_v15, 1 }
 0x3e9   : > { %v1588_v45 = vadd.f32 %v1587_v26, %v1586_v15 }
 0x3ea   : > { %vm1605_vm2 = vcmask 0   ;;  %v2224_v25 = vmov 0.0  }
 0x3eb   : > { %1606 = vst.msk [vmem:[%s3548_s8] sm:$0x1] %vm1605_vm2, %v2224_v25 }
 0x3ec   : > { %1607 = vst.msk [vmem:[%s3548_s8 + $0x1] sm:$0x1] %vm1605_vm2, %v2224_v25 }
 0x3ed   : > { %1608 = vst.msk [vmem:[%s3548_s8 + $0x2] sm:$0x1] %vm1605_vm2, %v2224_v25 }
 0x3ee   : > { %1609 = vst.msk [vmem:[%s3548_s8 + $0x3] sm:$0x1] %vm1605_vm2, %v2224_v25 }
 0x3ef   : > { %1610 = vst.msk [vmem:[%s3548_s8 + $0x4] sm:$0x1] %vm1605_vm2, %v2224_v25 }
 0x3f0   : > { %1611 = vst.msk [vmem:[%s3548_s8 + $0x5] sm:$0x1] %vm1605_vm2, %v2224_v25 }
 0x3f1   : > { %1612 = vst.msk [vmem:[%s3548_s8 + $0x6] sm:$0x1] %vm1605_vm2, %v2224_v25 }
 0x3f2   : > { %1613 = vst.msk [vmem:[%s3548_s8 + $0x7] sm:$0x1] %vm1605_vm2, %v2224_v25 }
 0x3f3   : > { %1614 = vst.msk [vmem:[%s3548_s8 + $0x8] sm:$0x1] %vm1605_vm2, %v2224_v25 }
 0x3f4   : > { %1615 = vst.msk [vmem:[%s3548_s8 + $0x9] sm:$0x1] %vm1605_vm2, %v2224_v25 }
 0x3f5   : > { %1616 = vst.msk [vmem:[%s3548_s8 + $0xa] sm:$0x1] %vm1605_vm2, %v2224_v25 }
 0x3f6   : > { %1617 = vst.msk [vmem:[%s3548_s8 + $0xb] sm:$0x1] %vm1605_vm2, %v2224_v25 }
 0x3f7   : > { %1618 = vst.msk [vmem:[%s3548_s8 + $0xc] sm:$0x1] %vm1605_vm2, %v2224_v25 }
 0x3f8   : > { %1619 = vst.msk [vmem:[%s3548_s8 + $0xd] sm:$0x1] %vm1605_vm2, %v2224_v25 }
 0x3f9   : > { %1620 = vst.msk [vmem:[%s3548_s8 + $0xe] sm:$0x1] %vm1605_vm2, %v2224_v25 }
 0x3fa   : > { %1621 = vst.msk [vmem:[%s3548_s8 + $0xf] sm:$0x1] %vm1605_vm2, %v2224_v25 }
 0x3fb PF: > { %v1622_v38 = vld [vmem:[%s3548_s8] sm:$0x1]  ;;  %vm1630_vm3 = vcmask 0   ;;  %v1623_v7 = vld [vmem:[%s3548_s8 + $0x1] sm:$0x1]  ;;  %p2071_p5 = scmp.ne.s32.totalorder %s2277_s28, 1 }
 0x3fc   : > { %v1626_v8 = vadd.f32 %v1622_v38, %v2957_v4  ;;  %v1627_v2 = vadd.f32 %v1623_v7, %v2969_v56  ;;  %v1624_v37 = vld [vmem:[%s3548_s8 + $0x2] sm:$0x1]  ;;  %v1625_v10 = vld [vmem:[%s3548_s8 + $0x3] sm:$0x1]  ;;  %v2047_v36 = vld [vmem:[%s3548_s8 + $0x4] sm:$0x1] }
 0x3fd   : > { %v1628_v19 = vadd.f32 %v1624_v37, %v2961_v59  ;;  %v1629_v35 = vadd.f32 %v1625_v10, %v2959_v58  ;;  %v2048_v4 = vld [vmem:[%s3548_s8 + $0x5] sm:$0x1]  ;;  %v2049_v56 = vld [vmem:[%s3548_s8 + $0x6] sm:$0x1]  ;;  %v1640_v33 = vadd.f32 %v2047_v36, %v2975_v55  ;;  %v2050_v59 = vld [vmem:[%s3548_s8 + $0x7] sm:$0x1] }
 0x3fe   : > { %1631 = vst.msk [vmem:[%s3548_s8] sm:$0x1] %vm1630_vm3, %v1626_v8  ;;  %v1641_v58 = vadd.f32 %v2048_v4, %v2973_v5  ;;  %v2055_v28 = vld [vmem:[%s3548_s8 + $0x8] sm:$0x1]  ;;  %v1642_v17 = vadd.f32 %v2049_v56, %v1554_v16  ;;  %v2056_v34 = vld [vmem:[%s3548_s8 + $0x9] sm:$0x1]  ;;  %v1643_v5 = vadd.f32 %v2050_v59, %v2979_v24 }
 0x3ff   : > { %1632 = vst.msk [vmem:[%s3548_s8 + $0x1] sm:$0x1] %vm1630_vm3, %v1627_v2  ;;  %v2057_v47 = vld [vmem:[%s3548_s8 + $0xa] sm:$0x1]  ;;  %v1653_v1 = vadd.f32 %v2055_v28, %v2963_v9  ;;  %v2058_v43 = vld [vmem:[%s3548_s8 + $0xb] sm:$0x1]  ;;  %v1654_v54 = vadd.f32 %v2056_v34, %v2971_v12 }
 0x400   : > { %1633 = vst.msk [vmem:[%s3548_s8 + $0x2] sm:$0x1] %vm1630_vm3, %v1628_v19  ;;  %v2063_v63 = vld [vmem:[%s3548_s8 + $0xc] sm:$0x1]  ;;  %v1655_v9 = vadd.f32 %v2057_v47, %v2965_v27  ;;  %v2064_v18 = vld [vmem:[%s3548_s8 + $0xd] sm:$0x1]  ;;  %v1656_v12 = vadd.f32 %v2058_v43, %v2967_v32 }
 0x401   : > { %1634 = vst.msk [vmem:[%s3548_s8 + $0x3] sm:$0x1] %vm1630_vm3, %v1629_v35  ;;  %v2065_v55 = vld [vmem:[%s3548_s8 + $0xe] sm:$0x1]  ;;  %v1666_v27 = vadd.f32 %v2063_v63, %v2977_v22  ;;  %v2066_v0 = vld [vmem:[%s3548_s8 + $0xf] sm:$0x1]  ;;  %v1667_v32 = vadd.f32 %v2064_v18, %v1588_v45 }
 0x402   : > { %2051 = vst.msk [vmem:[%s3548_s8 + $0x4] sm:$0x1] %vm1630_vm3, %v1640_v33  ;;  %v1668_v14 = vadd.f32 %v2065_v55, %v2983_v61  ;;  %v1669_v13 = vadd.f32 %v2066_v0, %v2981_v23 }
 0x403   : > { %2052 = vst.msk [vmem:[%s3548_s8 + $0x5] sm:$0x1] %vm1630_vm3, %v1641_v58 }
 0x404   : > { %2053 = vst.msk [vmem:[%s3548_s8 + $0x6] sm:$0x1] %vm1630_vm3, %v1642_v17 }
 0x405   : > { %2054 = vst.msk [vmem:[%s3548_s8 + $0x7] sm:$0x1] %vm1630_vm3, %v1643_v5 }
 0x406   : > { %2059 = vst.msk [vmem:[%s3548_s8 + $0x8] sm:$0x1] %vm1630_vm3, %v1653_v1 }
 0x407   : > { %2060 = vst.msk [vmem:[%s3548_s8 + $0x9] sm:$0x1] %vm1630_vm3, %v1654_v54 }
 0x408   : > { %2061 = vst.msk [vmem:[%s3548_s8 + $0xa] sm:$0x1] %vm1630_vm3, %v1655_v9 }
 0x409   : > { %2062 = vst.msk [vmem:[%s3548_s8 + $0xb] sm:$0x1] %vm1630_vm3, %v1656_v12  ;;  %1677 = sbr.rel (%p2071_p5) target bundleno = 1107 (0x453), region = 56 }
 0x40a   : > { %2067 = vst.msk [vmem:[%s3548_s8 + $0xc] sm:$0x1] %vm1630_vm3, %v1666_v27 }
 0x40b   : > { %2068 = vst.msk [vmem:[%s3548_s8 + $0xd] sm:$0x1] %vm1630_vm3, %v1667_v32 }
 0x40c   : > { %2069 = vst.msk [vmem:[%s3548_s8 + $0xe] sm:$0x1] %vm1630_vm3, %v1668_v14 }
 0x40d   : > { %2070 = vst.msk [vmem:[%s3548_s8 + $0xf] sm:$0x1] %vm1630_vm3, %v1669_v13 }
 0x40e   : > { %v2225_v22 = vmov 128.0   ;;  %v1678_v51 = vld [vmem:[%s3548_s8] sm:$0x1]  ;;  %v2072_v44 = vld [vmem:[%s3548_s8 + $0x8] sm:$0x1] }
 0x40f   : > { %2196 = vrcp.f32 %v2225_v22  ;;  %v1679_v31 = vld [vmem:[%s3548_s8 + $0x1] sm:$0x1]  ;;  %v2073_v23 = vld [vmem:[%s3548_s8 + $0x9] sm:$0x1]  ;;  %v1680_v40 = vld [vmem:[%s3548_s8 + $0x2] sm:$0x1] }
 0x410   : > { %v2074_v53 = vld [vmem:[%s3548_s8 + $0xa] sm:$0x1]  ;;  %v1681_v52 = vld [vmem:[%s3548_s8 + $0x3] sm:$0x1]  ;;  %v2075_v49 = vld [vmem:[%s3548_s8 + $0xb] sm:$0x1] }
 0x411   : > { %v1682_v48 = vld [vmem:[%s3548_s8 + $0x4] sm:$0x1]  ;;  %v2076_v39 = vld [vmem:[%s3548_s8 + $0xc] sm:$0x1]  ;;  %v1683_v20 = vld [vmem:[%s3548_s8 + $0x5] sm:$0x1] }
 0x412   : > { %v2077_v6 = vld [vmem:[%s3548_s8 + $0xd] sm:$0x1]  ;;  %v1684_v30 = vld [vmem:[%s3548_s8 + $0x6] sm:$0x1]  ;;  %v1685_v4 = vld [vmem:[%s3548_s8 + $0x7] sm:$0x1] }
 0x413   : > { %v2078_v38 = vld [vmem:[%s3548_s8 + $0xe] sm:$0x1] }
 0x414   : > { %v2079_v63 = vld [vmem:[%s3548_s8 + $0xf] sm:$0x1] }
 0x415   : > { %v2197_v60 = vpop.eup %2196 }
 0x416   : > { %v1687_v11 = vmul.f32 128.0, %v2197_v60  ;;  %vm1691_vm4 = vweird.f32 %v2197_v60 }
 0x418   : > { %v1688_v41 = vsub.f32 1.0, %v1687_v11 }
 0x41a   : > { %v1689_v57 = vmul.f32 %v2197_v60, %v1688_v41 }
 0x41c   : > { %v1690_v24 = vadd.f32 %v2197_v60, %v1689_v57 }
 0x41e   : > { %v1692_v29 = vsel %vm1691_vm4, %v2197_v60, %v1690_v24 }
 0x41f   : > { %v3207_v3 = vmul.f32 %v1692_v29, %v1678_v51  ;;  %v1709_v50 = vmul.f32 %v2072_v44, %v1692_v29  ;;  %v3209_v46 = vmul.f32 %v1692_v29, %v1679_v31  ;;  %v1710_v62 = vmul.f32 %v2073_v23, %v1692_v29 }
 0x420   : > { %v3217_v16 = vmul.f32 %v1692_v29, %v1680_v40  ;;  %v1711_v21 = vmul.f32 %v2074_v53, %v1692_v29  ;;  %v3219_v42 = vmul.f32 %v1692_v29, %v1681_v52  ;;  %v1712_v61 = vmul.f32 %v2075_v49, %v1692_v29 }
 0x421   : > { %v1717_v15 = vmul.f32 %v3207_v3, %v3207_v3  ;;  %v1718_v26 = vmul.f32 %v3209_v46, %v3209_v46  ;;  %v3228_v45 = vmul.f32 %v1692_v29, %v1682_v48  ;;  %v1713_v25 = vmul.f32 %v2076_v39, %v1692_v29 }
 0x422   : > { %v1719_v7 = vmul.f32 %v3217_v16, %v3217_v16  ;;  %v1720_v8 = vmul.f32 %v3219_v42, %v3219_v42  ;;  %v3237_v2 = vmul.f32 %v1692_v29, %v1683_v20  ;;  %v1714_v37 = vmul.f32 %v2077_v6, %v1692_v29 }
 0x423   : > { %v1725_v10 = vsub.f32 %v1709_v50, %v1717_v15  ;;  %v1726_v36 = vsub.f32 %v1710_v62, %v1718_v26  ;;  %v1721_v19 = vmul.f32 %v3228_v45, %v3228_v45  ;;  %v3241_v35 = vmul.f32 %v1692_v29, %v1684_v30 }
 0x424   : > { %v1727_v56 = vsub.f32 %v1711_v21, %v1719_v7  ;;  %v1728_v33 = vsub.f32 %v1712_v61, %v1720_v8  ;;  %v1722_v59 = vmul.f32 %v3237_v2, %v3237_v2  ;;  %v1715_v58 = vmul.f32 %v2078_v38, %v1692_v29 }
 0x425   : > { %v1733_v28 = vmax.f32 %v1725_v10, 0.0  ;;  %v1734_v17 = vmax.f32 %v1726_v36, 0.0  ;;  %v1729_v34 = vsub.f32 %v1713_v25, %v1721_v19  ;;  %v1723_v5 = vmul.f32 %v3241_v35, %v3241_v35 }
 0x426   : > { %v1735_v47 = vmax.f32 %v1727_v56, 0.0  ;;  %v1736_v1 = vmax.f32 %v1728_v33, 0.0  ;;  %v1730_v43 = vsub.f32 %v1714_v37, %v1722_v59  ;;  %v3250_v54 = vmul.f32 %v1692_v29, %v1685_v4  ;;  %v1741_v4 = vld [vmem:[%s3546_s6] sm:$0x1] }
 0x427   : > { %v1749_v9 = vadd.f32 1e-05, %v1733_v28  ;;  %v3255_v18 = vadd.f32 1e-05, %v1734_v17  ;;  %v1737_v12 = vmax.f32 %v1729_v34, 0.0  ;;  %v1731_v55 = vsub.f32 %v1715_v58, %v1723_v5 }
 0x428   : > { %v3257_v27 = vadd.f32 1e-05, %v1735_v47  ;;  %v3259_v0 = vadd.f32 1e-05, %v1736_v1  ;;  %v1738_v32 = vmax.f32 %v1730_v43, 0.0  ;;  %v1716_v13 = vmul.f32 %v2079_v63, %v1692_v29 }
 0x429   : > { %2198 = vrsqrt.f32 %v1749_v9  ;;  %v3261_v14 = vadd.f32 1e-05, %v1737_v12  ;;  %v1739_v60 = vmax.f32 %v1731_v55, 0.0  ;;  %v1724_v11 = vmul.f32 %v3250_v54, %v3250_v54  ;;  %v1742_v17 = vld [vmem:[%s3546_s6 + $0x1] sm:$0x1] }
 0x42a   : > { %2200 = vrsqrt.f32 %v3255_v18  ;;  %v3264_v22 = vadd.f32 1e-05, %v1738_v32  ;;  %vm1763_vm5 = vweird.f32 %v1749_v9  ;;  %vm1773_vm6 = vweird.f32 %v3255_v18 }
 0x42b   : > { %2202 = vrsqrt.f32 %v3257_v27  ;;  %v3271_v41 = vadd.f32 1e-05, %v1739_v60  ;;  %v1732_v57 = vsub.f32 %v1716_v13, %v1724_v11  ;;  %vm1783_vm7 = vweird.f32 %v3257_v27  ;;  %v1744_v60 = vld [vmem:[%s3546_s6 + $0x3] sm:$0x1] }
 0x42c   : > { %2204 = vrsqrt.f32 %v3259_v0  ;;  %vm1793_vm8 = vweird.f32 %v3259_v0  ;;  %vm1803_vm9 = vweird.f32 %v3261_v14  ;;  %vm1813_vm10 = vweird.f32 %v3264_v22 }
 0x42d   : > { %2206 = vrsqrt.f32 %v3261_v14  ;;  %v1740_v44 = vmax.f32 %v1732_v57, 0.0  ;;  %vm1823_vm13 = vweird.f32 %v3271_v41 }
 0x42e   : > { %2208 = vrsqrt.f32 %v3264_v22 }
 0x42f   : > { %v3274_v51 = vpop.eup %2198  ;;  %2210 = vrsqrt.f32 %v3271_v41  ;;  %v3289_v53 = vadd.f32 1e-05, %v1740_v44 }
 0x430   : > { %v3277_v24 = vpop.eup %2200  ;;  %v1758_v31 = vmul.f32 %v3274_v51, %v1749_v9  ;;  %vm1764_vm11 = vweird.f32 %v3274_v51  ;;  %v1743_v9 = vld [vmem:[%s3546_s6 + $0x2] sm:$0x1] }
 0x431   : > { %v3283_v23 = vpop.eup %2202  ;;  %v1768_v40 = vmul.f32 %v3277_v24, %v3255_v18  ;;  %vm1774_vm12 = vweird.f32 %v3277_v24  ;;  %2212 = vrsqrt.f32 %v3289_v53  ;;  %vm3324_vm1 = vmor %vm1763_vm5, %vm1764_vm11  ;;  %vm1833_vm11 = vweird.f32 %v3289_v53 }
 0x432   : > { %v3291_v52 = vpop.eup %2204  ;;  %v1759_v49 = vmul.f32 %v3274_v51, %v1758_v31  ;;  %v1778_v29 = vmul.f32 %v3283_v23, %v3257_v27  ;;  %vm1784_vm14 = vweird.f32 %v3283_v23  ;;  %vm3338_vm4 = vmor %vm1773_vm6, %vm1774_vm12  ;;  %v1745_v31 = vld [vmem:[%s3546_s6 + $0x4] sm:$0x1] }
 0x433   : > { %v3299_v48 = vpop.eup %2206  ;;  %v1769_v39 = vmul.f32 %v3277_v24, %v1768_v40  ;;  %v1788_v50 = vmul.f32 %v3291_v52, %v3259_v0  ;;  %vm1794_vm15 = vweird.f32 %v3291_v52  ;;  %vm3351_vm5 = vmor %vm1783_vm7, %vm1784_vm14 }
 0x434   : > { %v3306_v62 = vpop.eup %2208  ;;  %v1760_v20 = vmul.f32 0.5, %v1759_v49  ;;  %v1779_v6 = vmul.f32 %v3283_v23, %v1778_v29  ;;  %v1798_v21 = vmul.f32 %v3299_v48, %v3261_v14  ;;  %vm1804_vm0 = vweird.f32 %v3299_v48  ;;  %vm3369_vm7 = vmor %vm1793_vm8, %vm1794_vm15 }
 0x435   : > { %v3312_v61 = vpop.eup %2210  ;;  %v1770_v30 = vmul.f32 0.5, %v1769_v39  ;;  %v1789_v15 = vmul.f32 %v3291_v52, %v1788_v50  ;;  %v1808_v26 = vmul.f32 %v3306_v62, %v3264_v22  ;;  %vm1814_vm2 = vweird.f32 %v3306_v62  ;;  %vm3384_vm8 = vmor %vm1803_vm9, %vm1804_vm0  ;;  %v1746_v50 = vld [vmem:[%s3546_s6 + $0x5] sm:$0x1] }
 0x436   : > { %v1761_v25 = vsub.f32 1.5, %v1760_v20  ;;  %v1780_v38 = vmul.f32 0.5, %v1779_v6  ;;  %v1799_v7 = vmul.f32 %v3299_v48, %v1798_v21  ;;  %v1818_v8 = vmul.f32 %v3312_v61, %v3271_v41  ;;  %vm3402_vm9 = vmor %vm1813_vm10, %vm1814_vm2 }
 0x437   : > { %v1771_v10 = vsub.f32 1.5, %v1770_v30  ;;  %v1790_v36 = vmul.f32 0.5, %v1789_v15  ;;  %v1809_v19 = vmul.f32 %v3306_v62, %v1808_v26  ;;  %vm1824_vm6 = vweird.f32 %v3312_v61  ;;  %v3356_v43 = vpop.eup %2212  ;;  %v1747_v30 = vld [vmem:[%s3546_s6 + $0x6] sm:$0x1] }
 0x438   : > { %v1762_v56 = vmul.f32 %v3274_v51, %v1761_v25  ;;  %v1781_v59 = vsub.f32 1.5, %v1780_v38  ;;  %v1800_v58 = vmul.f32 0.5, %v1799_v7  ;;  %v1819_v28 = vmul.f32 %v3312_v61, %v1818_v8  ;;  %vm3425_vm10 = vmor %vm1823_vm13, %vm1824_vm6  ;;  %v2083_v25 = vld [vmem:[%s3546_s6 + $0xb] sm:$0x1] }
 0x439   : > { %v1772_v34 = vmul.f32 %v3277_v24, %v1771_v10  ;;  %v1791_v47 = vsub.f32 1.5, %v1790_v36  ;;  %v1810_v1 = vmul.f32 0.5, %v1809_v19  ;;  %v2085_v36 = vld [vmem:[%s3546_s6 + $0xd] sm:$0x1]  ;;  %vm1834_vm12 = vweird.f32 %v3356_v43 }
 0x43a   : > { %v1766_v63 = vsel %vm3324_vm1, %v3274_v51, %v1762_v56  ;;  %v1782_v18 = vmul.f32 %v3283_v23, %v1781_v59  ;;  %v1801_v55 = vsub.f32 1.5, %v1800_v58  ;;  %v1820_v27 = vmul.f32 0.5, %v1819_v28  ;;  %v2080_v51 = vld [vmem:[%s3546_s6 + $0x8] sm:$0x1]  ;;  %vm1835_vm13 = vmor %vm1833_vm11, %vm1834_vm12 }
 0x43b   : > { %v1837_v32 = vmul.f32 %v1766_v63, %v1741_v4  ;;  %v1776_v13 = vsel %vm3338_vm4, %v3277_v24, %v1772_v34  ;;  %v1792_v11 = vmul.f32 %v3291_v52, %v1791_v47  ;;  %v1811_v57 = vsub.f32 1.5, %v1810_v1  ;;  %v2087_v1 = vld [vmem:[%s3546_s6 + $0xf] sm:$0x1] }
 0x43c   : > { %v1838_v44 = vmul.f32 %v1776_v13, %v1742_v17  ;;  %v1786_v24 = vsel %vm3351_vm5, %v3283_v23, %v1782_v18  ;;  %v1802_v14 = vmul.f32 %v3299_v48, %v1801_v55  ;;  %v1821_v49 = vsub.f32 1.5, %v1820_v27  ;;  %v2081_v23 = vld [vmem:[%s3546_s6 + $0x9] sm:$0x1] }
 0x43d   : > { %v1854_v29 = vmul.f32 %v1837_v32, %v3207_v3  ;;  %1878 = vst.msk [vmem:[%s3548_s8] sm:$0x1] %vm1630_vm3, %v1837_v32  ;;  %v1839_v39 = vmul.f32 %v1786_v24, %v1743_v9  ;;  %v1796_v22 = vsel %vm3369_vm7, %v3291_v52, %v1792_v11  ;;  %v1812_v3 = vmul.f32 %v3306_v62, %v1811_v57  ;;  %v2082_v52 = vld [vmem:[%s3546_s6 + $0xa] sm:$0x1] }
 0x43e   : > { %v1855_v6 = vmul.f32 %v1838_v44, %v3209_v46  ;;  %1879 = vst.msk [vmem:[%s3548_s8 + $0x1] sm:$0x1] %vm1630_vm3, %v1838_v44  ;;  %v1840_v21 = vmul.f32 %v1796_v22, %v1744_v60  ;;  %v1806_v41 = vsel %vm3384_vm8, %v3299_v48, %v1802_v14  ;;  %v1822_v46 = vmul.f32 %v3312_v61, %v1821_v49 }
 0x43f   : > { %v1862_v15 = vsub.f32 %v2080_v51, %v1854_v29  ;;  %v1856_v26 = vmul.f32 %v1839_v39, %v3217_v16  ;;  %1880 = vst.msk [vmem:[%s3548_s8 + $0x2] sm:$0x1] %vm1630_vm3, %v1839_v39  ;;  %v1841_v38 = vmul.f32 %v1806_v41, %v1745_v31  ;;  %v1816_v48 = vsel %vm3402_vm9, %v3306_v62, %v1812_v3  ;;  %v2084_v16 = vld [vmem:[%s3546_s6 + $0xc] sm:$0x1] }
 0x440   : > { %v1863_v7 = vsub.f32 %v2081_v23, %v1855_v6  ;;  %v1857_v8 = vmul.f32 %v1840_v21, %v3219_v42  ;;  %1881 = vst.msk [vmem:[%s3548_s8 + $0x3] sm:$0x1] %vm1630_vm3, %v1840_v21  ;;  %v1842_v37 = vmul.f32 %v1816_v48, %v1746_v50  ;;  %v1826_v10 = vsel %vm3425_vm10, %v3312_v61, %v1822_v46 }
 0x441   : > { %2088 = vst.msk [vmem:[%s3548_s8 + $0x8] sm:$0x1] %vm1630_vm3, %v1862_v15  ;;  %v1864_v42 = vsub.f32 %v2082_v52, %v1856_v26  ;;  %v1858_v62 = vmul.f32 %v1841_v38, %v3228_v45  ;;  %v1843_v19 = vmul.f32 %v1826_v10, %v1747_v30  ;;  %v1828_v4 = vmul.f32 %v3356_v43, %v3289_v53  ;;  %v2086_v45 = vld [vmem:[%s3546_s6 + $0xe] sm:$0x1]  ;;  %v1748_v53 = vld [vmem:[%s3546_s6 + $0x7] sm:$0x1] }
 0x442   : > { %2089 = vst.msk [vmem:[%s3548_s8 + $0x9] sm:$0x1] %vm1630_vm3, %v1863_v7  ;;  %v1865_v61 = vsub.f32 %v2083_v25, %v1857_v8  ;;  %v1859_v56 = vmul.f32 %v1842_v37, %v3237_v2 }
 0x443   : > { %2090 = vst.msk [vmem:[%s3548_s8 + $0xa] sm:$0x1] %vm1630_vm3, %v1864_v42  ;;  %v1866_v33 = vsub.f32 %v2084_v16, %v1858_v62  ;;  %v1860_v59 = vmul.f32 %v1843_v19, %v3241_v35  ;;  %v1829_v58 = vmul.f32 %v3356_v43, %v1828_v4 }
 0x444   : > { %2091 = vst.msk [vmem:[%s3548_s8 + $0xb] sm:$0x1] %vm1630_vm3, %v1865_v61  ;;  %v1867_v2 = vsub.f32 %v2085_v36, %v1859_v56 }
 0x445   : > { %2092 = vst.msk [vmem:[%s3548_s8 + $0xc] sm:$0x1] %vm1630_vm3, %v1866_v33  ;;  %v1868_v28 = vsub.f32 %v2086_v45, %v1860_v59  ;;  %v1830_v17 = vmul.f32 0.5, %v1829_v58 }
 0x446   : > { %1882 = vst.msk [vmem:[%s3548_s8 + $0x4] sm:$0x1] %vm1630_vm3, %v1841_v38 }
 0x447   : > { %2093 = vst.msk [vmem:[%s3548_s8 + $0xd] sm:$0x1] %vm1630_vm3, %v1867_v2  ;;  %v1831_v35 = vsub.f32 1.5, %v1830_v17 }
 0x448   : > { %1883 = vst.msk [vmem:[%s3548_s8 + $0x5] sm:$0x1] %vm1630_vm3, %v1842_v37 }
 0x449   : > { %2094 = vst.msk [vmem:[%s3548_s8 + $0xe] sm:$0x1] %vm1630_vm3, %v1868_v28  ;;  %v1832_v34 = vmul.f32 %v3356_v43, %v1831_v35 }
 0x44a   : > { %1884 = vst.msk [vmem:[%s3548_s8 + $0x6] sm:$0x1] %vm1630_vm3, %v1843_v19 }
 0x44b   : > { %v1836_v5 = vsel %vm1835_vm13, %v3356_v43, %v1832_v34 }
 0x44c   : > { %v1844_v47 = vmul.f32 %v1836_v5, %v1748_v53 }
 0x44e   : > { %v1861_v63 = vmul.f32 %v1844_v47, %v3250_v54  ;;  %1885 = vst.msk [vmem:[%s3548_s8 + $0x7] sm:$0x1] %vm1630_vm3, %v1844_v47 }
 0x450   : > { %v1869_v9 = vsub.f32 %v2087_v1, %v1861_v63 }
 0x452   : > { %2095 = vst.msk [vmem:[%s3548_s8 + $0xf] sm:$0x1] %vm1630_vm3, %v1869_v9 }
 0x453 PF: > { %s19_s27 = sadd.s32 1, %s2220_s27  }
 0x454   : > { %p16_p6 = scmp.ge.s32.totalorder %s19_s27, 4  }
 0x456   :  { %18 = sbr.rel (!%p16_p6) target bundleno = 1 (0x1), region = 122 }

</bundles_post_ra>
